<compile_context>
chip_gen: v7x
topology: tpu7x:2x2x1
jax: 0.10.0
libtpu: 0.0.40
codegen_flags: <defaults>
</compile_context>

<pallas_src>
import jax
import jax.numpy as jnp
from jax.experimental import pallas as pl
from jax.experimental.pallas import tpu as pltpu


# ----------------------------- model dimensions -----------------------------
ENT_NUM = 64            # number of entities
REL_NUM = 8             # number of relations (rel_emb has 2*REL_NUM rows)
E_EDGES = 96            # number of edges in edge_index_all
INPUT_DIM = 32          # args.hidden_units = "32,32,32"
N_UNITS = (32, 32, 32)
REL_INPUT_DIM = 32      # args.rel_hidden_units = "32,32,32"
ENT_DIM = 64            # original module hardcodes 300; scaled down for the demo
NAME_SIZE = 48          # word/char name feature size
ATTR_SIZE = 40          # attribute feature size
ATTR_DIM = 32           # args.attr_dim
REL_DIM = 16            # args.rel_dim
MODAL_NUM = 4           # args.inner_view_num  -> [name, gph, rel, attr]
JOINT_DIM = ENT_DIM + N_UNITS[2] + 2 * REL_DIM + ATTR_DIM   # tri_fc in_features (160)


# --------------------------- weight slab packing -----------------------------

def pack_weights(params):
    """Pack every weight/bias into ONE f32 slab (a single DMA) with 8-row-aligned
    sections addressed in-kernel via static (free) slices.

    Also builds:
      * 'view_w': block-diagonal weight applying gc1 (GCN support), att_fc, wc_fc and
                  rel_shared_fc (twice: in/out features) in ONE matmul.
      * 'view_b': matching fused bias row (att_b / rel_shared_b; gc1 bias is applied
                  after the adjacency matmul, exactly as in GraphConvolution).

    Returns (slab, layout) with layout[name] = (row0, rows, cols)."""
    in_dim, gcn_hid = params["gc1_w"].shape
    attr_size, attr_dim = params["att_w"].shape
    name_size, ent_dim = params["wc_w"].shape
    rel_num, rel_dim = params["rel_shared_w"].shape

    u_cols = in_dim + attr_size + name_size + 2 * rel_num      # fused input width (136)
    v_cols = gcn_hid + attr_dim + ent_dim + 2 * rel_dim        # fused output width (160)

    view_w = jnp.zeros((u_cols, v_cols), jnp.float32)
    r = c = 0
    view_w = view_w.at[r:r + in_dim, c:c + gcn_hid].set(params["gc1_w"])
    r += in_dim; c += gcn_hid
    view_w = view_w.at[r:r + attr_size, c:c + attr_dim].set(params["att_w"])
    r += attr_size; c += attr_dim
    view_w = view_w.at[r:r + name_size, c:c + ent_dim].set(params["wc_w"])
    r += name_size; c += ent_dim
    view_w = view_w.at[r:r + rel_num, c:c + rel_dim].set(params["rel_shared_w"])
    r += rel_num; c += rel_dim
    view_w = view_w.at[r:r + rel_num, c:c + rel_dim].set(params["rel_shared_w"])

    view_b = jnp.zeros((1, v_cols), jnp.float32)
    b0 = gcn_hid
    view_b = view_b.at[0, b0:b0 + attr_dim].set(params["att_b"])
    b0 = gcn_hid + attr_dim + ent_dim
    view_b = view_b.at[0, b0:b0 + rel_dim].set(params["rel_shared_b"])
    view_b = view_b.at[0, b0 + rel_dim:b0 + 2 * rel_dim].set(params["rel_shared_b"])

    entries = [
        ("view_w", view_w),
        ("view_b", view_b),
        ("gc1_b", params["gc1_b"].reshape(1, -1)),
        ("gc2_w", params["gc2_w"]),
        ("gc2_b", params["gc2_b"].reshape(1, -1)),
        ("fusion_w", params["fusion_weight"].reshape(1, -1)),
        ("tri_w", params["tri_w"]),
        ("rel_emb", params["rel_emb"]),
        ("ea1_ww", params["ea1"]["ww_w"]),
        ("ea1_rel", params["ea1"]["rel_w"]),
        ("ea2_ww", params["ea2"]["ww_w"]),
        ("ea2_rel", params["ea2"]["rel_w"]),
        ("hw1_w", params["hw1"]["w"]),
        ("hw1_b", params["hw1"]["b"].reshape(1, -1)),
        ("hw2_w", params["hw2"]["w"]),
        ("hw2_b", params["hw2"]["b"].reshape(1, -1)),
    ]
    width = max(a.shape[1] for _, a in entries)
    blocks, layout, row = [], {}, 0
    for name, a in entries:
        rows, cols = a.shape
        rpad = -(-rows // 8) * 8                               # 8-row-aligned sections
        blocks.append(jnp.pad(a, ((0, rpad - rows), (0, width - cols))))
        layout[name] = (row, rows, cols)
        row += rpad
    layout["_view_split"] = (gcn_hid, attr_dim, ent_dim, rel_dim)
    return jnp.concatenate(blocks, axis=0), layout


def _default_compute_dtype():
    # bf16 MXU operands (full-rate on v6e/v7x, f32 accumulation); keep f32 on v5e/older.
    try:
        kind = jax.devices()[0].device_kind.lower()
    except Exception:
        return jnp.float32
    return jnp.bfloat16 if ("v6" in kind or "v7" in kind) else jnp.float32


# ------------------------------ fused Pallas kernel ------------------------------

def make_encoder_forward(layout, compute_dtype=None):
    cdt = _default_compute_dtype() if compute_dtype is None else compute_dtype

    def kernel(wslab_ref, feat_ref, adj_ref, edge_ref, tailrow_ref,
               slab_o, tri_o, rel_o):
        f32 = jnp.float32
        gcn_hid, attr_dim, ent_dim, rel_dim = layout["_view_split"]
        n = adj_ref.shape[0]
        e = edge_ref.shape[0]
        r2 = layout["rel_emb"][1]

        def mm(a, b):
            return jnp.dot(a.astype(cdt), b.astype(cdt), preferred_element_type=f32)

        def W(name):                      # static slice into the weight slab (free view)
            r0, nr, nc = layout[name]
            return wslab_ref[r0:r0 + nr, 0:nc]

        # ---- all four view projections in ONE block-diagonal matmul -------------------
        v = mm(feat_ref[...], W("view_w")) + W("view_b")            # (N, 160)
        c0, c1 = 0, gcn_hid
        support = v[:, c0:c1]                                       # x0 @ gc1_w
        c0, c1 = c1, c1 + attr_dim
        att = v[:, c0:c1]                                           # att_fc(att_features)
        c0, c1 = c1, c1 + ent_dim
        name_e = v[:, c0:c1]                                        # wc_fc(name_emb)
        c0, c1 = c1, c1 + 2 * rel_dim
        ent_rel = v[:, c0:c1]                                       # cat([rel_in_f, rel_out_f], 1)

        # ---- structure view: 2-layer GCN ----------------------------------------------
        # TODO(synk): F.dropout between the GCN layers is training-only; eval semantics here.
        adj = adj_ref[...]
        h1 = jnp.maximum(mm(adj, support) + W("gc1_b"), 0.0)
        gph = mm(adj, mm(h1, W("gc2_w"))) + W("gc2_b")

        # ---- multi-view fusion: softmax view weights + per-row L2 normalize ----------
        fw = W("fusion_w")                                           # (1, modal_num)
        fe = jnp.exp(fw - jnp.max(fw, axis=-1, keepdims=True))
        wsm = fe / jnp.sum(fe, axis=-1, keepdims=True)

        def l2w(x, i):
            ss = jnp.sum(x * x, axis=-1, keepdims=True)
            # F.normalize(p=2, dim=1, eps=1e-12): x * rsqrt(max(||x||^2, 1e-24))
            return x * jax.lax.rsqrt(jnp.maximum(ss, 1e-24)) * wsm[0:1, i:i + 1]

        # ---- tri_fc as accumulated partial matmuls over static tri_w row slices ------
        t0, _, d_e = layout["tri_w"]
        r = t0
        joint = None
        for x_i, i in ((name_e, 0), (gph, 1), (ent_rel, 2), (att, 3)):
            part = mm(l2w(x_i, i), wslab_ref[r:r + x_i.shape[1], 0:d_e])
            joint = part if joint is None else joint + part
            r += x_i.shape[1]

        # ---- triple branch: one-hot gather/scatter matrices built in VMEM ------------
        head = edge_ref[:, 0:1]
        etype = edge_ref[:, 1:2]
        tail = edge_ref[:, 2:3]
        oh_head = (jax.lax.broadcasted_iota(jnp.int32, (e, n), 1) == head).astype(cdt)
        oh_type = (jax.lax.broadcasted_iota(jnp.int32, (e, r2), 1) == etype).astype(cdt)
        oh_tail_g = (jax.lax.broadcasted_iota(jnp.int32, (e, n), 1) == tail).astype(cdt)
        oh_tail_s = (jax.lax.broadcasted_iota(jnp.int32, (n, e), 0)
                     == tailrow_ref[...]).astype(cdt)

        def ea_layer(x, r_in, ww, relw):                    # EALayer(mode='add')
            r_emb = mm(r_in, ww)                            # ww: r_hidden -> e_hidden
            e_head = mm(oh_head, x)                         # x[edge_index[0]]   (MXU gather)
            e_rel = mm(oh_type, r_emb)                      # r_emb[edge_type]
            e_tail = mm(oh_tail_g, x)                       # x[edge_index[1]]
            h_r = e_head + e_rel                            # mode='add'
            # Edge scores via XLU lane reduce; softmax is GLOBAL over all edges,
            # exactly matching torch.softmax(dp_att, dim=-1) in the reference.
            s = jnp.sum(h_r * e_tail, axis=-1, keepdims=True)        # (E, 1)
            p = jnp.exp(s - jnp.max(s, axis=0, keepdims=True))
            attn = p / jnp.sum(p, axis=0, keepdims=True)             # (E, 1)
            x_e = jnp.maximum(mm(oh_tail_s, h_r * attn), 0.0)        # relu(scatter_add)
            return x_e, mm(r_in, relw)                      # rel: r_hidden -> r_hidden

        def highway(x1, x2, hw_w, hw_b):                    # FinalHighway
            g = jax.nn.sigmoid(mm(x1, hw_w) + hw_b)
            return g * x2 + (1.0 - g) * x1

        x_e, rel1 = ea_layer(joint, W("rel_emb"), W("ea1_ww"), W("ea1_rel"))
        x_e_1 = highway(joint, x_e, W("hw1_w"), W("hw1_b"))
        x_e, rel2 = ea_layer(x_e_1, rel1, W("ea2_ww"), W("ea2_rel"))
        x_e_2 = highway(x_e_1, x_e, W("hw2_w"), W("hw2_b"))

        # ---- lane-dense packed stores (3 output DMAs total) --------------------------
        rel_o[...] = rel2
        tri_o[...] = jnp.concatenate([x_e_1, x_e_2], axis=1)          # (N, 2*ent_dim)
        pieces = [gph, ent_rel, att, joint, name_e]
        pad = slab_o.shape[1] - sum(p_.shape[1] for p_ in pieces)
        if pad > 0:
            pieces.append(jnp.zeros((n, pad), f32))
        slab_o[...] = jnp.concatenate(pieces, axis=1)                 # (N, 256) lane-dense

    def forward(wslab, entity_emb, input_idx, e_adj, edge_index_all, rel_all,
                name_emb, rel_features_in, rel_features_out, att_features):
        ent_num = e_adj.shape[0]
        gcn_hid, attr_dim, ent_dim, rel_dim = layout["_view_split"]
        n_out = layout["gc2_b"][2]
        r2, r_hid = layout["rel_emb"][1], layout["rel_emb"][2]

        # JAX glue outside the fused kernel: entity-embedding row gather + packing the
        # per-call feature / edge-index slabs (weights were packed once, outside the step).
        x0 = jnp.take(entity_emb, input_idx, axis=0)
        feat = jnp.concatenate(
            [x0, att_features, name_emb, rel_features_in, rel_features_out], axis=1)
        edge_cols = jnp.stack(
            [edge_index_all[0], rel_all, edge_index_all[1], jnp.zeros_like(rel_all)],
            axis=1).astype(jnp.int32)                                  # (E, 4)
        tail_row = edge_index_all[1].astype(jnp.int32).reshape(1, -1)  # (1, E)

        total = n_out + 2 * rel_dim + attr_dim + 2 * ent_dim           # 224
        slab_w = -(-total // 128) * 128                                 # pad to 256 lanes

        out_shape = (
            jax.ShapeDtypeStruct((ent_num, slab_w), jnp.float32),       # packed per-entity slab
            jax.ShapeDtypeStruct((ent_num, 2 * ent_dim), jnp.float32),  # tri_emb
            jax.ShapeDtypeStruct((r2, r_hid), jnp.float32),             # rel_emb out
        )
        slab, tri_emb, rel_out = pl.pallas_call(
            kernel,
            out_shape=out_shape,
            in_specs=[pl.BlockSpec(memory_space=pltpu.MemorySpace.VMEM) for _ in range(5)],
            out_specs=tuple(pl.BlockSpec(memory_space=pltpu.MemorySpace.VMEM)
                            for _ in range(3)),
            compiler_params=pltpu.CompilerParams(vmem_limit_bytes=8 * 1024 * 1024),
        )(wslab, feat, e_adj, edge_cols, tail_row)

        c = 0
        gph_emb = slab[:, c:c + n_out]; c += n_out
        ent_rel_emb = slab[:, c:c + 2 * rel_dim]; c += 2 * rel_dim
        att_emb = slab[:, c:c + attr_dim]; c += attr_dim
        joint_emb = slab[:, c:c + ent_dim]; c += ent_dim
        name_out = slab[:, c:c + ent_dim]
        return gph_emb, ent_rel_emb, rel_out, att_emb, joint_emb, tri_emb, name_out

    return forward


# --------------------------- deterministic parameters ------------------------

def init_params(key):
    keys = iter(jax.random.split(key, 24))

    def lin_w(kk, fi, fo):
        return jax.random.normal(kk, (fi, fo), jnp.float32) / float(fi) ** 0.5

    p = {}
    p["entity_emb"] = (jax.random.normal(next(keys), (ENT_NUM, INPUT_DIM), jnp.float32)
                       / float(ENT_NUM) ** 0.5)
    # GCN (GraphConvolution weights stored as (in, out))
    p["gc1_w"] = lin_w(next(keys), N_UNITS[0], N_UNITS[1])
    p["gc1_b"] = jnp.zeros((N_UNITS[1],), jnp.float32)
    p["gc2_w"] = lin_w(next(keys), N_UNITS[1], N_UNITS[2])
    p["gc2_b"] = jnp.zeros((N_UNITS[2],), jnp.float32)
    # relation / attribute / name views
    p["rel_shared_w"] = lin_w(next(keys), REL_NUM, REL_DIM)
    p["rel_shared_b"] = 0.01 * jax.random.normal(next(keys), (REL_DIM,), jnp.float32)
    p["att_w"] = lin_w(next(keys), ATTR_SIZE, ATTR_DIM)
    p["att_b"] = 0.01 * jax.random.normal(next(keys), (ATTR_DIM,), jnp.float32)
    p["wc_w"] = lin_w(next(keys), NAME_SIZE, ENT_DIM)
    # fusion weight (modal_num, 1), init ones
    p["fusion_weight"] = jnp.ones((MODAL_NUM, 1), jnp.float32)
    # triple-GAT branch
    p["tri_w"] = lin_w(next(keys), JOINT_DIM, ENT_DIM)
    # TODO(synk): nn.init.sparse_(sparsity=0.15) replaced with dense normal init
    p["rel_emb"] = 0.1 * jax.random.normal(next(keys), (2 * REL_NUM, REL_INPUT_DIM), jnp.float32)
    for name in ("ea1", "ea2"):
        p[name] = {"ww_w": lin_w(next(keys), REL_INPUT_DIM, ENT_DIM),
                   "rel_w": lin_w(next(keys), REL_INPUT_DIM, REL_INPUT_DIM)}
    for name in ("hw1", "hw2"):
        p[name] = {"w": lin_w(next(keys), ENT_DIM, ENT_DIM),
                   "b": 0.01 * jax.random.normal(next(keys), (ENT_DIM,), jnp.float32)}
    return p


# ----------------------------------- main ------------------------------------

if __name__ == "__main__":
    key = jax.random.PRNGKey(0)
    pkey, dkey = jax.random.split(key)
    params = init_params(pkey)

    dks = jax.random.split(dkey, 8)
    input_idx = jnp.arange(ENT_NUM, dtype=jnp.int32)
    adj = (jax.random.uniform(dks[0], (ENT_NUM, ENT_NUM)) < 0.1).astype(jnp.float32)
    adj = adj + jnp.eye(ENT_NUM, dtype=jnp.float32)
    e_adj = adj / jnp.sum(adj, axis=1, keepdims=True)       # row-normalized dense adjacency
    edge_index_all = jax.random.randint(dks[1], (2, E_EDGES), 0, ENT_NUM, dtype=jnp.int32)
    rel_all = jax.random.randint(dks[2], (E_EDGES,), 0, 2 * REL_NUM, dtype=jnp.int32)
    name_emb = jax.random.normal(dks[3], (ENT_NUM, NAME_SIZE), jnp.float32)
    rel_features_in = jax.random.normal(dks[4], (ENT_NUM, REL_NUM), jnp.float32)
    rel_features_out = jax.random.normal(dks[5], (ENT_NUM, REL_NUM), jnp.float32)
    att_features = jax.random.normal(dks[6], (ENT_NUM, ATTR_SIZE), jnp.float32)

    # Pack every weight/bias into ONE slab outside the step (1 DMA instead of ~25).
    wslab, layout = pack_weights(params)
    wslab = jax.block_until_ready(wslab)

    fwd = jax.jit(make_encoder_forward(layout))
    outs = fwd(wslab, params["entity_emb"], input_idx, e_adj, edge_index_all, rel_all,
               name_emb, rel_features_in, rel_features_out, att_features)
    outs = jax.block_until_ready(outs)
    gph_emb, ent_rel_emb, rel_emb_out, att_emb, joint_emb, tri_emb, name_out = outs

    assert gph_emb.shape == (ENT_NUM, N_UNITS[2])
    assert ent_rel_emb.shape == (ENT_NUM, 2 * REL_DIM)
    assert rel_emb_out.shape == (2 * REL_NUM, REL_INPUT_DIM)
    assert att_emb.shape == (ENT_NUM, ATTR_DIM)
    assert joint_emb.shape == (ENT_NUM, ENT_DIM)
    assert tri_emb.shape == (ENT_NUM, 2 * ENT_DIM)
    assert name_out.shape == (ENT_NUM, ENT_DIM)
    assert all(bool(jnp.all(jnp.isfinite(o))) for o in outs)
    print("KERNEL_OK")
</pallas_src>

<mosaic_0001>
module attributes {stable_mosaic.version = 11 : i64} {
  func.func @kernel(%arg0: memref<648x160xf32, #tpu.memory_space<vmem>>, %arg1: memref<64x136xf32, #tpu.memory_space<vmem>>, %arg2: memref<64x64xf32, #tpu.memory_space<vmem>>, %arg3: memref<96x4xi32, #tpu.memory_space<vmem>>, %arg4: memref<1x96xi32, #tpu.memory_space<vmem>>, %arg5: memref<64x256xf32, #tpu.memory_space<vmem>>, %arg6: memref<64x128xf32, #tpu.memory_space<vmem>>, %arg7: memref<16x32xf32, #tpu.memory_space<vmem>>) attributes {dimension_semantics = [], scalar_prefetch = 0 : i64, scratch_operands = 0 : i64, tpu.core_type = #tpu.core_type<tc>} {
    %c0 = arith.constant 0 : index
    %c0_0 = arith.constant 0 : index
    %0 = vector.load %arg1[%c0, %c0_0] : memref<64x136xf32, #tpu.memory_space<vmem>>, vector<64x136xf32>
    %c0_1 = arith.constant 0 : index
    %c0_2 = arith.constant 0 : index
    %1 = vector.load %arg0[%c0_1, %c0_2] : memref<648x160xf32, #tpu.memory_space<vmem>>, vector<136x160xf32>
    %cst = arith.constant dense<0.000000e+00> : vector<64x160xf32>
    %2 = tpu.matmul %0, %1, %cst {dimension_numbers = #tpu.dot_dimension_numbers<[1], [0], [0], [1], [0, 0, 1, 1], [], []>} : vector<64x136xf32>, vector<136x160xf32>, vector<64x160xf32> -> vector<64x160xf32>
    %c136 = arith.constant 136 : index
    %c0_3 = arith.constant 0 : index
    %3 = vector.load %arg0[%c136, %c0_3] : memref<648x160xf32, #tpu.memory_space<vmem>>, vector<1x160xf32>
    %4 = vector.broadcast %3 : vector<1x160xf32> to vector<64x160xf32>
    %5 = arith.addf %2, %4 : vector<64x160xf32>
    %6 = vector.extract_strided_slice %5 {offsets = [0, 0], sizes = [64, 32], strides = [1, 1]} : vector<64x160xf32> to vector<64x32xf32>
    %7 = vector.extract_strided_slice %5 {offsets = [0, 32], sizes = [64, 32], strides = [1, 1]} : vector<64x160xf32> to vector<64x32xf32>
    %8 = vector.extract_strided_slice %5 {offsets = [0, 64], sizes = [64, 64], strides = [1, 1]} : vector<64x160xf32> to vector<64x64xf32>
    %9 = vector.extract_strided_slice %5 {offsets = [0, 128], sizes = [64, 32], strides = [1, 1]} : vector<64x160xf32> to vector<64x32xf32>
    %c0_4 = arith.constant 0 : index
    %c0_5 = arith.constant 0 : index
    %10 = vector.load %arg2[%c0_4, %c0_5] : memref<64x64xf32, #tpu.memory_space<vmem>>, vector<64x64xf32>
    %cst_6 = arith.constant dense<0.000000e+00> : vector<64x32xf32>
    %11 = tpu.matmul %10, %6, %cst_6 {dimension_numbers = #tpu.dot_dimension_numbers<[1], [0], [0], [1], [0, 0, 1, 1], [], []>} : vector<64x64xf32>, vector<64x32xf32>, vector<64x32xf32> -> vector<64x32xf32>
    %c144 = arith.constant 144 : index
    %c0_7 = arith.constant 0 : index
    %12 = vector.load %arg0[%c144, %c0_7] : memref<648x160xf32, #tpu.memory_space<vmem>>, vector<1x32xf32>
    %13 = vector.broadcast %12 : vector<1x32xf32> to vector<64x32xf32>
    %14 = arith.addf %11, %13 : vector<64x32xf32>
    %cst_8 = arith.constant 0.000000e+00 : f32
    %15 = vector.broadcast %cst_8 : f32 to vector<64x32xf32>
    %16 = arith.maximumf %14, %15 : vector<64x32xf32>
    %c152 = arith.constant 152 : index
    %c0_9 = arith.constant 0 : index
    %17 = vector.load %arg0[%c152, %c0_9] : memref<648x160xf32, #tpu.memory_space<vmem>>, vector<32x32xf32>
    %cst_10 = arith.constant dense<0.000000e+00> : vector<64x32xf32>
    %18 = tpu.matmul %16, %17, %cst_10 {dimension_numbers = #tpu.dot_dimension_numbers<[1], [0], [0], [1], [0, 0, 1, 1], [], []>} : vector<64x32xf32>, vector<32x32xf32>, vector<64x32xf32> -> vector<64x32xf32>
    %cst_11 = arith.constant dense<0.000000e+00> : vector<64x32xf32>
    %19 = tpu.matmul %10, %18, %cst_11 {dimension_numbers = #tpu.dot_dimension_numbers<[1], [0], [0], [1], [0, 0, 1, 1], [], []>} : vector<64x64xf32>, vector<64x32xf32>, vector<64x32xf32> -> vector<64x32xf32>
    %c184 = arith.constant 184 : index
    %c0_12 = arith.constant 0 : index
    %20 = vector.load %arg0[%c184, %c0_12] : memref<648x160xf32, #tpu.memory_space<vmem>>, vector<1x32xf32>
    %21 = vector.broadcast %20 : vector<1x32xf32> to vector<64x32xf32>
    %22 = arith.addf %19, %21 : vector<64x32xf32>
    %c192 = arith.constant 192 : index
    %c0_13 = arith.constant 0 : index
    %23 = vector.load %arg0[%c192, %c0_13] : memref<648x160xf32, #tpu.memory_space<vmem>>, vector<1x4xf32>
    %cst_14 = arith.constant dense<0xFF800000> : vector<1xf32>
    %24 = vector.multi_reduction <maximumf>, %23, %cst_14 [1] : vector<1x4xf32> to vector<1xf32>
    %25 = vector.shape_cast %24 : vector<1xf32> to vector<1x1xf32>
    %26 = vector.broadcast %25 : vector<1x1xf32> to vector<1x4xf32>
    %27 = arith.subf %23, %26 : vector<1x4xf32>
    %28 = math.exp %27 : vector<1x4xf32>
    %cst_15 = arith.constant dense<0.000000e+00> : vector<1xf32>
    %29 = vector.multi_reduction <add>, %28, %cst_15 [1] : vector<1x4xf32> to vector<1xf32>
    %30 = vector.shape_cast %29 : vector<1xf32> to vector<1x1xf32>
    %31 = vector.broadcast %30 : vector<1x1xf32> to vector<1x4xf32>
    %32 = arith.divf %28, %31 : vector<1x4xf32>
    %33 = arith.mulf %8, %8 : vector<64x64xf32>
    %cst_16 = arith.constant dense<0.000000e+00> : vector<64xf32>
    %34 = vector.multi_reduction <add>, %33, %cst_16 [1] : vector<64x64xf32> to vector<64xf32>
    %35 = vector.shape_cast %34 : vector<64xf32> to vector<64x1xf32>
    %cst_17 = arith.constant 1.000000e-24 : f32
    %36 = vector.broadcast %cst_17 : f32 to vector<64x1xf32>
    %37 = arith.maximumf %35, %36 : vector<64x1xf32>
    %38 = math.rsqrt %37 : vector<64x1xf32>
    %39 = vector.broadcast %38 : vector<64x1xf32> to vector<64x64xf32>
    %40 = arith.mulf %8, %39 : vector<64x64xf32>
    %41 = vector.extract_strided_slice %32 {offsets = [0, 0], sizes = [1, 1], strides = [1, 1]} : vector<1x4xf32> to vector<1x1xf32>
    %42 = vector.broadcast %41 : vector<1x1xf32> to vector<64x64xf32>
    %43 = arith.mulf %40, %42 : vector<64x64xf32>
    %c200 = arith.constant 200 : index
    %c0_18 = arith.constant 0 : index
    %44 = vector.load %arg0[%c200, %c0_18] : memref<648x160xf32, #tpu.memory_space<vmem>>, vector<64x64xf32>
    %cst_19 = arith.constant dense<0.000000e+00> : vector<64x64xf32>
    %45 = tpu.matmul %43, %44, %cst_19 {dimension_numbers = #tpu.dot_dimension_numbers<[1], [0], [0], [1], [0, 0, 1, 1], [], []>} : vector<64x64xf32>, vector<64x64xf32>, vector<64x64xf32> -> vector<64x64xf32>
    %46 = arith.mulf %22, %22 : vector<64x32xf32>
    %cst_20 = arith.constant dense<0.000000e+00> : vector<64xf32>
    %47 = vector.multi_reduction <add>, %46, %cst_20 [1] : vector<64x32xf32> to vector<64xf32>
    %48 = vector.shape_cast %47 : vector<64xf32> to vector<64x1xf32>
    %cst_21 = arith.constant 1.000000e-24 : f32
    %49 = vector.broadcast %cst_21 : f32 to vector<64x1xf32>
    %50 = arith.maximumf %48, %49 : vector<64x1xf32>
    %51 = math.rsqrt %50 : vector<64x1xf32>
    %52 = vector.broadcast %51 : vector<64x1xf32> to vector<64x32xf32>
    %53 = arith.mulf %22, %52 : vector<64x32xf32>
    %54 = vector.extract_strided_slice %32 {offsets = [0, 1], sizes = [1, 1], strides = [1, 1]} : vector<1x4xf32> to vector<1x1xf32>
    %55 = vector.broadcast %54 : vector<1x1xf32> to vector<64x32xf32>
    %56 = arith.mulf %53, %55 : vector<64x32xf32>
    %c264 = arith.constant 264 : index
    %c0_22 = arith.constant 0 : index
    %57 = vector.load %arg0[%c264, %c0_22] : memref<648x160xf32, #tpu.memory_space<vmem>>, vector<32x64xf32>
    %cst_23 = arith.constant dense<0.000000e+00> : vector<64x64xf32>
    %58 = tpu.matmul %56, %57, %cst_23 {dimension_numbers = #tpu.dot_dimension_numbers<[1], [0], [0], [1], [0, 0, 1, 1], [], []>} : vector<64x32xf32>, vector<32x64xf32>, vector<64x64xf32> -> vector<64x64xf32>
    %59 = arith.addf %45, %58 : vector<64x64xf32>
    %60 = arith.mulf %9, %9 : vector<64x32xf32>
    %cst_24 = arith.constant dense<0.000000e+00> : vector<64xf32>
    %61 = vector.multi_reduction <add>, %60, %cst_24 [1] : vector<64x32xf32> to vector<64xf32>
    %62 = vector.shape_cast %61 : vector<64xf32> to vector<64x1xf32>
    %cst_25 = arith.constant 1.000000e-24 : f32
    %63 = vector.broadcast %cst_25 : f32 to vector<64x1xf32>
    %64 = arith.maximumf %62, %63 : vector<64x1xf32>
    %65 = math.rsqrt %64 : vector<64x1xf32>
    %66 = vector.broadcast %65 : vector<64x1xf32> to vector<64x32xf32>
    %67 = arith.mulf %9, %66 : vector<64x32xf32>
    %68 = vector.extract_strided_slice %32 {offsets = [0, 2], sizes = [1, 1], strides = [1, 1]} : vector<1x4xf32> to vector<1x1xf32>
    %69 = vector.broadcast %68 : vector<1x1xf32> to vector<64x32xf32>
    %70 = arith.mulf %67, %69 : vector<64x32xf32>
    %c296 = arith.constant 296 : index
    %c0_26 = arith.constant 0 : index
    %71 = vector.load %arg0[%c296, %c0_26] : memref<648x160xf32, #tpu.memory_space<vmem>>, vector<32x64xf32>
    %cst_27 = arith.constant dense<0.000000e+00> : vector<64x64xf32>
    %72 = tpu.matmul %70, %71, %cst_27 {dimension_numbers = #tpu.dot_dimension_numbers<[1], [0], [0], [1], [0, 0, 1, 1], [], []>} : vector<64x32xf32>, vector<32x64xf32>, vector<64x64xf32> -> vector<64x64xf32>
    %73 = arith.addf %59, %72 : vector<64x64xf32>
    %74 = arith.mulf %7, %7 : vector<64x32xf32>
    %cst_28 = arith.constant dense<0.000000e+00> : vector<64xf32>
    %75 = vector.multi_reduction <add>, %74, %cst_28 [1] : vector<64x32xf32> to vector<64xf32>
    %76 = vector.shape_cast %75 : vector<64xf32> to vector<64x1xf32>
    %cst_29 = arith.constant 1.000000e-24 : f32
    %77 = vector.broadcast %cst_29 : f32 to vector<64x1xf32>
    %78 = arith.maximumf %76, %77 : vector<64x1xf32>
    %79 = math.rsqrt %78 : vector<64x1xf32>
    %80 = vector.broadcast %79 : vector<64x1xf32> to vector<64x32xf32>
    %81 = arith.mulf %7, %80 : vector<64x32xf32>
    %82 = vector.extract_strided_slice %32 {offsets = [0, 3], sizes = [1, 1], strides = [1, 1]} : vector<1x4xf32> to vector<1x1xf32>
    %83 = vector.broadcast %82 : vector<1x1xf32> to vector<64x32xf32>
    %84 = arith.mulf %81, %83 : vector<64x32xf32>
    %c328 = arith.constant 328 : index
    %c0_30 = arith.constant 0 : index
    %85 = vector.load %arg0[%c328, %c0_30] : memref<648x160xf32, #tpu.memory_space<vmem>>, vector<32x64xf32>
    %cst_31 = arith.constant dense<0.000000e+00> : vector<64x64xf32>
    %86 = tpu.matmul %84, %85, %cst_31 {dimension_numbers = #tpu.dot_dimension_numbers<[1], [0], [0], [1], [0, 0, 1, 1], [], []>} : vector<64x32xf32>, vector<32x64xf32>, vector<64x64xf32> -> vector<64x64xf32>
    %87 = arith.addf %73, %86 : vector<64x64xf32>
    %c0_32 = arith.constant 0 : index
    %c0_33 = arith.constant 0 : index
    %88 = vector.load %arg3[%c0_32, %c0_33] : memref<96x4xi32, #tpu.memory_space<vmem>>, vector<96x1xi32>
    %c0_34 = arith.constant 0 : index
    %c1 = arith.constant 1 : index
    %89 = vector.load %arg3[%c0_34, %c1] : memref<96x4xi32, #tpu.memory_space<vmem>>, vector<96x1xi32>
    %c0_35 = arith.constant 0 : index
    %c2 = arith.constant 2 : index
    %90 = vector.load %arg3[%c0_35, %c2] : memref<96x4xi32, #tpu.memory_space<vmem>>, vector<96x1xi32>
    %91 = tpu.iota {dimensions = array<i32: 1>} : vector<96x64xi32>
    %92 = vector.broadcast %88 : vector<96x1xi32> to vector<96x64xi32>
    %93 = arith.cmpi eq, %91, %92 : vector<96x64xi32>
    %94 = arith.extui %93 : vector<96x64xi1> to vector<96x64xi32>
    %95 = arith.sitofp %94 : vector<96x64xi32> to vector<96x64xf32>
    %96 = tpu.iota {dimensions = array<i32: 1>} : vector<96x16xi32>
    %97 = vector.broadcast %89 : vector<96x1xi32> to vector<96x16xi32>
    %98 = arith.cmpi eq, %96, %97 : vector<96x16xi32>
    %99 = arith.extui %98 : vector<96x16xi1> to vector<96x16xi32>
    %100 = arith.sitofp %99 : vector<96x16xi32> to vector<96x16xf32>
    %101 = tpu.iota {dimensions = array<i32: 1>} : vector<96x64xi32>
    %102 = vector.broadcast %90 : vector<96x1xi32> to vector<96x64xi32>
    %103 = arith.cmpi eq, %101, %102 : vector<96x64xi32>
    %104 = arith.extui %103 : vector<96x64xi1> to vector<96x64xi32>
    %105 = arith.sitofp %104 : vector<96x64xi32> to vector<96x64xf32>
    %106 = tpu.iota {dimensions = array<i32: 0>} : vector<64x96xi32>
    %c0_36 = arith.constant 0 : index
    %c0_37 = arith.constant 0 : index
    %107 = vector.load %arg4[%c0_36, %c0_37] : memref<1x96xi32, #tpu.memory_space<vmem>>, vector<1x96xi32>
    %108 = vector.broadcast %107 : vector<1x96xi32> to vector<64x96xi32>
    %109 = arith.cmpi eq, %106, %108 : vector<64x96xi32>
    %110 = arith.extui %109 : vector<64x96xi1> to vector<64x96xi32>
    %111 = arith.sitofp %110 : vector<64x96xi32> to vector<64x96xf32>
    %c360 = arith.constant 360 : index
    %c0_38 = arith.constant 0 : index
    %112 = vector.load %arg0[%c360, %c0_38] : memref<648x160xf32, #tpu.memory_space<vmem>>, vector<16x32xf32>
    %c376 = arith.constant 376 : index
    %c0_39 = arith.constant 0 : index
    %113 = vector.load %arg0[%c376, %c0_39] : memref<648x160xf32, #tpu.memory_space<vmem>>, vector<32x64xf32>
    %c408 = arith.constant 408 : index
    %c0_40 = arith.constant 0 : index
    %114 = vector.load %arg0[%c408, %c0_40] : memref<648x160xf32, #tpu.memory_space<vmem>>, vector<32x32xf32>
    %cst_41 = arith.constant dense<0.000000e+00> : vector<16x64xf32>
    %115 = tpu.matmul %112, %113, %cst_41 {dimension_numbers = #tpu.dot_dimension_numbers<[1], [0], [0], [1], [0, 0, 1, 1], [], []>} : vector<16x32xf32>, vector<32x64xf32>, vector<16x64xf32> -> vector<16x64xf32>
    %cst_42 = arith.constant dense<0.000000e+00> : vector<96x64xf32>
    %116 = tpu.matmul %95, %87, %cst_42 {dimension_numbers = #tpu.dot_dimension_numbers<[1], [0], [0], [1], [0, 0, 1, 1], [], []>} : vector<96x64xf32>, vector<64x64xf32>, vector<96x64xf32> -> vector<96x64xf32>
    %cst_43 = arith.constant dense<0.000000e+00> : vector<96x64xf32>
    %117 = tpu.matmul %100, %115, %cst_43 {dimension_numbers = #tpu.dot_dimension_numbers<[1], [0], [0], [1], [0, 0, 1, 1], [], []>} : vector<96x16xf32>, vector<16x64xf32>, vector<96x64xf32> -> vector<96x64xf32>
    %cst_44 = arith.constant dense<0.000000e+00> : vector<96x64xf32>
    %118 = tpu.matmul %105, %87, %cst_44 {dimension_numbers = #tpu.dot_dimension_numbers<[1], [0], [0], [1], [0, 0, 1, 1], [], []>} : vector<96x64xf32>, vector<64x64xf32>, vector<96x64xf32> -> vector<96x64xf32>
    %119 = arith.addf %116, %117 : vector<96x64xf32>
    %120 = arith.mulf %119, %118 : vector<96x64xf32>
    %cst_45 = arith.constant dense<0.000000e+00> : vector<96xf32>
    %121 = vector.multi_reduction <add>, %120, %cst_45 [1] : vector<96x64xf32> to vector<96xf32>
    %122 = vector.shape_cast %121 : vector<96xf32> to vector<96x1xf32>
    %cst_46 = arith.constant dense<0xFF800000> : vector<1xf32>
    %123 = vector.multi_reduction <maximumf>, %122, %cst_46 [0] : vector<96x1xf32> to vector<1xf32>
    %124 = vector.shape_cast %123 : vector<1xf32> to vector<1x1xf32>
    %125 = vector.broadcast %124 : vector<1x1xf32> to vector<96x1xf32>
    %126 = arith.subf %122, %125 : vector<96x1xf32>
    %127 = math.exp %126 : vector<96x1xf32>
    %cst_47 = arith.constant dense<0.000000e+00> : vector<1xf32>
    %128 = vector.multi_reduction <add>, %127, %cst_47 [0] : vector<96x1xf32> to vector<1xf32>
    %129 = vector.shape_cast %128 : vector<1xf32> to vector<1x1xf32>
    %130 = vector.broadcast %129 : vector<1x1xf32> to vector<96x1xf32>
    %131 = arith.divf %127, %130 : vector<96x1xf32>
    %132 = vector.broadcast %131 : vector<96x1xf32> to vector<96x64xf32>
    %133 = arith.mulf %119, %132 : vector<96x64xf32>
    %cst_48 = arith.constant dense<0.000000e+00> : vector<64x64xf32>
    %134 = tpu.matmul %111, %133, %cst_48 {dimension_numbers = #tpu.dot_dimension_numbers<[1], [0], [0], [1], [0, 0, 1, 1], [], []>} : vector<64x96xf32>, vector<96x64xf32>, vector<64x64xf32> -> vector<64x64xf32>
    %cst_49 = arith.constant 0.000000e+00 : f32
    %135 = vector.broadcast %cst_49 : f32 to vector<64x64xf32>
    %136 = arith.maximumf %134, %135 : vector<64x64xf32>
    %cst_50 = arith.constant dense<0.000000e+00> : vector<16x32xf32>
    %137 = tpu.matmul %112, %114, %cst_50 {dimension_numbers = #tpu.dot_dimension_numbers<[1], [0], [0], [1], [0, 0, 1, 1], [], []>} : vector<16x32xf32>, vector<32x32xf32>, vector<16x32xf32> -> vector<16x32xf32>
    %c504 = arith.constant 504 : index
    %c0_51 = arith.constant 0 : index
    %138 = vector.load %arg0[%c504, %c0_51] : memref<648x160xf32, #tpu.memory_space<vmem>>, vector<64x64xf32>
    %c568 = arith.constant 568 : index
    %c0_52 = arith.constant 0 : index
    %139 = vector.load %arg0[%c568, %c0_52] : memref<648x160xf32, #tpu.memory_space<vmem>>, vector<1x64xf32>
    %cst_53 = arith.constant dense<0.000000e+00> : vector<64x64xf32>
    %140 = tpu.matmul %87, %138, %cst_53 {dimension_numbers = #tpu.dot_dimension_numbers<[1], [0], [0], [1], [0, 0, 1, 1], [], []>} : vector<64x64xf32>, vector<64x64xf32>, vector<64x64xf32> -> vector<64x64xf32>
    %141 = vector.broadcast %139 : vector<1x64xf32> to vector<64x64xf32>
    %142 = arith.addf %140, %141 : vector<64x64xf32>
    %143 = arith.negf %142 : vector<64x64xf32>
    %144 = math.exp %143 : vector<64x64xf32>
    %cst_54 = arith.constant 1.000000e+00 : f32
    %145 = vector.broadcast %cst_54 : f32 to vector<64x64xf32>
    %146 = arith.addf %145, %144 : vector<64x64xf32>
    %147 = arith.divf %145, %146 : vector<64x64xf32>
    %148 = arith.mulf %147, %136 : vector<64x64xf32>
    %cst_55 = arith.constant 1.000000e+00 : f32
    %149 = vector.broadcast %cst_55 : f32 to vector<64x64xf32>
    %150 = arith.subf %149, %147 : vector<64x64xf32>
    %151 = arith.mulf %150, %87 : vector<64x64xf32>
    %152 = arith.addf %148, %151 : vector<64x64xf32>
    %c440 = arith.constant 440 : index
    %c0_56 = arith.constant 0 : index
    %153 = vector.load %arg0[%c440, %c0_56] : memref<648x160xf32, #tpu.memory_space<vmem>>, vector<32x64xf32>
    %c472 = arith.constant 472 : index
    %c0_57 = arith.constant 0 : index
    %154 = vector.load %arg0[%c472, %c0_57] : memref<648x160xf32, #tpu.memory_space<vmem>>, vector<32x32xf32>
    %cst_58 = arith.constant dense<0.000000e+00> : vector<16x64xf32>
    %155 = tpu.matmul %137, %153, %cst_58 {dimension_numbers = #tpu.dot_dimension_numbers<[1], [0], [0], [1], [0, 0, 1, 1], [], []>} : vector<16x32xf32>, vector<32x64xf32>, vector<16x64xf32> -> vector<16x64xf32>
    %cst_59 = arith.constant dense<0.000000e+00> : vector<96x64xf32>
    %156 = tpu.matmul %95, %152, %cst_59 {dimension_numbers = #tpu.dot_dimension_numbers<[1], [0], [0], [1], [0, 0, 1, 1], [], []>} : vector<96x64xf32>, vector<64x64xf32>, vector<96x64xf32> -> vector<96x64xf32>
    %cst_60 = arith.constant dense<0.000000e+00> : vector<96x64xf32>
    %157 = tpu.matmul %100, %155, %cst_60 {dimension_numbers = #tpu.dot_dimension_numbers<[1], [0], [0], [1], [0, 0, 1, 1], [], []>} : vector<96x16xf32>, vector<16x64xf32>, vector<96x64xf32> -> vector<96x64xf32>
    %cst_61 = arith.constant dense<0.000000e+00> : vector<96x64xf32>
    %158 = tpu.matmul %105, %152, %cst_61 {dimension_numbers = #tpu.dot_dimension_numbers<[1], [0], [0], [1], [0, 0, 1, 1], [], []>} : vector<96x64xf32>, vector<64x64xf32>, vector<96x64xf32> -> vector<96x64xf32>
    %159 = arith.addf %156, %157 : vector<96x64xf32>
    %160 = arith.mulf %159, %158 : vector<96x64xf32>
    %cst_62 = arith.constant dense<0.000000e+00> : vector<96xf32>
    %161 = vector.multi_reduction <add>, %160, %cst_62 [1] : vector<96x64xf32> to vector<96xf32>
    %162 = vector.shape_cast %161 : vector<96xf32> to vector<96x1xf32>
    %cst_63 = arith.constant dense<0xFF800000> : vector<1xf32>
    %163 = vector.multi_reduction <maximumf>, %162, %cst_63 [0] : vector<96x1xf32> to vector<1xf32>
    %164 = vector.shape_cast %163 : vector<1xf32> to vector<1x1xf32>
    %165 = vector.broadcast %164 : vector<1x1xf32> to vector<96x1xf32>
    %166 = arith.subf %162, %165 : vector<96x1xf32>
    %167 = math.exp %166 : vector<96x1xf32>
    %cst_64 = arith.constant dense<0.000000e+00> : vector<1xf32>
    %168 = vector.multi_reduction <add>, %167, %cst_64 [0] : vector<96x1xf32> to vector<1xf32>
    %169 = vector.shape_cast %168 : vector<1xf32> to vector<1x1xf32>
    %170 = vector.broadcast %169 : vector<1x1xf32> to vector<96x1xf32>
    %171 = arith.divf %167, %170 : vector<96x1xf32>
    %172 = vector.broadcast %171 : vector<96x1xf32> to vector<96x64xf32>
    %173 = arith.mulf %159, %172 : vector<96x64xf32>
    %cst_65 = arith.constant dense<0.000000e+00> : vector<64x64xf32>
    %174 = tpu.matmul %111, %173, %cst_65 {dimension_numbers = #tpu.dot_dimension_numbers<[1], [0], [0], [1], [0, 0, 1, 1], [], []>} : vector<64x96xf32>, vector<96x64xf32>, vector<64x64xf32> -> vector<64x64xf32>
    %cst_66 = arith.constant 0.000000e+00 : f32
    %175 = vector.broadcast %cst_66 : f32 to vector<64x64xf32>
    %176 = arith.maximumf %174, %175 : vector<64x64xf32>
    %cst_67 = arith.constant dense<0.000000e+00> : vector<16x32xf32>
    %177 = tpu.matmul %137, %154, %cst_67 {dimension_numbers = #tpu.dot_dimension_numbers<[1], [0], [0], [1], [0, 0, 1, 1], [], []>} : vector<16x32xf32>, vector<32x32xf32>, vector<16x32xf32> -> vector<16x32xf32>
    %c576 = arith.constant 576 : index
    %c0_68 = arith.constant 0 : index
    %178 = vector.load %arg0[%c576, %c0_68] : memref<648x160xf32, #tpu.memory_space<vmem>>, vector<64x64xf32>
    %c640 = arith.constant 640 : index
    %c0_69 = arith.constant 0 : index
    %179 = vector.load %arg0[%c640, %c0_69] : memref<648x160xf32, #tpu.memory_space<vmem>>, vector<1x64xf32>
    %cst_70 = arith.constant dense<0.000000e+00> : vector<64x64xf32>
    %180 = tpu.matmul %152, %178, %cst_70 {dimension_numbers = #tpu.dot_dimension_numbers<[1], [0], [0], [1], [0, 0, 1, 1], [], []>} : vector<64x64xf32>, vector<64x64xf32>, vector<64x64xf32> -> vector<64x64xf32>
    %181 = vector.broadcast %179 : vector<1x64xf32> to vector<64x64xf32>
    %182 = arith.addf %180, %181 : vector<64x64xf32>
    %183 = arith.negf %182 : vector<64x64xf32>
    %184 = math.exp %183 : vector<64x64xf32>
    %cst_71 = arith.constant 1.000000e+00 : f32
    %185 = vector.broadcast %cst_71 : f32 to vector<64x64xf32>
    %186 = arith.addf %185, %184 : vector<64x64xf32>
    %187 = arith.divf %185, %186 : vector<64x64xf32>
    %188 = arith.mulf %187, %176 : vector<64x64xf32>
    %cst_72 = arith.constant 1.000000e+00 : f32
    %189 = vector.broadcast %cst_72 : f32 to vector<64x64xf32>
    %190 = arith.subf %189, %187 : vector<64x64xf32>
    %191 = arith.mulf %190, %152 : vector<64x64xf32>
    %192 = arith.addf %188, %191 : vector<64x64xf32>
    %c0_73 = arith.constant 0 : index
    %c0_74 = arith.constant 0 : index
    %193 = vector.load %arg7[%c0_73, %c0_74] : memref<16x32xf32, #tpu.memory_space<vmem>>, vector<16x32xf32>
    tpu.vector_store %arg7[%c0_73, %c0_74], %177 {strides = array<i32>} : memref<16x32xf32, #tpu.memory_space<vmem>>, vector<16x32xf32>,
    %194 = tpu.concatenate %152, %192 in 1 : vector<64x64xf32>, vector<64x64xf32> -> vector<64x128xf32>
    %c0_75 = arith.constant 0 : index
    %c0_76 = arith.constant 0 : index
    %195 = vector.load %arg6[%c0_75, %c0_76] : memref<64x128xf32, #tpu.memory_space<vmem>>, vector<64x128xf32>
    tpu.vector_store %arg6[%c0_75, %c0_76], %194 {strides = array<i32>} : memref<64x128xf32, #tpu.memory_space<vmem>>, vector<64x128xf32>,
    %cst_77 = arith.constant 0.000000e+00 : f32
    %196 = vector.broadcast %cst_77 : f32 to vector<64x32xf32>
    %197 = tpu.concatenate %22, %9, %7, %87, %8, %196 in 1 : vector<64x32xf32>, vector<64x32xf32>, vector<64x32xf32>, vector<64x64xf32>, vector<64x64xf32>, vector<64x32xf32> -> vector<64x256xf32>
    %c0_78 = arith.constant 0 : index
    %c0_79 = arith.constant 0 : index
    %198 = vector.load %arg5[%c0_78, %c0_79] : memref<64x256xf32, #tpu.memory_space<vmem>>, vector<64x256xf32>
    tpu.vector_store %arg5[%c0_78, %c0_79], %197 {strides = array<i32>} : memref<64x256xf32, #tpu.memory_space<vmem>>, vector<64x256xf32>,
    return
  }
}

</mosaic_0001>

<bundles_post_ra>
// kernel: forward.1
= control target key start
LH: loop header
LB: loop body
LE: loop exit
PB: predicated region body
PF: predicated region fallthrough
CT: control target
= control target key end

     0   :  { %13 = vsyncpa [#allocation3], 0  ;;  %vm88_vm0 = vcmask 64512   ;;  %vm614_vm1 = vcmask 31744   ;;  %s7774_s0 = inlined_call_operand.vmem [shape: f32[648,160], index: 0, kind: input, shape index: {}]   ;;  %s7775_s1 = inlined_call_operand.vmem [shape: f32[64,136], index: 1, kind: input, shape index: {}]   ;;  %s7776_s2 = inlined_call_operand.vmem [shape: f32[64,64], index: 2, kind: input, shape index: {}]   ;;  %s7777_s3 = inlined_call_operand.vmem [shape: s32[96,4], index: 3, kind: input, shape index: {}]   ;;  %s7778_s4 = inlined_call_operand.vmem [shape: s32[1,96], index: 4, kind: input, shape index: {}]   ;;  %s7779_s5 = inlined_call_operand.vmem [shape: f32[64,256], index: 5, kind: output, shape index: {0}]   ;;  %s7780_s6 = inlined_call_operand.hbm [shape: f32[64,128], index: 6, kind: output, shape index: {1}]   ;;  %s7781_s7 = inlined_call_operand.hbm [shape: f32[16,32], index: 7, kind: output, shape index: {2}]  }
   0x1   :  { %v42_v0 = vld [vmem:[%s7774_s0 + $0x8] sm:$0xff]  ;;  %v44_v1 = vld [vmem:[%s7774_s0 + $0x18] sm:$0xff]  ;;  %v41_v2 = vld [vmem:[%s7774_s0] sm:$0xff] }
   0x2   :  { %v5269_v3 = vpack.c.bf16 %v44_v1, %v42_v0  ;;  %v43_v4 = vld [vmem:[%s7774_s0 + $0x10] sm:$0xff]  ;;  %v46_v5 = vld [vmem:[%s7774_s0 + $0x28] sm:$0xff]  ;;  %v48_v6 = vld [vmem:[%s7774_s0 + $0x38] sm:$0xff] }
   0x3   :  { %v5271_v7 = vpack.c.bf16 %v43_v4, %v41_v2  ;;  %v5273_v8 = vpack.c.bf16 %v48_v6, %v46_v5  ;;  %v45_v9 = vld [vmem:[%s7774_s0 + $0x20] sm:$0xff]  ;;  %v47_v10 = vld [vmem:[%s7774_s0 + $0x30] sm:$0xff]  ;;  %v50_v11 = vld [vmem:[%s7774_s0 + $0x48] sm:$0xff] }
   0x4   :  { %5270 = vmatprep.subr.bf16.mxu0 %v5269_v3  ;;  %v52_v12 = vld [vmem:[%s7774_s0 + $0x58] sm:$0xff]  ;;  %v5275_v13 = vpack.c.bf16 %v47_v10, %v45_v9  ;;  %v49_v15 = vld [vmem:[%s7774_s0 + $0x40] sm:$0xff]  ;;  %v51_v16 = vld [vmem:[%s7774_s0 + $0x50] sm:$0xff] }
   0x5   :  { %5272 = vmatpush1.bf16.msra.mxu0 %v5271_v7  ;;  %v5277_v14 = vpack.c.bf16 %v52_v12, %v50_v11  ;;  %v54_v17 = vld [vmem:[%s7774_s0 + $0x68] sm:$0xff]  ;;  %v56_v18 = vld [vmem:[%s7774_s0 + $0x78] sm:$0xff]  ;;  %v5279_v19 = vpack.c.bf16 %v51_v16, %v49_v15  ;;  %v53_v21 = vld [vmem:[%s7774_s0 + $0x60] sm:$0xff] }
   0x6   :  { %5274 = vmatprep.subr.bf16.mxu0 %v5273_v8  ;;  %v5281_v20 = vpack.c.bf16 %v56_v18, %v54_v17  ;;  %v55_v22 = vld [vmem:[%s7774_s0 + $0x70] sm:$0xff]  ;;  %v58_v23 = vld [vmem:[%s7774_s0 + $0x88] sm:$0xff]  ;;  %v60_v24 = vld [vmem:[%s7774_s0 + $0x98] sm:$0xff] }
   0x7   :  { %v26_v25 = vld [vmem:[%s7775_s1 + $0x8] sm:$0xff]  ;;  %v5283_v26 = vpack.c.bf16 %v55_v22, %v53_v21  ;;  %v5285_v27 = vpack.c.bf16 %v60_v24, %v58_v23  ;;  %v57_v28 = vld [vmem:[%s7774_s0 + $0x80] sm:$0xff]  ;;  %v59_v29 = vld [vmem:[%s7774_s0 + $0x90] sm:$0xff] }
   0x8   :  { %4216 = vmatprep.mubr.msk.f32.mxu0 %vm88_vm0, %v26_v25  ;;  %v62_v30 = vld [vmem:[%s7774_s0 + $0xa8] sm:$0xff]  ;;  %v64_v31 = vld [vmem:[%s7774_s0 + $0xb8] sm:$0xff]  ;;  %v5287_v32 = vpack.c.bf16 %v59_v29, %v57_v28  ;;  %v6001_v33 = vld [vmem:[%s7774_s0 + $0x180] ss:$0 sm:$0xff] }
   0x9   :  { %5276 = vmatpush1.bf16.msra.mxu0 %v5275_v13  ;;  %v5289_v34 = vpack.c.bf16 %v64_v31, %v62_v30  ;;  %v61_v35 = vld [vmem:[%s7774_s0 + $0xa0] sm:$0xff]  ;;  %v63_v36 = vld [vmem:[%s7774_s0 + $0xb0] sm:$0xff]  ;;  %v615_v37 = vsel %vm614_vm1, %v6001_v33, -inf }
   0xa   :  { %5278 = vmatprep.subr.bf16.mxu0 %v5277_v14 }
   0xd   :  { %5280 = vmatpush1.bf16.msra.mxu0 %v5279_v19 }
   0xe   :  { %5282 = vmatprep.subr.bf16.mxu0 %v5281_v20 }
  0x11   :  { %5284 = vmatpush1.bf16.msra.mxu0 %v5283_v26 }
  0x12   :  { %5286 = vmatprep.subr.bf16.mxu0 %v5285_v27 }
  0x13   :  { %14 = vsyncpa [#allocation5], 0  ;;  %v66_v38 = vld [vmem:[%s7774_s0 + $0xc8] sm:$0xff]  ;;  %v68_v39 = vld [vmem:[%s7774_s0 + $0xd8] sm:$0xff]  ;;  %616 = vmax.xlane.f32.xlu0 %v615_v37  ;;  %v5291_v40 = vpack.c.bf16 %v63_v36, %v61_v35  ;;  %vm235_vm2 = vcmask 523264   ;;  %v78_v11 = vlaneseq  ;;  %s5876_s16 = smov 64  }
  0x14   :  { %v5293_v41 = vpack.c.bf16 %v68_v39, %v66_v38  ;;  %v65_v42 = vld [vmem:[%s7774_s0 + $0xc0] sm:$0xff]  ;;  %v67_v43 = vld [vmem:[%s7774_s0 + $0xd0] sm:$0xff]  ;;  %v70_v44 = vld [vmem:[%s7774_s0 + $0xe8] sm:$0xff]  ;;  %s5877_s17 = smov 96   ;;  %vm377_vm3 = vcmask 261120   ;;  %vm1890_vm4 = vcmask 130048  }
  0x15   :  { %5288 = vmatpush1.bf16.msra.mxu0 %v5287_v32  ;;  %v72_v45 = vld [vmem:[%s7774_s0 + $0xf8] sm:$0xff]  ;;  %v5295_v46 = vpack.c.bf16 %v67_v43, %v65_v42  ;;  %v69_v48 = vld [vmem:[%s7774_s0 + $0xe0] sm:$0xff]  ;;  %v71_v49 = vld [vmem:[%s7774_s0 + $0xf0] sm:$0xff]  ;;  %v6113_v12 = vshrl.u32 %v78_v11, 7  ;;  %s5883_s19 = smov 32  }
  0x16   :  { %5290 = vmatprep.subr.bf16.mxu0 %v5289_v34  ;;  %v5297_v47 = vpack.c.bf16 %v72_v45, %v70_v44  ;;  %v5299_v50 = vpack.c.bf16 %v71_v49, %v69_v48  ;;  %v74_v51 = vld [vmem:[%s7774_s0 + $0x108] sm:$0xff]  ;;  %v73_v52 = vld [vmem:[%s7774_s0 + $0x100] sm:$0xff]  ;;  %v28_v54 = vld [vmem:[%s7775_s1 + $0x18] sm:$0xff] }
  0x17   :  { %v25_v53 = vld [vmem:[%s7775_s1] sm:$0xff]  ;;  %v27_v55 = vld [vmem:[%s7775_s1 + $0x10] sm:$0xff]  ;;  %v30_v56 = vld [vmem:[%s7775_s1 + $0x28] sm:$0xff]  ;;  %v80_v13 = vsub.s32 0, %v6113_v12  ;;  %v84_v17 = vsub.s32 1, %v6113_v12 }
  0x18   :  { %v29_v57 = vld [vmem:[%s7775_s1 + $0x20] sm:$0xff]  ;;  %v32_v58 = vld [vmem:[%s7775_s1 + $0x38] sm:$0xff]  ;;  %v31_v59 = vld [vmem:[%s7775_s1 + $0x30] sm:$0xff] }
  0x19   :  { %5292 = vmatpush1.bf16.msra.mxu0 %v5291_v40  ;;  %v34_v60 = vld [vmem:[%s7775_s1 + $0x48] sm:$0xff]  ;;  %v33_v61 = vld [vmem:[%s7775_s1 + $0x40] sm:$0xff]  ;;  %v36_v62 = vld [vmem:[%s7775_s1 + $0x58] sm:$0xff] }
  0x1a   :  { %5294 = vmatprep.subr.bf16.mxu0 %v5293_v41  ;;  %v35_v63 = vld [vmem:[%s7775_s1 + $0x50] sm:$0xff]  ;;  %v38_v0 = vld [vmem:[%s7775_s1 + $0x68] sm:$0xff]  ;;  %v37_v1 = vld [vmem:[%s7775_s1 + $0x60] sm:$0xff] }
  0x1b   :  { %v40_v2 = vld [vmem:[%s7775_s1 + $0x78] sm:$0xff]  ;;  %v39_v3 = vld [vmem:[%s7775_s1 + $0x70] sm:$0xff]  ;;  %v6096_v4 = vld [vmem:[%s7776_s2] sm:$0xff] }
  0x1c   :  { %v6104_v8 = vld [vmem:[%s7776_s2 + $0x20] sm:$0xff]  ;;  %v4215_v14 = vld [vmem:[%s7774_s0 + $0x110] ss:$8 sm:$0x3] }
  0x1d   :  { %5296 = vmatpush1.bf16.msra.mxu0 %v5295_v46  ;;  %4775 = vmatprep.mubr.msk.f32.mxu1 %vm235_vm2, %v6104_v8  ;;  %v81_v15 = vrot.slane %v4215_v14, %v80_v13  ;;  %v6126_v21 = vrot.slane %v4215_v14, %v84_v17 }
  0x1e   :  { %5298 = vmatprep.subr.bf16.mxu0 %v5297_v47 }
  0x21   :  { %5300 = vmatpush1.bf16.msra.mxu0 %v5299_v50 }
  0x22   :  { %145 = vmatprep.subr.mxu0 %v74_v51 }
  0x25   :  { %146 = vmatpush1.msra.mxu0 %v73_v52 }
  0x26   :  { %178 = vmatmul.mubr.f32.vlgmr.msra.gmra.mrb[0].mxu0 %v25_v53 }
  0x27   :  { %4217 = vmatprep.mubr.msk.f32.mxu0 %vm88_vm0, %v28_v54 }
  0x2a   :  { %184 = vmatmul.mubr.f32.gmra.mrb[2].mxu0 %v27_v55 }
  0x2b   :  { %4218 = vmatprep.mubr.msk.f32.mxu0 %vm88_vm0, %v30_v56  ;;  %v6196_v56 = vld [vmem:[%s7776_s2 + $0x8] sm:$0xff] }
  0x2e   :  { %190 = vmatmul.mubr.f32.gmra.mrb[4].mxu0 %v29_v57  ;;  %v6201_v57 = vld [vmem:[%s7776_s2 + $0x28] sm:$0xff] }
  0x2f   :  { %4219 = vmatprep.mubr.msk.f32.mxu0 %vm88_vm0, %v32_v58  ;;  %v6206_v58 = vld [vmem:[%s7776_s2 + $0x10] sm:$0xff] }
  0x32   :  { %196 = vmatmul.mubr.f32.gmra.mrb[6].mxu0 %v31_v59  ;;  %v6211_v59 = vld [vmem:[%s7776_s2 + $0x30] sm:$0xff] }
  0x33   :  { %4220 = vmatprep.mubr.msk.f32.mxu0 %vm88_vm0, %v34_v60  ;;  %v6223_v60 = vld [vmem:[%s7776_s2 + $0x18] sm:$0xff] }
  0x36   :  { %202 = vmatmul.mubr.f32.gmra.mrb[8].mxu0 %v33_v61  ;;  %v6230_v61 = vld [vmem:[%s7776_s2 + $0x38] sm:$0xff] }
  0x37   :  { %4221 = vmatprep.mubr.msk.f32.mxu0 %vm88_vm0, %v36_v62  ;;  %v5878_v62 = vmov 0  }
  0x38   :  { %5633 = vset.pattern.permute.xlu0 %v5878_v62 }
  0x3a   :  { %208 = vmatmul.mubr.f32.gmra.mrb[10].mxu0 %v35_v63  ;;  %v5879_v63 = vmov 3  }
  0x3b   :  { %4222 = vmatprep.mubr.msk.f32.mxu0 %vm88_vm0, %v38_v0  ;;  %5634 = vset.pattern.permute.xlu1 %v5879_v63 }
  0x3e   :  { %214 = vmatmul.mubr.f32.gmra.mrb[12].mxu0 %v37_v1  ;;  %v373_v1 = vld [vmem:[%s7774_s0 + $0x130] sm:$0xff] }
  0x3f   :  { %4223 = vmatprep.mubr.msk.f32.mxu0 %vm88_vm0, %v40_v2  ;;  %v374_v2 = vld [vmem:[%s7774_s0 + $0x140] sm:$0xff] }
  0x42   :  { %220 = vmatmul.mubr.f32.gmra.mrb[14].mxu0 %v39_v3  ;;  %v5317_v3 = vpack.c.bf16 %v374_v2, %v373_v1 }
  0x43   :  { %4769 = vmatprep.mubr.msk.f32.mxu0 %vm235_vm2, %v6096_v4 }
  0xa0   :  { %v617_v5 = vpop.xlane.xlu0 %616 }
  0xa1   :  { %v618_v6 = vsub.f32 %v6001_v33, %v617_v5 }
  0xa3   :  { %v619_v7 = vmul.f32 1.442695, %v618_v6 }
  0xa5   :  { %5644 = vpow2.f32 %v619_v7  ;;  %v375_v7 = vld [vmem:[%s7774_s0 + $0x150] sm:$0xff] }
  0xaf   :  { %v6108_v9 = vpop.eup %5644 }
  0xb0   :  { %v621_v10 = vsel %vm614_vm1, %v6108_v9, 0.0 }
  0xb1   :  { %622 = vadd.xlane.f32.xlu0 %v621_v10  ;;  %v376_v10 = vld [vmem:[%s7774_s0 + $0x160] sm:$0xff] }
  0xb2   :  { %v5321_v13 = vpack.c.bf16 %v376_v10, %v375_v7 }
  0xf9   :  { %v179_v16 = vpop.f32.mrb[0].mxu0 }
  0xfa   :  { %v6120_v18 = vadd.f32 %v179_v16, %v81_v15  ;;  %v6122_v19 = vpop.f32.mrb[1].mxu0 }
  0xfb   :  { %v6273_v1 = vadd.f32 %v6122_v19, %v6126_v21 }
  0xfc   :  { %7854 = vst [vmem:[#allocation8_spill] sm:$0xff] %v6120_v18  ;;  %v626_v20 = vmul.f32 %v6120_v18, %v6120_v18 }
  0xfd   :  { %v185_v22 = vpop.f32.mrb[2].mxu0  ;;  %7864 = vst [vmem:[#allocation18_spill] sm:$0xff] %v6273_v1  ;;  %v1081_v2 = vmul.f32 %v6273_v1, %v6273_v1 }
  0xfe   :  { %v6128_v23 = vadd.f32 %v185_v22, %v81_v15  ;;  %v187_v24 = vpop.f32.mrb[3].mxu0  ;;  %642 = vrot.lane.b32.xlu1 %v626_v20, %s5876_s16 }
  0xff   :  { %v6132_v25 = vadd.f32 %v187_v24, %v6126_v21 }
 0x100   :  { %7855 = vst [vmem:[#allocation9_spill] sm:$0xff] %v6128_v23  ;;  %v627_v26 = vmul.f32 %v6128_v23, %v6128_v23  ;;  %v5301_v27 = vpack.c.bf16 %v6128_v23, %v6120_v18 }
 0x101   :  { %7856 = vst [vmem:[#allocation10_spill] sm:$0xff] %v6132_v25  ;;  %v191_v28 = vpop.f32.mrb[4].mxu0 }
 0x102   :  { %v6138_v29 = vadd.f32 %v191_v28, %v81_v15  ;;  %v6140_v30 = vpop.f32.mrb[5].mxu0  ;;  %1292 = vrot.lane.b32.xlu0 %v627_v26, %s5877_s17  ;;  %1290 = vrot.lane.b32.xlu1 %v626_v20, %s5877_s17 }
 0x103   :  { %5302 = vmatprep.subr.bf16.mxu0 %v5301_v27  ;;  %5565 = vmatprep.subr.bf16.mxu1 %v5301_v27 }
 0x104   :  { %7857 = vst [vmem:[#allocation11_spill] sm:$0xff] %v6138_v29  ;;  %5304 = vmatpush3.bf16.msra.mxu0 %v5301_v27  ;;  %5569 = vmatpush3.bf16.msra.mxu1 %v5301_v27  ;;  %v628_v31 = vmul.f32 %v6138_v29, %v6138_v29 }
 0x105   :  { %v197_v32 = vpop.f32.mrb[6].mxu0 }
 0x106   :  { %v6146_v33 = vadd.f32 %v197_v32, %v81_v15  ;;  %v6148_v34 = vpop.f32.mrb[7].mxu0  ;;  %646 = vrot.lane.b32.xlu0 %v628_v31, %s5876_s16  ;;  %644 = vrot.lane.b32.xlu1 %v627_v26, %s5876_s16 }
 0x108   :  { %7858 = vst [vmem:[#allocation12_spill] sm:$0xff] %v6146_v33  ;;  %v629_v35 = vmul.f32 %v6146_v33, %v6146_v33  ;;  %v5305_v36 = vpack.c.bf16 %v6146_v33, %v6138_v29 }
 0x109   :  { %v203_v37 = vpop.f32.mrb[8].mxu0 }
 0x10a   :  { %v6156_v38 = vpop.f32.mrb[9].mxu0  ;;  %1296 = vrot.lane.b32.xlu0 %v629_v35, %s5877_s17  ;;  %1294 = vrot.lane.b32.xlu1 %v628_v31, %s5877_s17  ;;  %v6160_v39 = vadd.f32 %v203_v37, %v81_v15 }
 0x10b   :  { %5306 = vmatprep.subr.bf16.mxu0 %v5305_v36  ;;  %5566 = vmatprep.subr.bf16.mxu1 %v5305_v36  ;;  %v6290_v19 = vadd.f32 %v6156_v38, %v6126_v21 }
 0x10c   :  { %7859 = vst [vmem:[#allocation13_spill] sm:$0xff] %v6160_v39  ;;  %5308 = vmatpush3.bf16.msra.mxu0 %v5305_v36  ;;  %5570 = vmatpush3.bf16.msra.mxu1 %v5305_v36  ;;  %v630_v44 = vmul.f32 %v6160_v39, %v6160_v39 }
 0x10d   :  { %v209_v40 = vpop.f32.mrb[10].mxu0  ;;  %7867 = vst [vmem:[#allocation21_spill] sm:$0xff] %v6290_v19 }
 0x10e   :  { %v6162_v41 = vadd.f32 %v209_v40, %v81_v15  ;;  %v6164_v42 = vpop.f32.mrb[11].mxu0  ;;  %648 = vrot.lane.b32.xlu1 %v629_v35, %s5876_s16 }
 0x110   :  { %7860 = vst [vmem:[#allocation14_spill] sm:$0xff] %v6162_v41  ;;  %v631_v43 = vmul.f32 %v6162_v41, %v6162_v41  ;;  %v5309_v45 = vpack.c.bf16 %v6162_v41, %v6160_v39 }
 0x111   :  { %v215_v46 = vpop.f32.mrb[12].mxu0 }
 0x112   :  { %v6173_v47 = vpop.f32.mrb[13].mxu0  ;;  %1300 = vrot.lane.b32.xlu0 %v631_v43, %s5877_s17  ;;  %650 = vrot.lane.b32.xlu1 %v630_v44, %s5876_s16  ;;  %v6177_v49 = vadd.f32 %v215_v46, %v81_v15 }
 0x113   :  { %5310 = vmatprep.subr.bf16.mxu0 %v5309_v45  ;;  %5567 = vmatprep.subr.bf16.mxu1 %v5309_v45  ;;  %v6304_v38 = vadd.f32 %v6173_v47, %v6126_v21  ;;  %v234_v47 = vld [vmem:[%s7774_s0 + $0x120] ss:$0 sm:$0xff] }
 0x114   :  { %5312 = vmatpush3.bf16.msra.mxu0 %v5309_v45  ;;  %5571 = vmatpush3.bf16.msra.mxu1 %v5309_v45  ;;  %7861 = vst [vmem:[#allocation15_spill] sm:$0xff] %v6177_v49  ;;  %v632_v55 = vmul.f32 %v6177_v49, %v6177_v49 }
 0x115   :  { %v221_v48 = vpop.f32.mrb[14].mxu0  ;;  %7869 = vst [vmem:[#allocation23_spill] sm:$0xff] %v6304_v38 }
 0x116   :  { %v6179_v50 = vadd.f32 %v221_v48, %v81_v15  ;;  %v223_v51 = vpop.f32.mrb[15].mxu0  ;;  %1298 = vrot.lane.b32.xlu1 %v630_v44, %s5877_s17 }
 0x117   :  { %v6183_v52 = vadd.f32 %v223_v51, %v6126_v21 }
 0x118   :  { %7862 = vst [vmem:[#allocation16_spill] sm:$0xff] %v6179_v50  ;;  %v633_v53 = vmul.f32 %v6179_v50, %v6179_v50  ;;  %v5313_v54 = vpack.c.bf16 %v6179_v50, %v6177_v49 }
 0x119   :  { %7863 = vst [vmem:[#allocation17_spill] sm:$0xff] %v6183_v52 }
 0x11a   :  { %1304 = vrot.lane.b32.xlu0 %v633_v53, %s5877_s17  ;;  %652 = vrot.lane.b32.xlu1 %v631_v43, %s5876_s16 }
 0x11b   :  { %5314 = vmatprep.subr.bf16.mxu0 %v5313_v54  ;;  %5568 = vmatprep.subr.bf16.mxu1 %v5313_v54 }
 0x11c   :  { %5316 = vmatpush3.bf16.msra.mxu0 %v5313_v54  ;;  %5572 = vmatpush3.bf16.msra.mxu1 %v5313_v54 }
 0x11d   :  { %5318 = vmatprep.subr.bf16.mxu1 %v5317_v3 }
 0x11e   :  { %654 = vrot.lane.b32.xlu1 %v632_v55, %s5876_s16 }
 0x11f   :  { %4770 = vmatmul.mubr.msk.f32.vlgmr.msra.gmra.mrb[16].mxu0 %vm235_vm2, %v6196_v56  ;;  %4776 = vmatmul.mubr.msk.f32.vlgmr.msra.gmra.mrb[0].mxu1 %vm235_vm2, %v6201_v57 }
 0x120   :  { %4772 = vmatprep.mubr.msk.f32.mxu0 %vm235_vm2, %v6206_v58  ;;  %4778 = vmatprep.mubr.msk.f32.mxu1 %vm235_vm2, %v6211_v59 }
 0x121   :  { %5320 = vmatpush3.bf16.msra.mxu1 %v5317_v3  ;;  %v6283_v3 = vadd.f32 %v6148_v34, %v6126_v21  ;;  %v6297_v34 = vadd.f32 %v6164_v42, %v6126_v21 }
 0x122   :  { %1302 = vrot.lane.b32.xlu1 %v632_v55, %s5877_s17  ;;  %5322 = vmatprep.subr.bf16.mxu1 %v5321_v13 }
 0x123   :  { %4773 = vmatmul.mubr.msk.f32.gmra.mrb[18].mxu0 %vm235_vm2, %v6223_v60  ;;  %4779 = vmatmul.mubr.msk.f32.gmra.mrb[2].mxu1 %vm235_vm2, %v6230_v61  ;;  %7866 = vst [vmem:[#allocation20_spill] sm:$0xff] %v6283_v3  ;;  %v1084_v7 = vmul.f32 %v6283_v3, %v6283_v3  ;;  %7868 = vst [vmem:[#allocation22_spill] sm:$0xff] %v6297_v34 }
 0x125   :  { %5324 = vmatpush3.bf16.msra.mxu1 %v5321_v13  ;;  %v1098_v10 = vsel %vm377_vm3, %v1084_v7, 0.0  ;;  %v1085_v13 = vmul.f32 %v6290_v19, %v6290_v19 }
 0x126   :  { %656 = vrot.lane.b32.xlu1 %v633_v53, %s5876_s16 }
 0x13e   :  { %v623_v0 = vpop.xlane.xlu0 %622 }
 0x13f   :  { %5646 = vrcp.f32 %v623_v0  ;;  %v5880_v0 = vmov 1  }
 0x149   :  { %v5647_v51 = vpop.eup %5646 }
 0x14a   :  { %v6264_v55 = vmul.f32 %v5647_v51, %v6108_v9  ;;  %v6277_v9 = vadd.f32 %v6140_v30, %v6126_v21 }
 0x14c   :  { %7865 = vst [vmem:[#allocation19_spill] sm:$0xff] %v6277_v9 }
 0x170   :  { %v643_v5 = vpop.permute.xlu1 %642 }
 0x171   :  { %v666_v6 = vsel %vm235_vm2, %v643_v5, 0.0  ;;  %v1089_v5 = vsel %vm377_vm3, %v1081_v2, 0.0 }
 0x172   :  { %667 = vadd.xlane.f32.xlu1 %v666_v6  ;;  %v1083_v6 = vmul.f32 %v6277_v9, %v6277_v9 }
 0x174   :  { %v1293_v14 = vpop.permute.xlu0 %1292  ;;  %v1291_v15 = vpop.permute.xlu1 %1290  ;;  %v1095_v30 = vsel %vm377_vm3, %v1083_v6, 0.0 }
 0x175   :  { %v1314_v40 = vsel %vm377_vm3, %v1291_v15, 0.0  ;;  %v1317_v44 = vsel %vm377_vm3, %v1293_v14, 0.0  ;;  %v1101_v14 = vsel %vm377_vm3, %v1085_v13, 0.0  ;;  %v1086_v15 = vmul.f32 %v6297_v34, %v6297_v34 }
 0x176   :  { %v1082_v13 = vmul.f32 %v6132_v25, %v6132_v25 }
 0x177   :  { %v1104_v42 = vsel %vm377_vm3, %v1086_v15, 0.0 }
 0x178   :  { %v645_v16 = vpop.permute.xlu1 %644  ;;  %v647_v20 = vpop.permute.xlu0 %646 }
 0x179   :  { %v669_v17 = vsel %vm235_vm2, %v645_v16, 0.0  ;;  %v672_v24 = vsel %vm235_vm2, %v647_v20, 0.0 }
 0x17a   :  { %670 = vadd.xlane.f32.xlu0 %v669_v17  ;;  %v1087_v17 = vmul.f32 %v6304_v38, %v6304_v38 }
 0x17c   :  { %v1295_v22 = vpop.permute.xlu1 %1294  ;;  %v1297_v46 = vpop.permute.xlu0 %1296  ;;  %v1107_v20 = vsel %vm377_vm3, %v1087_v17, 0.0 }
 0x17d   :  { %v1320_v45 = vsel %vm377_vm3, %v1295_v22, 0.0  ;;  %v1323_v48 = vsel %vm377_vm3, %v1297_v46, 0.0 }
 0x17e   :  { %673 = vadd.xlane.f32.xlu0 %v672_v24 }
 0x180   :  { %v649_v26 = vpop.permute.xlu1 %648 }
 0x181   :  { %v675_v27 = vsel %vm235_vm2, %v649_v26, 0.0 }
 0x182   :  { %676 = vadd.xlane.f32.xlu1 %v675_v27 }
 0x184   :  { %v651_v28 = vpop.permute.xlu1 %650  ;;  %v1301_v54 = vpop.permute.xlu0 %1300 }
 0x185   :  { %v678_v31 = vsel %vm235_vm2, %v651_v28, 0.0  ;;  %v1329_v63 = vsel %vm377_vm3, %v1301_v54, 0.0 }
 0x186   :  { %679 = vadd.xlane.f32.xlu0 %v678_v31 }
 0x188   :  { %v1299_v32 = vpop.permute.xlu1 %1298 }
 0x189   :  { %v1326_v53 = vsel %vm377_vm3, %v1299_v32, 0.0 }
 0x18c   :  { %v653_v35 = vpop.permute.xlu1 %652  ;;  %v1305_v15 = vpop.permute.xlu0 %1304 }
 0x18d   :  { %v681_v36 = vsel %vm235_vm2, %v653_v35, 0.0 }
 0x18e   :  { %682 = vadd.xlane.f32.xlu1 %v681_v36 }
 0x190   :  { %v655_v37 = vpop.permute.xlu1 %654 }
 0x191   :  { %v684_v43 = vsel %vm235_vm2, %v655_v37, 0.0 }
 0x192   :  { %1315 = vadd.xlane.f32.xlu1 %v1314_v40  ;;  %685 = vadd.xlane.f32.xlu0 %v684_v43 }
 0x194   :  { %v1303_v16 = vpop.permute.xlu1 %1302 }
 0x195   :  { %v1332_v22 = vsel %vm377_vm3, %v1303_v16, 0.0  ;;  %v1335_v16 = vsel %vm377_vm3, %v1305_v15, 0.0 }
 0x196   :  { %1318 = vadd.xlane.f32.xlu1 %v1317_v44 }
 0x198   :  { %v657_v24 = vpop.permute.xlu1 %656 }
 0x199   :  { %v687_v21 = vsel %vm235_vm2, %v657_v24, 0.0 }
 0x19a   :  { %1321 = vadd.xlane.f32.xlu1 %v1320_v45 }
 0x19e   :  { %1324 = vadd.xlane.f32.xlu1 %v1323_v48 }
 0x1a2   :  { %1327 = vadd.xlane.f32.xlu1 %v1326_v53 }
 0x1a6   :  { %1330 = vadd.xlane.f32.xlu1 %v1329_v63 }
 0x1a8   :  { %716 = vperm.xlu0 %5633, %v6264_v55  }
 0x1ac   :  { %5637 = vset.pattern.permute.xlu0 %v5880_v0 }
 0x1b7   :  { %1363 = vperm.xlu1 %5634, %v6264_v55  }
 0x1bb   :  { %5635 = vset.pattern.permute.xlu1 %v5880_v0 }
 0x1c7   :  { %1090 = vadd.xlane.f32.xlu0 %v1089_v5 }
 0x1cb   :  { %1096 = vadd.xlane.f32.xlu0 %v1095_v30 }
 0x1cf   :  { %1099 = vadd.xlane.f32.xlu0 %v1098_v10 }
 0x1d3   :  { %1102 = vadd.xlane.f32.xlu0 %v1101_v14  ;;  %v1092_v14 = vsel %vm377_vm3, %v1082_v13, 0.0 }
 0x1d7   :  { %1105 = vadd.xlane.f32.xlu0 %v1104_v42 }
 0x1db   :  { %1108 = vadd.xlane.f32.xlu0 %v1107_v20  ;;  %1333 = vadd.xlane.f32.xlu1 %v1332_v22 }
 0x1df   :  { %688 = vadd.xlane.f32.xlu1 %v687_v21 }
 0x1f0   :  { %792 = vperm.xlu1 %5635, %v6264_v55  }
 0x1f2   :  { %v4771_v26 = vpop.f32.mrb[16].mxu0  ;;  %v4777_v27 = vpop.f32.mrb[0].mxu1 }
 0x1f3   :  { %v332_v28 = vadd.f32 %v4771_v26, %v234_v47  ;;  %v326_v31 = vpop.f32.mrb[17].mxu0  ;;  %v346_v32 = vpop.f32.mrb[1].mxu1  ;;  %v352_v5 = vadd.f32 %v4777_v27, %v234_v47 }
 0x1f4   :  { %v327_v35 = vadd.f32 %v326_v31, %v234_v47  ;;  %v347_v40 = vadd.f32 %v346_v32, %v234_v47  ;;  %v5881_v32 = vmov 2  }
 0x1f5   :  { %v366_v44 = vmax.f32 %v332_v28, 0.0  ;;  %v370_v30 = vmax.f32 %v352_v5, 0.0  ;;  %5636 = vset.pattern.permute.xlu1 %v5881_v32 }
 0x1f6   :  { %v365_v36 = vmax.f32 %v327_v35, 0.0  ;;  %v4774_v37 = vpop.f32.mrb[18].mxu0  ;;  %v4780_v43 = vpop.f32.mrb[2].mxu1  ;;  %v369_v54 = vmax.f32 %v347_v40, 0.0 }
 0x1f7   :  { %v342_v45 = vadd.f32 %v4774_v37, %v234_v47  ;;  %v336_v46 = vpop.f32.mrb[19].mxu0  ;;  %v356_v48 = vpop.f32.mrb[3].mxu1  ;;  %v362_v7 = vadd.f32 %v4780_v43, %v234_v47 }
 0x1f8   :  { %v337_v51 = vadd.f32 %v336_v46, %v234_v47  ;;  %4789 = vmatprep.mubr.msk.f32.mxu1 %vm377_vm3, %v365_v36  ;;  %v357_v63 = vadd.f32 %v356_v48, %v234_v47 }
 0x1f9   :  { %4790 = vmatmul.mubr.msk.f32.vlgmr.msra.gmra.mrb[4].mxu1 %vm377_vm3, %v366_v44  ;;  %v368_v2 = vmax.f32 %v342_v45, 0.0  ;;  %v372_v10 = vmax.f32 %v362_v7, 0.0 }
 0x1fa   :  { %v367_v53 = vmax.f32 %v337_v51, 0.0  ;;  %v371_v6 = vmax.f32 %v357_v63, 0.0 }
 0x1fc   :  { %4792 = vmatprep.mubr.msk.f32.mxu1 %vm377_vm3, %v367_v53 }
 0x1fd   :  { %4793 = vmatmul.mubr.msk.f32.gmra.mrb[6].mxu1 %vm377_vm3, %v368_v2 }
 0x1fe   :  { %4795 = vmatprep.mubr.msk.f32.mxu1 %vm377_vm3, %v369_v54 }
 0x201   :  { %4796 = vmatmul.mubr.msk.f32.gmra.mrb[8].mxu1 %vm377_vm3, %v370_v30 }
 0x202   :  { %4798 = vmatprep.mubr.msk.f32.mxu1 %vm377_vm3, %v371_v6 }
 0x205   :  { %4799 = vmatmul.mubr.msk.f32.gmra.mrb[10].mxu1 %vm377_vm3, %v372_v10 }
 0x206   :  { %4817 = vmatprep.mubr.msk.f32.mxu1 %vm235_vm2, %v6096_v4 }
 0x214   :  { %1093 = vadd.xlane.f32.xlu1 %v1092_v14  ;;  %v1088_v14 = vmul.f32 %v6183_v52, %v6183_v52 }
 0x218   :  { %1336 = vadd.xlane.f32.xlu1 %v1335_v16 }
 0x2cc   :  { %v4791_v42 = vpop.f32.mrb[4].mxu1 }
 0x2cd   :  { %v468_v17 = vpop.f32.mrb[5].mxu1 }
 0x2ce   :  { %v5325_v20 = vpack.c.bf16 %v4791_v42, %v468_v17 }
 0x2d0   :  { %v4794_v22 = vpop.f32.mrb[6].mxu1  ;;  %5326 = vmatprep.subr.bf16.mxu1 %v5325_v20 }
 0x2d1   :  { %v478_v24 = vpop.f32.mrb[7].mxu1  ;;  %5328 = vmatpush3.bf16.msra.mxu1 %v5325_v20 }
 0x2d2   :  { %v5329_v21 = vpack.c.bf16 %v4794_v22, %v478_v24  ;;  %v1110_v24 = vsel %vm377_vm3, %v1088_v14, 0.0 }
 0x2d4   :  { %v4797_v47 = vpop.f32.mrb[8].mxu1  ;;  %5330 = vmatprep.subr.bf16.mxu1 %v5329_v21 }
 0x2d5   :  { %v488_v4 = vpop.f32.mrb[9].mxu1  ;;  %5332 = vmatpush3.bf16.msra.mxu1 %v5329_v21 }
 0x2d6   :  { %v5333_v26 = vpack.c.bf16 %v4797_v47, %v488_v4  ;;  %v671_v47 = vpop.xlane.xlu0 %670 }
 0x2d8   :  { %v4800_v27 = vpop.f32.mrb[10].mxu1  ;;  %5334 = vmatprep.subr.bf16.mxu1 %v5333_v26 }
 0x2d9   :  { %v498_v28 = vpop.f32.mrb[11].mxu1  ;;  %5336 = vmatpush3.bf16.msra.mxu1 %v5333_v26 }
 0x2da   :  { %v5337_v31 = vpack.c.bf16 %v4800_v27, %v498_v28 }
 0x2dc   :  { %5338 = vmatprep.subr.bf16.mxu1 %v5337_v31 }
 0x2dd   :  { %5340 = vmatpush3.bf16.msra.mxu1 %v5337_v31 }
 0x2e0   :  { %4818 = vmatmul.mubr.msk.f32.vlgmr.msra.gmra.mrb[12].mxu1 %vm235_vm2, %v6196_v56  ;;  %v668_v56 = vpop.xlane.xlu1 %667 }
 0x2e1   :  { %4820 = vmatprep.mubr.msk.f32.mxu1 %vm235_vm2, %v6206_v58 }
 0x2e4   :  { %4821 = vmatmul.mubr.msk.f32.gmra.mrb[14].mxu1 %vm235_vm2, %v6223_v60  ;;  %v6348_v58 = vpop.xlane.xlu1 %676 }
 0x2e5   :  { %4823 = vmatprep.mubr.msk.f32.mxu1 %vm235_vm2, %v6104_v8 }
 0x2e8   :  { %4824 = vmatmul.mubr.msk.f32.gmra.mrb[16].mxu1 %vm235_vm2, %v6201_v57  ;;  %v6350_v35 = vpop.xlane.xlu1 %682  ;;  %v507_v57 = vld [vmem:[%s7774_s0 + $0x170] ss:$0 sm:$0xff] }
 0x2e9   :  { %4826 = vmatprep.mubr.msk.f32.mxu1 %vm235_vm2, %v6211_v59 }
 0x2ec   :  { %4827 = vmatmul.mubr.msk.f32.gmra.mrb[18].mxu1 %vm235_vm2, %v6230_v61  ;;  %v6352_v60 = vpop.xlane.xlu1 %1315 }
 0x2f0   :  { %v6354_v8 = vpop.xlane.xlu1 %1318 }
 0x2f4   :  { %v6356_v36 = vpop.xlane.xlu1 %1321 }
 0x2f8   :  { %v6361_v61 = vpop.xlane.xlu1 %1324 }
 0x2fc   :  { %v6376_v63 = vpop.xlane.xlu1 %1327 }
 0x300   :  { %v6391_v17 = vpop.xlane.xlu1 %1330 }
 0x3b3   :  { %v4819_v59 = vpop.f32.mrb[12].mxu1 }
 0x3b4   :  { %v6363_v37 = vadd.f32 %v4819_v59, %v507_v57  ;;  %v574_v40 = vpop.f32.mrb[13].mxu1  ;;  %v690_v59 = vmax.f32 %v668_v56, 1e-24 }
 0x3b5   :  { %v6365_v43 = vadd.f32 %v574_v40, %v507_v57  ;;  %v6406_v40 = vpop.permute.xlu1 %1363 }
 0x3b6   :  { %7870 = vst [vmem:[#allocation24_spill] sm:$0xff] %v6363_v37  ;;  %v736_v44 = vmul.f32 %v6363_v37, %v6363_v37  ;;  %5648 = vrsqrt.f32 %v690_v59 }
 0x3b7   :  { %7871 = vst [vmem:[#allocation25_spill] sm:$0xff] %v6365_v43  ;;  %v4822_v45 = vpop.f32.mrb[14].mxu1  ;;  %v735_v53 = vmul.f32 %v6365_v43, %v6365_v43 }
 0x3b8   :  { %v6369_v46 = vadd.f32 %v4822_v45, %v507_v57  ;;  %v746_v48 = vsel %vm377_vm3, %v736_v44, 0.0  ;;  %v584_v51 = vpop.f32.mrb[15].mxu1  ;;  %v674_v45 = vpop.xlane.xlu0 %673 }
 0x3b9   :  { %747 = vadd.xlane.f32.xlu1 %v746_v48  ;;  %v6374_v54 = vadd.f32 %v584_v51, %v507_v57  ;;  %v743_v10 = vsel %vm377_vm3, %v735_v53, 0.0  ;;  %v691_v51 = vmax.f32 %v671_v47, 1e-24  ;;  %v6411_v53 = vpop.xlane.xlu1 %1333 }
 0x3ba   :  { %7872 = vst [vmem:[#allocation26_spill] sm:$0xff] %v6369_v46  ;;  %v738_v2 = vmul.f32 %v6369_v46, %v6369_v46 }
 0x3bb   :  { %7873 = vst [vmem:[#allocation27_spill] sm:$0xff] %v6374_v54  ;;  %v4825_v5 = vpop.f32.mrb[16].mxu1  ;;  %v737_v6 = vmul.f32 %v6374_v54, %v6374_v54  ;;  %5650 = vrsqrt.f32 %v691_v51 }
 0x3bc   :  { %v752_v30 = vsel %vm377_vm3, %v738_v2, 0.0  ;;  %v6383_v7 = vadd.f32 %v4825_v5, %v507_v57  ;;  %v594_v13 = vpop.f32.mrb[17].mxu1  ;;  %v693_v5 = vmax.f32 %v6348_v58, 1e-24  ;;  %v680_v56 = vpop.xlane.xlu0 %679 }
 0x3bd   :  { %753 = vadd.xlane.f32.xlu0 %v752_v30  ;;  %744 = vadd.xlane.f32.xlu1 %v743_v10  ;;  %v749_v15 = vsel %vm377_vm3, %v737_v6, 0.0  ;;  %v6393_v20 = vadd.f32 %v594_v13, %v507_v57  ;;  %v695_v6 = vmax.f32 %v6350_v35, 1e-24  ;;  %v689_v30 = vpop.xlane.xlu1 %688  ;;  %v694_v13 = vmax.f32 %v680_v56, 1e-24 }
 0x3be   :  { %7874 = vst [vmem:[#allocation28_spill] sm:$0xff] %v6383_v7  ;;  %v740_v16 = vmul.f32 %v6383_v7, %v6383_v7  ;;  %v697_v14 = vmax.f32 %v689_v30, 1e-24 }
 0x3bf   :  { %v4828_v42 = vpop.f32.mrb[18].mxu1  ;;  %7875 = vst [vmem:[#allocation29_spill] sm:$0xff] %v6393_v20  ;;  %v739_v31 = vmul.f32 %v6393_v20, %v6393_v20 }
 0x3c0   :  { %v6395_v22 = vadd.f32 %v4828_v42, %v507_v57  ;;  %v604_v21 = vpop.f32.mrb[19].mxu1  ;;  %v758_v26 = vsel %vm377_vm3, %v740_v16, 0.0  ;;  %v686_v10 = vpop.xlane.xlu0 %685  ;;  %v804_v16 = vld [vmem:[%s7774_s0 + $0x220] sm:$0xff] }
 0x3c1   :  { %1111 = vadd.xlane.f32.xlu0 %v1110_v24  ;;  %750 = vadd.xlane.f32.xlu1 %v749_v15  ;;  %v6401_v27 = vadd.f32 %v604_v21, %v507_v57  ;;  %v755_v48 = vsel %vm377_vm3, %v739_v31, 0.0  ;;  %v692_v57 = vmax.f32 %v674_v45, 1e-24  ;;  %v803_v15 = vld [vmem:[%s7774_s0 + $0x210] sm:$0xff]  ;;  %v5649_v58 = vpop.eup %5648  ;;  %v696_v42 = vmax.f32 %v686_v10, 1e-24  ;;  %v6422_v24 = vpop.permute.xlu1 %792 }
 0x3c2   :  { %7876 = vst [vmem:[#allocation30_spill] sm:$0xff] %v6395_v22  ;;  %v742_v4 = vmul.f32 %v6395_v22, %v6395_v22  ;;  %v5341_v21 = vpack.c.bf16 %v804_v16, %v803_v15  ;;  %v1343_v10 = vmax.f32 %v6391_v17, 1e-24  ;;  %v1342_v16 = vmax.f32 %v6376_v63, 1e-24 }
 0x3c3   :  { %7877 = vst [vmem:[#allocation31_spill] sm:$0xff] %v6401_v27  ;;  %v741_v44 = vmul.f32 %v6401_v27, %v6401_v27  ;;  %5652 = vrsqrt.f32 %v692_v57 }
 0x3c4   :  { %v764_v28 = vsel %vm377_vm3, %v742_v4, 0.0  ;;  %5654 = vrsqrt.f32 %v693_v5  ;;  %v6424_v35 = vpop.permute.xlu0 %716  ;;  %5342 = vmatprep.subr.bf16.mxu1 %v5341_v21  ;;  %v706_v4 = vmul.f32 %v5649_v58, %v6120_v18  ;;  %v1341_v5 = vmax.f32 %v6361_v61, 1e-24 }
 0x3c5   :  { %765 = vadd.xlane.f32.xlu0 %v764_v28  ;;  %759 = vadd.xlane.f32.xlu1 %v758_v26  ;;  %v761_v2 = vsel %vm377_vm3, %v741_v44, 0.0  ;;  %5656 = vrsqrt.f32 %v695_v6  ;;  %v5651_v47 = vpop.eup %5650  ;;  %v805_v26 = vld [vmem:[%s7774_s0 + $0x230] sm:$0xff]  ;;  %v806_v28 = vld [vmem:[%s7774_s0 + $0x240] sm:$0xff]  ;;  %v1339_v44 = vmax.f32 %v6354_v8, 1e-24  ;;  %v6436_v51 = vpop.xlane.xlu1 %1093 }
 0x3c6   :  { %5658 = vrsqrt.f32 %v694_v13  ;;  %5344 = vmatpush3.bf16.msra.mxu1 %v5341_v21  ;;  %v5345_v59 = vpack.c.bf16 %v806_v28, %v805_v26  ;;  %v719_v45 = vmul.f32 %v6424_v35, %v706_v4  ;;  %v707_v57 = vmul.f32 %v5651_v47, %v6128_v23  ;;  %v1801_v4 = vld [vmem:[%s7774_s0 + $0x2f0] sm:$0xff] }
 0x3c7   :  { %5660 = vrsqrt.f32 %v697_v14  ;;  %v1340_v8 = vmax.f32 %v6356_v36, 1e-24  ;;  %v727_v36 = vld [vmem:[%s7774_s0 + $0x190] sm:$0xff]  ;;  %v728_v14 = vld [vmem:[%s7774_s0 + $0x1a0] sm:$0xff] }
 0x3c8   :  { %5662 = vrsqrt.f32 %v696_v42  ;;  %5346 = vmatprep.subr.bf16.mxu1 %v5345_v59  ;;  %v720_v30 = vmul.f32 %v6424_v35, %v707_v57  ;;  %v6457_v17 = vpack.c.bf16 %v728_v14, %v727_v36 }
 0x3c9   :  { %756 = vadd.xlane.f32.xlu1 %v755_v48  ;;  %v1338_v48 = vmax.f32 %v6352_v60, 1e-24  ;;  %5664 = vrsqrt.f32 %v1339_v44  ;;  %v1337_v58 = vpop.xlane.xlu1 %1336 }
 0x3ca   :  { %5348 = vmatpush3.bf16.msra.mxu1 %v5345_v59  ;;  %v1345_v26 = vmax.f32 %v1337_v58, 1e-24 }
 0x3cb   :  { %5666 = vrsqrt.f32 %v1338_v48  ;;  %5350 = vmatprep.subr.bf16.mxu1 %v6457_v17 }
 0x3cc   :  { %5668 = vrsqrt.f32 %v1341_v5 }
 0x3cd   :  { %762 = vadd.xlane.f32.xlu1 %v761_v2  ;;  %v5653_v31 = vpop.eup %5652  ;;  %5670 = vrsqrt.f32 %v1340_v8 }
 0x3ce   :  { %v5655_v2 = vpop.eup %5654  ;;  %v708_v56 = vmul.f32 %v5653_v31, %v6138_v29  ;;  %5672 = vrsqrt.f32 %v1343_v10  ;;  %v1802_v31 = vld [vmem:[%s7774_s0 + $0x300] sm:$0xff] }
 0x3cf   :  { %v5657_v6 = vpop.eup %5656  ;;  %v709_v61 = vmul.f32 %v5655_v2, %v6146_v33  ;;  %5674 = vrsqrt.f32 %v1342_v16  ;;  %v5381_v44 = vpack.c.bf16 %v1802_v31, %v1801_v4  ;;  %v1803_v2 = vld [vmem:[%s7774_s0 + $0x310] sm:$0xff]  ;;  %v6504_v16 = vld [vmem:[%s7774_s0 + $0x2e0] sm:$0xff] }
 0x3d0   :  { %v721_v60 = vmul.f32 %v6424_v35, %v708_v56  ;;  %v711_v13 = vmul.f32 %v5657_v6, %v6162_v41  ;;  %v5659_v15 = vpop.eup %5658  ;;  %5676 = vrsqrt.f32 %v1345_v26  ;;  %v1804_v56 = vld [vmem:[%s7774_s0 + $0x320] sm:$0xff] }
 0x3d1   :  { %v5661_v42 = vpop.eup %5660  ;;  %v722_v21 = vmul.f32 %v6424_v35, %v709_v61  ;;  %v710_v28 = vmul.f32 %v5659_v15, %v6160_v39  ;;  %5382 = vmatprep.subr.bf16.mxu0 %v5381_v44 }
 0x3d2   :  { %v5663_v47 = vpop.eup %5662  ;;  %v724_v63 = vmul.f32 %v6424_v35, %v711_v13  ;;  %v713_v59 = vmul.f32 %v5661_v42, %v6179_v50  ;;  %5384 = vmatpush3.bf16.msra.mxu0 %v5381_v44 }
 0x3d3   :  { %v712_v48 = vmul.f32 %v5663_v47, %v6177_v49  ;;  %v5665_v57 = vpop.eup %5664 }
 0x3d4   :  { %v726_v5 = vmul.f32 %v6424_v35, %v713_v59  ;;  %v1355_v10 = vmul.f32 %v5665_v57, %v6128_v23  ;;  %v1531_v57 = vld [vmem:[%s7777_s3] sm:$0xff] }
 0x3d5   :  { %v725_v8 = vmul.f32 %v6424_v35, %v712_v48  ;;  %v6529_v48 = vld [vmem:[%s7777_s3 + $0x8] sm:$0xff] }
 0x3d6   :  { %v1367_v13 = vmul.f32 %v6406_v40, %v1355_v10 }
 0x3db   :  { %944 = vrot.lane.b32.xlu0 %v719_v45, %s5876_s16  ;;  %v723_v45 = vmul.f32 %v6424_v35, %v710_v28 }
 0x3de   :  { %946 = vrot.lane.b32.xlu1 %v720_v30, %s5876_s16  ;;  %v5385_v30 = vpack.c.bf16 %v1804_v56, %v1803_v2  ;;  %v1534_v2 = vld [vmem:[%s7777_s3 + $0x18] sm:$0xff]  ;;  %v6556_v56 = vld [vmem:[%s7777_s3 + $0x30] sm:$0xff] }
 0x3df   :  { %948 = vrot.lane.b32.xlu0 %v721_v60, %s5876_s16 }
 0x3e0   :  { %5386 = vmatprep.subr.bf16.mxu0 %v5385_v30 }
 0x3e1   :  { %5388 = vmatpush3.bf16.msra.mxu0 %v5385_v30  ;;  %v6567_v30 = vld [vmem:[%s7777_s3 + $0x40] sm:$0xff] }
 0x3e2   :  { %1138 = vperm.xlu1 %5636, %v6264_v55   ;;  %v1344_v55 = vmax.f32 %v6411_v53, 1e-24  ;;  %v5667_v53 = vpop.eup %5666 }
 0x3e3   :  { %950 = vrot.lane.b32.xlu0 %v722_v21, %s5876_s16  ;;  %v5669_v6 = vpop.eup %5668  ;;  %v1354_v61 = vmul.f32 %v5667_v53, %v6120_v18  ;;  %v6547_v53 = vld [vmem:[%s7777_s3 + $0x20] sm:$0xff] }
 0x3e4   :  { %5678 = vrsqrt.f32 %v1344_v55  ;;  %v5671_v60 = vpop.eup %5670  ;;  %v1357_v36 = vmul.f32 %v5669_v6, %v6146_v33  ;;  %v1538_v6 = vld [vmem:[%s7777_s3 + $0x38] sm:$0xff] }
 0x3e5   :  { %v5673_v35 = vpop.eup %5672  ;;  %v1366_v14 = vmul.f32 %v6406_v40, %v1354_v61  ;;  %v1356_v15 = vmul.f32 %v5671_v60, %v6138_v29  ;;  %v6572_v60 = vld [vmem:[%s7777_s3 + $0x48] sm:$0xff]  ;;  %v6581_v61 = vld [vmem:[%s7777_s3 + $0x50] sm:$0xff] }
 0x3e6   :  { %954 = vrot.lane.b32.xlu1 %v724_v63, %s5876_s16  ;;  %v5675_v58 = vpop.eup %5674  ;;  %v1369_v42 = vmul.f32 %v6406_v40, %v1357_v36  ;;  %v1359_v21 = vmul.f32 %v5673_v35, %v6162_v41 }
 0x3e7   :  { %952 = vrot.lane.b32.xlu0 %v723_v45, %s5876_s16  ;;  %5638 = vset.pattern.permute.xlu1 %v5880_v0  ;;  %v6495_v0 = vld [vmem:[%s7774_s0 + $0x2d0] sm:$0xff]  ;;  %v5677_v47 = vpop.eup %5676  ;;  %v1368_v4 = vmul.f32 %v6406_v40, %v1356_v15  ;;  %v1358_v26 = vmul.f32 %v5675_v58, %v6160_v39 }
 0x3e8   :  { %4925 = vmatprep.mubr.msk.f32.mxu0 %vm377_vm3, %v6495_v0  ;;  %v1371_v28 = vmul.f32 %v6406_v40, %v1359_v21  ;;  %v1361_v31 = vmul.f32 %v5677_v47, %v6179_v50 }
 0x3e9   :  { %4926 = vmatmul.mubr.msk.f32.vlgmr.msra.gmra.mrb[20].mxu0 %vm377_vm3, %v6504_v16  ;;  %v1370_v55 = vmul.f32 %v6406_v40, %v1358_v26 }
 0x3ea   :  { %958 = vrot.lane.b32.xlu1 %v726_v5, %s5876_s16  ;;  %v1373_v44 = vmul.f32 %v6406_v40, %v1361_v31  ;;  %v1536_v5 = vld [vmem:[%s7777_s3 + $0x28] sm:$0xff] }
 0x3eb   :  { %956 = vrot.lane.b32.xlu0 %v725_v8, %s5876_s16  ;;  %v6561_v8 = vpop.xlane.xlu0 %1090 }
 0x3ee   :  { %1388 = vrot.lane.b32.xlu1 %v1367_v13, %s5877_s17  ;;  %v5679_v63 = vpop.eup %5678  ;;  %v6586_v13 = vld [vmem:[%s7777_s3 + $0x58] sm:$0xff] }
 0x3ef   :  { %1386 = vrot.lane.b32.xlu0 %v1366_v14, %s5877_s17  ;;  %v1360_v59 = vmul.f32 %v5679_v63, %v6177_v49  ;;  %v6574_v10 = vpop.xlane.xlu0 %1096 }
 0x3f1   :  { %v1372_v45 = vmul.f32 %v6406_v40, %v1360_v59  ;;  %v6538_v40 = vld [vmem:[%s7777_s3 + $0x10] sm:$0xff] }
 0x3f2   :  { %1392 = vrot.lane.b32.xlu1 %v1369_v42, %s5877_s17 }
 0x3f3   :  { %1390 = vrot.lane.b32.xlu0 %v1368_v4, %s5877_s17  ;;  %v6590_v36 = vpop.xlane.xlu0 %1099 }
 0x3f6   :  { %1396 = vrot.lane.b32.xlu1 %v1371_v28, %s5877_s17 }
 0x3f7   :  { %1394 = vrot.lane.b32.xlu0 %v1370_v55, %s5877_s17  ;;  %v6595_v35 = vpop.xlane.xlu0 %1102 }
 0x3fa   :  { %1400 = vrot.lane.b32.xlu1 %v1373_v44, %s5877_s17 }
 0x3fb   :  { %1398 = vrot.lane.b32.xlu0 %v1372_v45, %s5877_s17  ;;  %v6600_v14 = vpop.xlane.xlu0 %1105 }
 0x3fe   :  { %1621 = vperm.xlu1 %5638, %v6529_v48  }
 0x3ff   :  { %1618 = vperm.xlu0 %5637, %v1531_v57   ;;  %v6603_v15 = vpop.xlane.xlu0 %1108 }
 0x402   :  { %1624 = vperm.xlu1 %5638, %v6538_v40  }
 0x403   :  { %1627 = vperm.xlu0 %5637, %v1534_v2  }
 0x406   :  { %1630 = vperm.xlu1 %5638, %v6547_v53  }
 0x407   :  { %1633 = vperm.xlu0 %5637, %v1536_v5  }
 0x40a   :  { %1636 = vperm.xlu1 %5638, %v6556_v56  }
 0x40b   :  { %1639 = vperm.xlu0 %5637, %v1538_v6  }
 0x40e   :  { %1642 = vperm.xlu1 %5638, %v6567_v30  }
 0x40f   :  { %1645 = vperm.xlu0 %5637, %v6572_v60  }
 0x412   :  { %1648 = vperm.xlu1 %5638, %v6581_v61  }
 0x413   :  { %1651 = vperm.xlu0 %5637, %v6586_v13  }
 0x416   :  { %5639 = vset.pattern.permute.xlu1 %v5881_v32 }
 0x417   :  { %5640 = vset.pattern.permute.xlu0 %v5881_v32  ;;  %1690 = vperm.xlu1 %5639, %v1531_v57  }
 0x418   :  { %1693 = vperm.xlu0 %5640, %v6529_v48  }
 0x41b   :  { %1696 = vperm.xlu1 %5639, %v6538_v40  }
 0x41c   :  { %1702 = vperm.xlu0 %5640, %v6547_v53  }
 0x41f   :  { %1699 = vperm.xlu1 %5639, %v1534_v2  }
 0x420   :  { %1708 = vperm.xlu0 %5640, %v6556_v56  }
 0x423   :  { %1705 = vperm.xlu1 %5639, %v1536_v5  }
 0x424   :  { %1714 = vperm.xlu0 %5640, %v6567_v30  }
 0x427   :  { %1711 = vperm.xlu1 %5639, %v1538_v6  }
 0x428   :  { %1720 = vperm.xlu0 %5640, %v6581_v61  }
 0x42b   :  { %1717 = vperm.xlu1 %5639, %v6572_v60  }
 0x42c   :  { %5641 = vset.pattern.permute.xlu0 %v5878_v62 }
 0x42d   :  { %1546 = vperm.xlu0 %5641, %v1531_v57  }
 0x42f   :  { %1723 = vperm.xlu1 %5639, %v6586_v13  }
 0x431   :  { %1555 = vperm.xlu0 %5641, %v1534_v2  }
 0x433   :  { %5642 = vset.pattern.permute.xlu1 %v5878_v62  ;;  %v729_v62 = vld [vmem:[%s7774_s0 + $0x1b0] sm:$0xff] }
 0x434   :  { %1549 = vperm.xlu1 %5642, %v6529_v48   ;;  %v730_v48 = vld [vmem:[%s7774_s0 + $0x1c0] sm:$0xff] }
 0x435   :  { %1561 = vperm.xlu0 %5641, %v1536_v5  }
 0x438   :  { %1552 = vperm.xlu1 %5642, %v6538_v40  }
 0x439   :  { %1567 = vperm.xlu0 %5641, %v1538_v6  }
 0x43c   :  { %1558 = vperm.xlu1 %5642, %v6547_v53  }
 0x43d   :  { %1573 = vperm.xlu0 %5641, %v6572_v60  }
 0x440   :  { %1564 = vperm.xlu1 %5642, %v6556_v56  }
 0x441   :  { %1579 = vperm.xlu0 %5641, %v6586_v13  }
 0x444   :  { %1570 = vperm.xlu1 %5642, %v6567_v30  }
 0x445   :  { %5643 = vset.pattern.permute.xlu0 %v5881_v32 }
 0x446   :  { %v748_v58 = vpop.xlane.xlu1 %747 }
 0x447   :  { %v768_v42 = vmax.f32 %v748_v58, 1e-24 }
 0x448   :  { %1576 = vperm.xlu1 %5642, %v6581_v61   ;;  %v1115_v61 = vmax.f32 %v6574_v10, 1e-24  ;;  %v1117_v10 = vmax.f32 %v6595_v35, 1e-24 }
 0x449   :  { %5680 = vrsqrt.f32 %v768_v42 }
 0x44a   :  { %v754_v21 = vpop.xlane.xlu0 %753  ;;  %v745_v47 = vpop.xlane.xlu1 %744 }
 0x44b   :  { %v770_v4 = vmax.f32 %v754_v21, 1e-24  ;;  %v767_v26 = vmax.f32 %v745_v47, 1e-24 }
 0x44d   :  { %5682 = vrsqrt.f32 %v767_v26 }
 0x44e   :  { %v6608_v63 = vpop.xlane.xlu0 %1111  ;;  %v751_v28 = vpop.xlane.xlu1 %750  ;;  %5684 = vrsqrt.f32 %v770_v4 }
 0x44f   :  { %v769_v31 = vmax.f32 %v751_v28, 1e-24 }
 0x451   :  { %5686 = vrsqrt.f32 %v769_v31 }
 0x452   :  { %v760_v55 = vpop.xlane.xlu1 %759  ;;  %v766_v59 = vpop.xlane.xlu0 %765 }
 0x453   :  { %v772_v44 = vmax.f32 %v760_v55, 1e-24  ;;  %v5681_v45 = vpop.eup %5680  ;;  %v774_v57 = vmax.f32 %v766_v59, 1e-24  ;;  %v5353_v55 = vpack.c.bf16 %v730_v48, %v729_v62  ;;  %v1149_v48 = vld [vmem:[%s7774_s0 + $0x250] sm:$0xff] }
 0x454   :  { %v784_v47 = vmul.f32 %v5681_v45, %v6363_v37  ;;  %v732_v45 = vld [vmem:[%s7774_s0 + $0x1e0] sm:$0xff] }
 0x455   :  { %5688 = vrsqrt.f32 %v772_v44  ;;  %v731_v44 = vld [vmem:[%s7774_s0 + $0x1d0] sm:$0xff] }
 0x456   :  { %v757_v58 = vpop.xlane.xlu1 %756  ;;  %v796_v40 = vmul.f32 %v6422_v24, %v784_v47  ;;  %v734_v47 = vld [vmem:[%s7774_s0 + $0x200] sm:$0xff] }
 0x457   :  { %v771_v42 = vmax.f32 %v757_v58, 1e-24  ;;  %v5683_v21 = vpop.eup %5682  ;;  %v5357_v58 = vpack.c.bf16 %v732_v45, %v731_v44  ;;  %v1114_v45 = vmax.f32 %v6436_v51, 1e-24  ;;  %v1116_v51 = vmax.f32 %v6590_v36, 1e-24 }
 0x458   :  { %v5685_v2 = vpop.eup %5684  ;;  %v783_v4 = vmul.f32 %v5683_v21, %v6365_v43  ;;  %v733_v21 = vld [vmem:[%s7774_s0 + $0x1f0] sm:$0xff] }
 0x459   :  { %5690 = vrsqrt.f32 %v771_v42  ;;  %v786_v6 = vmul.f32 %v5685_v2, %v6369_v46  ;;  %v945_v42 = vpop.permute.xlu0 %944  ;;  %v5361_v62 = vpack.c.bf16 %v734_v47, %v733_v21  ;;  %v1375_v21 = vld [vmem:[%s7774_s0 + $0x2a0] sm:$0xff]  ;;  %v1118_v47 = vmax.f32 %v6600_v14, 1e-24 }
 0x45a   :  { %5692 = vrsqrt.f32 %v774_v57  ;;  %v763_v5 = vpop.xlane.xlu1 %762  ;;  %v795_v28 = vmul.f32 %v6422_v24, %v783_v4 }
 0x45b   :  { %v773_v26 = vmax.f32 %v763_v5, 1e-24  ;;  %v5687_v31 = vpop.eup %5686  ;;  %v798_v60 = vmul.f32 %v6422_v24, %v786_v6  ;;  %v1150_v5 = vld [vmem:[%s7774_s0 + $0x260] sm:$0xff] }
 0x45c   :  { %4837 = vmatprep.mubr.msk.f32.mxu1 %vm377_vm3, %v795_v28  ;;  %v785_v59 = vmul.f32 %v5687_v31, %v6374_v54 }
 0x45d   :  { %5694 = vrsqrt.f32 %v773_v26  ;;  %4838 = vmatmul.mubr.msk.f32.vlgmr.msra.gmra.mrb[20].mxu1 %vm377_vm3, %v796_v40  ;;  %v949_v28 = vpop.permute.xlu0 %948 }
 0x45e   :  { %v797_v57 = vmul.f32 %v6422_v24, %v785_v59  ;;  %5352 = vmatpush3.bf16.msra.mxu1 %v6457_v17  ;;  %v1113_v59 = vmax.f32 %v6561_v8, 1e-24  ;;  %v947_v32 = vpop.permute.xlu1 %946  ;;  %v1152_v8 = vld [vmem:[%s7774_s0 + $0x280] sm:$0xff] }
 0x45f   :  { %v5689_v53 = vpop.eup %5688  ;;  %5354 = vmatprep.subr.bf16.mxu1 %v5353_v55 }
 0x460   :  { %4840 = vmatprep.mubr.msk.f32.mxu1 %vm377_vm3, %v797_v57  ;;  %v788_v2 = vmul.f32 %v5689_v53, %v6383_v7  ;;  %v1151_v57 = vld [vmem:[%s7774_s0 + $0x270] sm:$0xff]  ;;  %5696 = vrsqrt.f32 %v1113_v59 }
 0x461   :  { %4841 = vmatmul.mubr.msk.f32.gmra.mrb[22].mxu1 %vm377_vm3, %v798_v60  ;;  %v951_v53 = vpop.permute.xlu0 %950  ;;  %5698 = vrsqrt.f32 %v1114_v45 }
 0x462   :  { %5356 = vmatpush3.bf16.msra.mxu1 %v5353_v55  ;;  %v800_v31 = vmul.f32 %v6422_v24, %v788_v2  ;;  %v5365_v55 = vpack.c.bf16 %v1150_v5, %v1149_v48  ;;  %v6681_v60 = vpop.permute.xlu1 %1138  ;;  %5700 = vrsqrt.f32 %v1115_v61 }
 0x463   :  { %v5691_v17 = vpop.eup %5690  ;;  %5358 = vmatprep.subr.bf16.mxu1 %v5357_v58  ;;  %5702 = vrsqrt.f32 %v1116_v51 }
 0x464   :  { %v5693_v56 = vpop.eup %5692  ;;  %v787_v4 = vmul.f32 %v5691_v17, %v6393_v20  ;;  %5704 = vrsqrt.f32 %v1117_v10  ;;  %v1119_v17 = vmax.f32 %v6603_v15, 1e-24  ;;  %v1806_v20 = vld [vmem:[%s7774_s0 + $0x340] sm:$0xff] }
 0x465   :  { %v790_v40 = vmul.f32 %v5693_v56, %v6395_v22  ;;  %v953_v36 = vpop.permute.xlu0 %952  ;;  %5706 = vrsqrt.f32 %v1118_v47  ;;  %v1120_v56 = vmax.f32 %v6608_v63, 1e-24  ;;  %v1377_v63 = vld [vmem:[%s7774_s0 + $0x2c0] sm:$0xff] }
 0x466   :  { %v799_v13 = vmul.f32 %v6422_v24, %v787_v4  ;;  %5360 = vmatpush3.bf16.msra.mxu1 %v5357_v58  ;;  %v1374_v58 = vld [vmem:[%s7774_s0 + $0x290] sm:$0xff]  ;;  %v955_v2 = vpop.permute.xlu1 %954  ;;  %5708 = vrsqrt.f32 %v1119_v17 }
 0x467   :  { %v5695_v26 = vpop.eup %5694  ;;  %5362 = vmatprep.subr.bf16.mxu1 %v5361_v62  ;;  %v802_v44 = vmul.f32 %v6422_v24, %v790_v40  ;;  %5710 = vrsqrt.f32 %v1120_v56 }
 0x468   :  { %4843 = vmatprep.mubr.msk.f32.mxu1 %vm377_vm3, %v799_v13  ;;  %v789_v6 = vmul.f32 %v5695_v26, %v6401_v27  ;;  %v1376_v13 = vld [vmem:[%s7774_s0 + $0x2b0] sm:$0xff] }
 0x469   :  { %4844 = vmatmul.mubr.msk.f32.gmra.mrb[24].mxu1 %vm377_vm3, %v800_v31  ;;  %v957_v4 = vpop.permute.xlu0 %956 }
 0x46a   :  { %v801_v30 = vmul.f32 %v6422_v24, %v789_v6  ;;  %5364 = vmatpush3.bf16.msra.mxu1 %v5361_v62  ;;  %v5369_v24 = vpack.c.bf16 %v1152_v8, %v1151_v57  ;;  %v5697_v35 = vpop.eup %5696  ;;  %v959_v48 = vpop.permute.xlu1 %958 }
 0x46b   :  { %5366 = vmatprep.subr.bf16.mxu1 %v5365_v55  ;;  %v5699_v62 = vpop.eup %5698  ;;  %v1129_v14 = vmul.f32 %v5697_v35, %v6273_v1 }
 0x46c   :  { %4846 = vmatprep.mubr.msk.f32.mxu1 %vm377_vm3, %v801_v30  ;;  %v5701_v15 = vpop.eup %5700  ;;  %v1130_v26 = vmul.f32 %v5699_v62, %v6132_v25 }
 0x46d   :  { %4847 = vmatmul.mubr.msk.f32.gmra.mrb[26].mxu1 %vm377_vm3, %v802_v44  ;;  %v1141_v5 = vmul.f32 %v6681_v60, %v1129_v14  ;;  %v1131_v31 = vmul.f32 %v5701_v15, %v6277_v9  ;;  %v1387_v51 = vpop.permute.xlu0 %1386  ;;  %v7796_v14 = vmov 0.0  }
 0x46e   :  { %4865 = vmatprep.mubr.msk.f32.mxu1 %vm235_vm2, %v945_v42  ;;  %v5373_v42 = vpack.c.bf16 %v1375_v21, %v1374_v58  ;;  %v1142_v6 = vmul.f32 %v6681_v60, %v1130_v26 }
 0x46f   :  { %v1143_v59 = vmul.f32 %v6681_v60, %v1131_v31 }
 0x471   :  { %4866 = vmatmul.mubr.msk.f32.vlgmr.msra.gmra.mrb[20].mxu1 %vm235_vm2, %v947_v32  ;;  %v1391_v47 = vpop.permute.xlu0 %1390 }
 0x472   :  { %4868 = vmatprep.mubr.msk.f32.mxu1 %vm235_vm2, %v949_v28  ;;  %5368 = vmatpush3.bf16.msra.mxu1 %v5365_v55  ;;  %v5703_v28 = vpop.eup %5702  ;;  %v5377_v55 = vpack.c.bf16 %v1377_v63, %v1376_v13 }
 0x473   :  { %5370 = vmatprep.subr.bf16.mxu1 %v5369_v24  ;;  %v5705_v40 = vpop.eup %5704  ;;  %v1132_v32 = vmul.f32 %v5703_v28, %v6283_v3 }
 0x474   :  { %v5707_v30 = vpop.eup %5706  ;;  %v1133_v44 = vmul.f32 %v5705_v40, %v6290_v19 }
 0x475   :  { %4869 = vmatmul.mubr.msk.f32.gmra.mrb[22].mxu1 %vm235_vm2, %v951_v53  ;;  %v5709_v45 = vpop.eup %5708  ;;  %v1144_v57 = vmul.f32 %v6681_v60, %v1132_v32  ;;  %v1134_v61 = vmul.f32 %v5707_v30, %v6297_v34 }
 0x476   :  { %4871 = vmatprep.mubr.msk.f32.mxu1 %vm235_vm2, %v953_v36  ;;  %5372 = vmatpush3.bf16.msra.mxu1 %v5369_v24  ;;  %v1145_v8 = vmul.f32 %v6681_v60, %v1133_v44  ;;  %v5711_v53 = vpop.eup %5710  ;;  %v1135_v24 = vmul.f32 %v5709_v45, %v6304_v38  ;;  %v1389_v36 = vpop.permute.xlu1 %1388 }
 0x477   :  { %5374 = vmatprep.subr.bf16.mxu1 %v5373_v42  ;;  %v1146_v58 = vmul.f32 %v6681_v60, %v1134_v61  ;;  %v1136_v10 = vmul.f32 %v5711_v53, %v6183_v52 }
 0x478   :  { %v1147_v21 = vmul.f32 %v6681_v60, %v1135_v24 }
 0x479   :  { %4872 = vmatmul.mubr.msk.f32.gmra.mrb[24].mxu1 %vm235_vm2, %v955_v2  ;;  %v1395_v2 = vpop.permute.xlu0 %1394 }
 0x47a   :  { %4874 = vmatprep.mubr.msk.f32.mxu1 %vm235_vm2, %v957_v4  ;;  %v1393_v17 = vpop.permute.xlu1 %1392 }
 0x47d   :  { %4875 = vmatmul.mubr.msk.f32.gmra.mrb[26].mxu1 %vm235_vm2, %v959_v48  ;;  %v1399_v56 = vpop.permute.xlu0 %1398 }
 0x47e   :  { %4885 = vmatprep.mubr.msk.f32.mxu1 %vm377_vm3, %v1141_v5  ;;  %v1397_v35 = vpop.permute.xlu1 %1396 }
 0x481   :  { %4886 = vmatmul.mubr.msk.f32.vlgmr.msra.gmra.mrb[20].mxu1 %vm377_vm3, %v1142_v6  ;;  %v1619_v62 = vpop.permute.xlu0 %1618 }
 0x482   :  { %4888 = vmatprep.mubr.msk.f32.mxu1 %vm377_vm3, %v1143_v59  ;;  %5376 = vmatpush3.bf16.msra.mxu1 %v5373_v42  ;;  %v1148_v42 = vmul.f32 %v6681_v60, %v1136_v10  ;;  %v6737_v60 = vand.u32 127, %v78_v11  ;;  %v1401_v4 = vpop.permute.xlu1 %1400 }
 0x483   :  { %5378 = vmatprep.subr.bf16.mxu1 %v5377_v55 }
 0x484   :  { %vm1653_vm5 = vcmp.eq.s32.totalorder %v6737_v60, %v1619_v62 }
 0x485   :  { %4889 = vmatmul.mubr.msk.f32.gmra.mrb[22].mxu1 %vm377_vm3, %v1144_v57  ;;  %v6743_v15 = vsel %vm1653_vm5, 1.0, %v7796_v14  ;;  %v1628_v11 = vpop.permute.xlu0 %1627 }
 0x486   :  { %4891 = vmatprep.mubr.msk.f32.mxu1 %vm377_vm3, %v1145_v8  ;;  %5380 = vmatpush3.bf16.msra.mxu1 %v5377_v55  ;;  %v1622_v48 = vpop.permute.xlu1 %1621  ;;  %vm1656_vm8 = vcmp.eq.s32.totalorder %v6737_v60, %v1628_v11 }
 0x487   :  { %4932 = vmatprep.mubr.msk.f32.mxu0 %vm1890_vm4, %v6743_v15  ;;  %vm1654_vm6 = vcmp.eq.s32.totalorder %v6737_v60, %v1622_v48  ;;  %v6760_v59 = vsel %vm1656_vm8, 1.0, %v7796_v14 }
 0x488   :  { %v6750_v6 = vsel %vm1654_vm6, 1.0, %v7796_v14 }
 0x489   :  { %4892 = vmatmul.mubr.msk.f32.gmra.mrb[24].mxu1 %vm377_vm3, %v1146_v58  ;;  %v1634_v31 = vpop.permute.xlu0 %1633 }
 0x48a   :  { %4894 = vmatprep.mubr.msk.f32.mxu1 %vm377_vm3, %v1147_v21  ;;  %v1625_v5 = vpop.permute.xlu1 %1624  ;;  %vm1658_vm10 = vcmp.eq.s32.totalorder %v6737_v60, %v1634_v31 }
 0x48b   :  { %vm1655_vm7 = vcmp.eq.s32.totalorder %v6737_v60, %v1625_v5  ;;  %v6772_v45 = vsel %vm1658_vm10, 1.0, %v7796_v14 }
 0x48c   :  { %v6753_v55 = vsel %vm1655_vm7, 1.0, %v7796_v14 }
 0x48d   :  { %4895 = vmatmul.mubr.msk.f32.gmra.mrb[26].mxu1 %vm377_vm3, %v1148_v42  ;;  %v1640_v32 = vpop.permute.xlu0 %1639 }
 0x48e   :  { %4905 = vmatprep.mubr.msk.f32.mxu1 %vm377_vm3, %v1387_v51  ;;  %v1631_v13 = vpop.permute.xlu1 %1630  ;;  %vm1660_vm12 = vcmp.eq.s32.totalorder %v6737_v60, %v1640_v32 }
 0x48f   :  { %vm1657_vm9 = vcmp.eq.s32.totalorder %v6737_v60, %v1631_v13  ;;  %v6784_v53 = vsel %vm1660_vm12, 1.0, %v7796_v14 }
 0x490   :  { %v6765_v30 = vsel %vm1657_vm9, 1.0, %v7796_v14 }
 0x491   :  { %4906 = vmatmul.mubr.msk.f32.vlgmr.msra.gmra.mrb[20].mxu1 %vm377_vm3, %v1389_v36  ;;  %v1646_v8 = vpop.permute.xlu0 %1645 }
 0x492   :  { %4908 = vmatprep.mubr.msk.f32.mxu1 %vm377_vm3, %v1391_v47  ;;  %v1637_v40 = vpop.permute.xlu1 %1636  ;;  %vm1662_vm14 = vcmp.eq.s32.totalorder %v6737_v60, %v1646_v8 }
 0x493   :  { %vm1659_vm11 = vcmp.eq.s32.totalorder %v6737_v60, %v1637_v40  ;;  %v6796_v58 = vsel %vm1662_vm14, 1.0, %v7796_v14 }
 0x494   :  { %v6777_v57 = vsel %vm1659_vm11, 1.0, %v7796_v14 }
 0x495   :  { %4909 = vmatmul.mubr.msk.f32.gmra.mrb[22].mxu1 %vm377_vm3, %v1393_v17  ;;  %v1652_v51 = vpop.permute.xlu0 %1651 }
 0x496   :  { %4911 = vmatprep.mubr.msk.f32.mxu1 %vm377_vm3, %v1395_v2  ;;  %v1643_v44 = vpop.permute.xlu1 %1642  ;;  %vm1664_vm0 = vcmp.eq.s32.totalorder %v6737_v60, %v1652_v51 }
 0x497   :  { %vm1661_vm13 = vcmp.eq.s32.totalorder %v6737_v60, %v1643_v44  ;;  %v6810_v36 = vsel %vm1664_vm0, 1.0, %v7796_v14 }
 0x498   :  { %v6789_v24 = vsel %vm1661_vm13, 1.0, %v7796_v14 }
 0x499   :  { %4912 = vmatmul.mubr.msk.f32.gmra.mrb[24].mxu1 %vm377_vm3, %v1397_v35  ;;  %v1694_v2 = vpop.permute.xlu0 %1693 }
 0x49a   :  { %4914 = vmatprep.mubr.msk.f32.mxu1 %vm377_vm3, %v1399_v56  ;;  %v1649_v61 = vpop.permute.xlu1 %1648  ;;  %vm1726_vm5 = vcmp.eq.s32.totalorder %v6737_v60, %v1694_v2 }
 0x49b   :  { %vm1663_vm15 = vcmp.eq.s32.totalorder %v6737_v60, %v1649_v61 }
 0x49c   :  { %v6801_v21 = vsel %vm1663_vm15, 1.0, %v7796_v14 }
 0x49d   :  { %4915 = vmatmul.mubr.msk.f32.gmra.mrb[26].mxu1 %vm377_vm3, %v1401_v4  ;;  %v1703_v48 = vpop.permute.xlu0 %1702 }
 0x49e   :  { %v1691_v10 = vpop.permute.xlu1 %1690  ;;  %vm1729_vm8 = vcmp.eq.s32.totalorder %v6737_v60, %v1703_v48 }
 0x49f   :  { %vm1725_vm1 = vcmp.eq.s32.totalorder %v6737_v60, %v1691_v10  ;;  %v6846_v10 = vsel %vm1726_vm5, 1.0, %v7796_v14  ;;  %v6862_v7 = vsel %vm1729_vm8, 1.0, %v7796_v14 }
 0x4a0   :  { %v6813_v42 = vsel %vm1725_vm1, 1.0, %v7796_v14  ;;  %7885 = vst [vmem:[#allocation39_spill] sm:$0xff] %v6846_v10  ;;  %7888 = vst [vmem:[#allocation42_spill] sm:$0xff] %v6862_v7 }
 0x4a1   :  { %7878 = vst [vmem:[#allocation32_spill] sm:$0xff] %v6813_v42 }
 0x4a2   :  { %v1697_v47 = vpop.permute.xlu1 %1696 }
 0x4a3   :  { %vm1727_vm6 = vcmp.eq.s32.totalorder %v6737_v60, %v1697_v47 }
 0x4a4   :  { %v6849_v22 = vsel %vm1727_vm6, 1.0, %v7796_v14 }
 0x4a5   :  { %7886 = vst [vmem:[#allocation40_spill] sm:$0xff] %v6849_v22 }
 0x4a6   :  { %v1700_v17 = vpop.permute.xlu1 %1699 }
 0x4a7   :  { %vm1728_vm7 = vcmp.eq.s32.totalorder %v6737_v60, %v1700_v17 }
 0x4a8   :  { %v6858_v47 = vsel %vm1728_vm7, 1.0, %v7796_v14 }
 0x4a9   :  { %7887 = vst [vmem:[#allocation41_spill] sm:$0xff] %v6858_v47 }
 0x4aa   :  { %v1706_v4 = vpop.permute.xlu1 %1705 }
 0x4ab   :  { %vm1730_vm9 = vcmp.eq.s32.totalorder %v6737_v60, %v1706_v4  ;;  %v1805_v4 = vld [vmem:[%s7774_s0 + $0x330] sm:$0xff] }
 0x4ac   :  { %v5449_v46 = vpack.c.bf16 %v1806_v20, %v1805_v4  ;;  %v1808_v4 = vld [vmem:[%s7774_s0 + $0x360] sm:$0xff] }
 0x4bc   :  { %v4927_v63 = vpop.f32.mrb[20].mxu0 }
 0x4bd   :  { %v1881_v26 = vpop.f32.mrb[21].mxu0 }
 0x4be   :  { %v5389_v28 = vpack.c.bf16 %v4927_v63, %v1881_v26  ;;  %v1712_v63 = vpop.permute.xlu1 %1711 }
 0x4bf   :  { %vm1732_vm11 = vcmp.eq.s32.totalorder %v6737_v60, %v1712_v63 }
 0x4c0   :  { %5390 = vmatprep.subr.bf16.mxu0 %v5389_v28  ;;  %v6888_v54 = vsel %vm1732_vm11, 1.0, %v7796_v14 }
 0x4c1   :  { %5392 = vmatpush3.bf16.msra.mxu0 %v5389_v28  ;;  %v1709_v28 = vpop.permute.xlu0 %1708  ;;  %7891 = vst [vmem:[#allocation45_spill] sm:$0xff] %v6888_v54 }
 0x4c2   :  { %v1718_v8 = vpop.permute.xlu1 %1717  ;;  %vm1731_vm10 = vcmp.eq.s32.totalorder %v6737_v60, %v1709_v28 }
 0x4c3   :  { %v6880_v28 = vsel %vm1731_vm10, 1.0, %v7796_v14  ;;  %vm1734_vm13 = vcmp.eq.s32.totalorder %v6737_v60, %v1718_v8 }
 0x4c4   :  { %4933 = vmatmul.mubr.msk.f32.vlgmr.msra.gmra.mrb[22].mxu0 %vm1890_vm4, %v6750_v6  ;;  %7890 = vst [vmem:[#allocation44_spill] sm:$0xff] %v6880_v28  ;;  %v6900_v20 = vsel %vm1734_vm13, 1.0, %v7796_v14 }
 0x4c5   :  { %4935 = vmatprep.mubr.msk.f32.mxu0 %vm1890_vm4, %v6753_v55  ;;  %v1715_v51 = vpop.permute.xlu0 %1714  ;;  %7893 = vst [vmem:[#allocation47_spill] sm:$0xff] %v6900_v20 }
 0x4c6   :  { %v1724_v27 = vpop.permute.xlu1 %1723  ;;  %vm1733_vm12 = vcmp.eq.s32.totalorder %v6737_v60, %v1715_v51 }
 0x4c7   :  { %v6892_v63 = vsel %vm1733_vm12, 1.0, %v7796_v14  ;;  %vm1736_vm0 = vcmp.eq.s32.totalorder %v6737_v60, %v1724_v27  ;;  %v1807_v27 = vld [vmem:[%s7774_s0 + $0x350] sm:$0xff] }
 0x4c8   :  { %4936 = vmatmul.mubr.msk.f32.gmra.mrb[24].mxu0 %vm1890_vm4, %v6760_v59  ;;  %7892 = vst [vmem:[#allocation46_spill] sm:$0xff] %v6892_v63  ;;  %v5453_v43 = vpack.c.bf16 %v1808_v4, %v1807_v27 }
 0x4c9   :  { %4938 = vmatprep.mubr.msk.f32.mxu0 %vm1890_vm4, %v6765_v30  ;;  %v1721_v2 = vpop.permute.xlu0 %1720 }
 0x4ca   :  { %v1550_v17 = vpop.permute.xlu1 %1549  ;;  %vm1735_vm14 = vcmp.eq.s32.totalorder %v6737_v60, %v1721_v2  ;;  %v6916_v2 = vsel %vm1736_vm0, 1.0, %v7796_v14 }
 0x4cb   :  { %vm1582_vm1 = vcmp.eq.s32.totalorder %v6737_v60, %v1550_v17  ;;  %7895 = vst [vmem:[#allocation49_spill] sm:$0xff] %v6916_v2 }
 0x4cc   :  { %4939 = vmatmul.mubr.msk.f32.gmra.mrb[26].mxu0 %vm1890_vm4, %v6772_v45  ;;  %v6927_v37 = vsel %vm1582_vm1, 1.0, %v7796_v14 }
 0x4cd   :  { %4941 = vmatprep.mubr.msk.f32.mxu0 %vm1890_vm4, %v6777_v57  ;;  %v1547_v48 = vpop.permute.xlu0 %1546  ;;  %7896 = vst [vmem:[#allocation50_spill] sm:$0xff] %v6927_v37 }
 0x4ce   :  { %vm1581_vm15 = vcmp.eq.s32.totalorder %v6737_v60, %v1547_v48 }
 0x4d0   :  { %4942 = vmatmul.mubr.msk.f32.gmra.mrb[28].mxu0 %vm1890_vm4, %v6784_v53 }
 0x4d1   :  { %4944 = vmatprep.mubr.msk.f32.mxu0 %vm1890_vm4, %v6789_v24  ;;  %v1556_v51 = vpop.permute.xlu0 %1555 }
 0x4d2   :  { %vm1584_vm6 = vcmp.eq.s32.totalorder %v6737_v60, %v1556_v51 }
 0x4d4   :  { %4945 = vmatmul.mubr.msk.f32.gmra.mrb[30].mxu0 %vm1890_vm4, %v6796_v58 }
 0x4d5   :  { %4947 = vmatprep.mubr.msk.f32.mxu0 %vm1890_vm4, %v6801_v21  ;;  %v1562_v48 = vpop.permute.xlu0 %1561 }
 0x4d6   :  { %vm1586_vm8 = vcmp.eq.s32.totalorder %v6737_v60, %v1562_v48 }
 0x4d8   :  { %4948 = vmatmul.mubr.msk.f32.gmra.mrb[32].mxu0 %vm1890_vm4, %v6810_v36 }
 0x4d9   :  { %4966 = vmatprep.mubr.msk.f32.mxu0 %vm235_vm2, %v6813_v42  ;;  %v1568_v41 = vpop.permute.xlu0 %1567 }
 0x4da   :  { %vm1588_vm10 = vcmp.eq.s32.totalorder %v6737_v60, %v1568_v41 }
 0x564   :  { %v6819_v35 = vpop.f32.mrb[20].mxu1 }
 0x565   :  { %v6821_v56 = vpop.f32.mrb[21].mxu1 }
 0x566   :  { %v5393_v62 = vpack.c.bf16 %v6819_v35, %v6821_v56 }
 0x568   :  { %v6825_v5 = vpop.f32.mrb[22].mxu1  ;;  %5394 = vmatprep.subr.bf16.mxu0 %v5393_v62 }
 0x569   :  { %7879 = vst [vmem:[#allocation33_spill] sm:$0xff] %v6825_v5  ;;  %v6827_v11 = vpop.f32.mrb[23].mxu1  ;;  %5396 = vmatpush3.bf16.msra.mxu0 %v5393_v62 }
 0x56a   :  { %7880 = vst [vmem:[#allocation34_spill] sm:$0xff] %v6827_v11  ;;  %v5397_v13 = vpack.c.bf16 %v6825_v5, %v6827_v11 }
 0x56c   :  { %v6831_v26 = vpop.f32.mrb[24].mxu1  ;;  %5398 = vmatprep.subr.bf16.mxu0 %v5397_v13 }
 0x56d   :  { %7881 = vst [vmem:[#allocation35_spill] sm:$0xff] %v6831_v26  ;;  %v6833_v31 = vpop.f32.mrb[25].mxu1  ;;  %5400 = vmatpush3.bf16.msra.mxu0 %v5397_v13 }
 0x56e   :  { %7882 = vst [vmem:[#allocation36_spill] sm:$0xff] %v6833_v31  ;;  %v5401_v40 = vpack.c.bf16 %v6831_v26, %v6833_v31 }
 0x570   :  { %v6837_v32 = vpop.f32.mrb[26].mxu1  ;;  %5402 = vmatprep.subr.bf16.mxu0 %v5401_v40 }
 0x571   :  { %7883 = vst [vmem:[#allocation37_spill] sm:$0xff] %v6837_v32  ;;  %v6839_v44 = vpop.f32.mrb[27].mxu1  ;;  %5404 = vmatpush3.bf16.msra.mxu0 %v5401_v40 }
 0x572   :  { %7884 = vst [vmem:[#allocation38_spill] sm:$0xff] %v6839_v44  ;;  %v5405_v61 = vpack.c.bf16 %v6837_v32, %v6839_v44 }
 0x574   :  { %5406 = vmatprep.subr.bf16.mxu0 %v5405_v61 }
 0x575   :  { %5408 = vmatpush3.bf16.msra.mxu0 %v5405_v61 }
 0x576   :  { %5410 = vmatprep.subr.bf16.mxu0 %v5393_v62 }
 0x578   :  { %4967 = vmatmul.mubr.msk.f32.vlgmr.msra.gmra.mrb[34].mxu0 %vm235_vm2, %v6846_v10 }
 0x579   :  { %4969 = vmatprep.mubr.msk.f32.mxu0 %vm235_vm2, %v6849_v22  ;;  %5412 = vmatpush3.bf16.msra.mxu0 %v5393_v62  ;;  %v6870_v62 = vsel %vm1730_vm9, 1.0, %v7796_v14 }
 0x57a   :  { %5414 = vmatprep.subr.bf16.mxu0 %v5397_v13  ;;  %7889 = vst [vmem:[#allocation43_spill] sm:$0xff] %v6870_v62 }
 0x57c   :  { %4970 = vmatmul.mubr.msk.f32.gmra.mrb[36].mxu0 %vm235_vm2, %v6858_v47 }
 0x57d   :  { %4972 = vmatprep.mubr.msk.f32.mxu0 %vm235_vm2, %v6862_v7  ;;  %5416 = vmatpush3.bf16.msra.mxu0 %v5397_v13  ;;  %v1553_v13 = vpop.permute.xlu1 %1552 }
 0x57e   :  { %5418 = vmatprep.subr.bf16.mxu0 %v5401_v40  ;;  %vm1583_vm5 = vcmp.eq.s32.totalorder %v6737_v60, %v1553_v13  ;;  %v6942_v13 = vsel %vm1584_vm6, 1.0, %v7796_v14 }
 0x57f   :  { %v6934_v50 = vsel %vm1583_vm5, 1.0, %v7796_v14  ;;  %7898 = vst [vmem:[#allocation52_spill] sm:$0xff] %v6942_v13 }
 0x580   :  { %4973 = vmatmul.mubr.msk.f32.gmra.mrb[38].mxu0 %vm235_vm2, %v6870_v62  ;;  %7897 = vst [vmem:[#allocation51_spill] sm:$0xff] %v6934_v50 }
 0x581   :  { %4975 = vmatprep.mubr.msk.f32.mxu0 %vm235_vm2, %v6880_v28  ;;  %5420 = vmatpush3.bf16.msra.mxu0 %v5401_v40  ;;  %v6905_v40 = vsel %vm1735_vm14, 1.0, %v7796_v14  ;;  %v1559_v8 = vpop.permute.xlu1 %1558 }
 0x582   :  { %5422 = vmatprep.subr.bf16.mxu0 %v5405_v61  ;;  %7894 = vst [vmem:[#allocation48_spill] sm:$0xff] %v6905_v40  ;;  %vm1585_vm7 = vcmp.eq.s32.totalorder %v6737_v60, %v1559_v8  ;;  %v1574_v8 = vpop.permute.xlu0 %1573 }
 0x583   :  { %v6946_v51 = vsel %vm1585_vm7, 1.0, %v7796_v14  ;;  %vm1590_vm12 = vcmp.eq.s32.totalorder %v6737_v60, %v1574_v8 }
 0x584   :  { %4976 = vmatmul.mubr.msk.f32.gmra.mrb[40].mxu0 %vm235_vm2, %v6888_v54  ;;  %7899 = vst [vmem:[#allocation53_spill] sm:$0xff] %v6946_v51 }
 0x585   :  { %4978 = vmatprep.mubr.msk.f32.mxu0 %vm235_vm2, %v6892_v63  ;;  %5424 = vmatpush3.bf16.msra.mxu0 %v5405_v61  ;;  %v6912_v61 = vsel %vm1581_vm15, 1.0, %v7796_v14  ;;  %v1565_v17 = vpop.permute.xlu1 %1564  ;;  %vm2517_vm15 = vcmask 785408  }
 0x586   :  { %5450 = vmatprep.subr.bf16.mxu0 %v5449_v46  ;;  %vm1587_vm9 = vcmp.eq.s32.totalorder %v6737_v60, %v1565_v17  ;;  %v1580_v41 = vpop.permute.xlu0 %1579 }
 0x587   :  { %v6958_v48 = vsel %vm1587_vm9, 1.0, %v7796_v14  ;;  %vm1592_vm14 = vcmp.eq.s32.totalorder %v6737_v60, %v1580_v41 }
 0x588   :  { %4979 = vmatmul.mubr.msk.f32.gmra.mrb[42].mxu0 %vm235_vm2, %v6900_v20  ;;  %7901 = vst [vmem:[#allocation55_spill] sm:$0xff] %v6958_v48  ;;  %v6989_v8 = vsel %vm1592_vm14, 1.0, %v7796_v14 }
 0x589   :  { %4981 = vmatprep.mubr.msk.f32.mxu0 %vm235_vm2, %v6905_v40  ;;  %v1571_v27 = vpop.permute.xlu1 %1570  ;;  %7906 = vst [vmem:[#allocation60_spill] sm:$0xff] %v6989_v8 }
 0x58a   :  { %vm1589_vm11 = vcmp.eq.s32.totalorder %v6737_v60, %v1571_v27  ;;  %v6978_v27 = vsel %vm1590_vm12, 1.0, %v7796_v14 }
 0x58b   :  { %v6970_v17 = vsel %vm1589_vm11, 1.0, %v7796_v14  ;;  %7904 = vst [vmem:[#allocation58_spill] sm:$0xff] %v6978_v27 }
 0x58c   :  { %4982 = vmatmul.mubr.msk.f32.gmra.mrb[44].mxu0 %vm235_vm2, %v6916_v2  ;;  %7903 = vst [vmem:[#allocation57_spill] sm:$0xff] %v6970_v17 }
 0x58d   :  { %5000 = vmatprep.mubr.msk.f32.mxu0 %vm235_vm2, %v6912_v61  ;;  %v1577_v4 = vpop.permute.xlu1 %1576 }
 0x58e   :  { %vm1591_vm13 = vcmp.eq.s32.totalorder %v6737_v60, %v1577_v4  ;;  %v2948_v60 = vld [vmem:[%s7774_s0 + $0x370] sm:$0xff]  ;;  %v2949_v4 = vld [vmem:[%s7774_s0 + $0x380] sm:$0xff] }
 0x58f   :  { %v6982_v49 = vsel %vm1591_vm13, 1.0, %v7796_v14  ;;  %v5473_v41 = vpack.c.bf16 %v2949_v4, %v2948_v60 }
 0x590   :  { %5001 = vmatmul.mubr.msk.f32.vlgmr.msra.gmra.mrb[22].mxu0 %vm235_vm2, %v6927_v37  ;;  %7905 = vst [vmem:[#allocation59_spill] sm:$0xff] %v6982_v49 }
 0x591   :  { %5003 = vmatprep.mubr.msk.f32.mxu0 %vm235_vm2, %v6934_v50  ;;  %5452 = vmatpush3.bf16.msra.mxu0 %v5449_v46  ;;  %v6954_v46 = vsel %vm1586_vm8, 1.0, %v7796_v14 }
 0x592   :  { %5454 = vmatprep.subr.bf16.mxu0 %v5453_v43  ;;  %7900 = vst [vmem:[#allocation54_spill] sm:$0xff] %v6954_v46 }
 0x594   :  { %5004 = vmatmul.mubr.msk.f32.gmra.mrb[24].mxu0 %vm235_vm2, %v6942_v13 }
 0x595   :  { %5006 = vmatprep.mubr.msk.f32.mxu0 %vm235_vm2, %v6946_v51  ;;  %5456 = vmatpush3.bf16.msra.mxu0 %v5453_v43  ;;  %v6966_v43 = vsel %vm1588_vm10, 1.0, %v7796_v14  ;;  %v2950_v14 = vld [vmem:[%s7774_s0 + $0x390] sm:$0xff] }
 0x596   :  { %7902 = vst [vmem:[#allocation56_spill] sm:$0xff] %v6966_v43  ;;  %5474 = vmatprep.subr.bf16.mxu0 %v5473_v41 }
 0x598   :  { %5007 = vmatmul.mubr.msk.f32.gmra.mrb[26].mxu0 %vm235_vm2, %v6954_v46 }
 0x599   :  { %5009 = vmatprep.mubr.msk.f32.mxu0 %vm235_vm2, %v6958_v48 }
 0x59c   :  { %5010 = vmatmul.mubr.msk.f32.gmra.mrb[28].mxu0 %vm235_vm2, %v6966_v43 }
 0x59d   :  { %5012 = vmatprep.mubr.msk.f32.mxu0 %vm235_vm2, %v6970_v17 }
 0x5a0   :  { %5013 = vmatmul.mubr.msk.f32.gmra.mrb[30].mxu0 %vm235_vm2, %v6978_v27 }
 0x5a1   :  { %5015 = vmatprep.mubr.msk.f32.mxu0 %vm235_vm2, %v6982_v49 }
 0x5a4   :  { %5016 = vmatmul.mubr.msk.f32.gmra.mrb[32].mxu0 %vm235_vm2, %v6989_v8 }
 0x5a5   :  { %5062 = vmatprep.mubr.msk.f32.mxu0 %vm377_vm3, %v6495_v0  ;;  %v2951_v0 = vld [vmem:[%s7774_s0 + $0x3a0] sm:$0xff] }
 0x5a8   :  { %5063 = vmatmul.mubr.msk.f32.vlgmr.msra.gmra.mrb[46].mxu0 %vm377_vm3, %v6504_v16  ;;  %v5477_v16 = vpack.c.bf16 %v2951_v0, %v2950_v14 }
 0x5a9   :  { %5476 = vmatpush3.bf16.msra.mxu0 %v5473_v41 }
 0x5aa   :  { %5478 = vmatprep.subr.bf16.mxu0 %v5477_v16 }
 0x5ad   :  { %5480 = vmatpush3.bf16.msra.mxu0 %v5477_v16 }
 0x64b   :  { %v4968_v33 = vpop.f32.mrb[34].mxu0 }
 0x64c   :  { %v2154_v39 = vpop.f32.mrb[35].mxu0 }
 0x64f   :  { %v4971_v23 = vpop.f32.mrb[36].mxu0 }
 0x650   :  { %v2164_v29 = vpop.f32.mrb[37].mxu0 }
 0x653   :  { %v4974_v52 = vpop.f32.mrb[38].mxu0 }
 0x654   :  { %v2174_v18 = vpop.f32.mrb[39].mxu0 }
 0x657   :  { %v4977_v60 = vpop.f32.mrb[40].mxu0 }
 0x658   :  { %v2184_v4 = vpop.f32.mrb[41].mxu0 }
 0x65b   :  { %v4980_v41 = vpop.f32.mrb[42].mxu0 }
 0x65c   :  { %v2194_v34 = vpop.f32.mrb[43].mxu0 }
 0x65f   :  { %v4983_v38 = vpop.f32.mrb[44].mxu0 }
 0x660   :  { %v2204_v3 = vpop.f32.mrb[45].mxu0 }
 0x663   :  { %v7009_v19 = vpop.f32.mrb[22].mxu0 }
 0x664   :  { %v2375_v25 = vmul.f32 %v7009_v19, %v4968_v33  ;;  %v7012_v9 = vpop.f32.mrb[23].mxu0 }
 0x665   :  { %v2374_v14 = vmul.f32 %v7012_v9, %v2154_v39 }
 0x666   :  { %v2389_v0 = vsel %vm235_vm2, %v2375_v25, 0.0 }
 0x667   :  { %2390 = vadd.xlane.f32.xlu0 %v2389_v0  ;;  %v7016_v16 = vpop.f32.mrb[24].mxu0  ;;  %v2386_v1 = vsel %vm235_vm2, %v2374_v14, 0.0 }
 0x668   :  { %v2377_v8 = vmul.f32 %v7016_v16, %v4971_v23  ;;  %2387 = vadd.xlane.f32.xlu1 %v2386_v1  ;;  %v7020_v2 = vpop.f32.mrb[25].mxu0 }
 0x669   :  { %v2376_v49 = vmul.f32 %v7020_v2, %v2164_v29 }
 0x66a   :  { %v2395_v33 = vsel %vm235_vm2, %v2377_v8, 0.0 }
 0x66b   :  { %v7024_v40 = vpop.f32.mrb[26].mxu0  ;;  %v2392_v39 = vsel %vm235_vm2, %v2376_v49, 0.0 }
 0x66c   :  { %v2379_v25 = vmul.f32 %v7024_v40, %v4974_v52  ;;  %2396 = vadd.xlane.f32.xlu1 %v2395_v33  ;;  %2393 = vadd.xlane.f32.xlu0 %v2392_v39  ;;  %v7028_v0 = vpop.f32.mrb[27].mxu0 }
 0x66d   :  { %v2378_v14 = vmul.f32 %v7028_v0, %v2174_v18 }
 0x66e   :  { %v2401_v23 = vsel %vm235_vm2, %v2379_v25, 0.0 }
 0x66f   :  { %v7032_v1 = vpop.f32.mrb[28].mxu0  ;;  %v2398_v29 = vsel %vm235_vm2, %v2378_v14, 0.0 }
 0x670   :  { %v2381_v8 = vmul.f32 %v7032_v1, %v4977_v60  ;;  %2402 = vadd.xlane.f32.xlu1 %v2401_v23  ;;  %2399 = vadd.xlane.f32.xlu0 %v2398_v29  ;;  %v7036_v27 = vpop.f32.mrb[29].mxu0 }
 0x671   :  { %v2380_v49 = vmul.f32 %v7036_v27, %v2184_v4 }
 0x672   :  { %v2407_v52 = vsel %vm235_vm2, %v2381_v8, 0.0 }
 0x673   :  { %v7040_v33 = vpop.f32.mrb[30].mxu0  ;;  %v2404_v18 = vsel %vm235_vm2, %v2380_v49, 0.0 }
 0x674   :  { %v2383_v39 = vmul.f32 %v7040_v33, %v4980_v41  ;;  %2408 = vadd.xlane.f32.xlu1 %v2407_v52  ;;  %2405 = vadd.xlane.f32.xlu0 %v2404_v18  ;;  %v7044_v25 = vpop.f32.mrb[31].mxu0 }
 0x675   :  { %v2382_v60 = vmul.f32 %v7044_v25, %v2194_v34 }
 0x676   :  { %v2413_v14 = vsel %vm235_vm2, %v2383_v39, 0.0  ;;  %v7070_v39 = vld [vmem:[%s7778_s4] ss:$0 sm:$0xff] }
 0x677   :  { %v7048_v23 = vpop.f32.mrb[32].mxu0  ;;  %v2410_v4 = vsel %vm235_vm2, %v2382_v60, 0.0  ;;  %vm1775_vm0 = vcmp.eq.s32.totalorder %v6113_v12, %v7070_v39  ;;  %v7909_v60 = vmov 0.0  }
 0x678   :  { %v2385_v29 = vmul.f32 %v7048_v23, %v4983_v38  ;;  %2414 = vadd.xlane.f32.xlu1 %v2413_v14  ;;  %2411 = vadd.xlane.f32.xlu0 %v2410_v4  ;;  %v7052_v8 = vpop.f32.mrb[33].mxu0  ;;  %v7075_v14 = vsel %vm1775_vm0, 1.0, %v7909_v60 }
 0x679   :  { %v2384_v41 = vmul.f32 %v7052_v8, %v2204_v3  ;;  %7910 = vst [vmem:[#allocation63_spill] sm:$0xff] %v7075_v14  ;;  %5042 = vmatprep.mubr.msk.f32.mxu1 %vm2517_vm15, %v7075_v14 }
 0x67a   :  { %v2419_v49 = vsel %vm235_vm2, %v2385_v29, 0.0 }
 0x67b   :  { %v7056_v52 = vpop.f32.mrb[46].mxu0  ;;  %v2416_v34 = vsel %vm235_vm2, %v2384_v41, 0.0 }
 0x67c   :  { %7907 = vst [vmem:[#allocation61_spill] sm:$0xff] %v7056_v52  ;;  %2420 = vadd.xlane.f32.xlu1 %v2419_v49  ;;  %v7059_v18 = vpop.f32.mrb[47].mxu0  ;;  %2417 = vadd.xlane.f32.xlu0 %v2416_v34 }
 0x67d   :  { %7908 = vst [vmem:[#allocation62_spill] sm:$0xff] %v7059_v18  ;;  %5101 = vmatprep.mubr.msk.f32.mxu0 %vm377_vm3, %v7059_v18 }
 0x67e   :  { %5102 = vmatmul.mubr.msk.f32.vlgmr.msra.gmra.mrb[48].mxu0 %vm377_vm3, %v7056_v52 }
 0x67f   :  { %5108 = vmatprep.mubr.msk.f32.mxu0 %vm1890_vm4, %v6743_v15 }
 0x6f4   :  { %v2391_v3 = vpop.xlane.xlu0 %2390 }
 0x6f5   :  { %v2388_v38 = vpop.xlane.xlu1 %2387 }
 0x6f9   :  { %v2394_v4 = vpop.xlane.xlu0 %2393  ;;  %v2397_v29 = vpop.xlane.xlu1 %2396 }
 0x6fd   :  { %v2400_v15 = vpop.xlane.xlu0 %2399  ;;  %v2403_v41 = vpop.xlane.xlu1 %2402 }
 0x6fe   :  { %v2422_v20 = vmax.f32 %v2388_v38, %v2400_v15  ;;  %v2423_v17 = vmax.f32 %v2391_v3, %v2403_v41 }
 0x701   :  { %v2406_v49 = vpop.xlane.xlu0 %2405  ;;  %v2409_v34 = vpop.xlane.xlu1 %2408 }
 0x702   :  { %v2424_v63 = vmax.f32 %v2394_v4, %v2406_v49  ;;  %v2425_v43 = vmax.f32 %v2397_v29, %v2409_v34 }
 0x705   :  { %v2412_v52 = vpop.xlane.xlu0 %2411  ;;  %v2415_v18 = vpop.xlane.xlu1 %2414 }
 0x706   :  { %v2426_v54 = vmax.f32 %v2422_v20, %v2412_v52  ;;  %v2427_v48 = vmax.f32 %v2423_v17, %v2415_v18 }
 0x708   :  { %v2430_v7 = vmax.f32 %v2426_v54, %v2427_v48 }
 0x709   :  { %v2418_v28 = vpop.xlane.xlu0 %2417  ;;  %v2421_v46 = vpop.xlane.xlu1 %2420 }
 0x70a   :  { %v2428_v62 = vmax.f32 %v2424_v63, %v2418_v28  ;;  %v2429_v51 = vmax.f32 %v2425_v43, %v2421_v46 }
 0x70c   :  { %v2431_v14 = vmax.f32 %v2428_v62, %v2429_v51 }
 0x70e   :  { %v2432_v13 = vmax.f32 %v2430_v7, %v2431_v14 }
 0x710   :  { %v2433_v47 = vrot.slane %v2432_v13, 4 }
 0x712   :  { %v2434_v50 = vmax.f32 %v2432_v13, %v2433_v47 }
 0x714   :  { %v2435_v22 = vrot.slane %v2434_v50, 2 }
 0x716   :  { %v2436_v37 = vmax.f32 %v2434_v50, %v2435_v22 }
 0x718   :  { %v2437_v10 = vrot.slane %v2436_v37, 1 }
 0x71a   :  { %v2438_v42 = vmax.f32 %v2436_v37, %v2437_v10 }
 0x71c   :  { %v2439_v32 = vsub.f32 %v2388_v38, %v2438_v42  ;;  %v2440_v44 = vsub.f32 %v2391_v3, %v2438_v42  ;;  %v2441_v26 = vsub.f32 %v2394_v4, %v2438_v42  ;;  %v2442_v31 = vsub.f32 %v2397_v29, %v2438_v42 }
 0x71d   :  { %v2443_v17 = vsub.f32 %v2400_v15, %v2438_v42  ;;  %v2444_v63 = vsub.f32 %v2403_v41, %v2438_v42  ;;  %v2445_v62 = vsub.f32 %v2406_v49, %v2438_v42  ;;  %v2446_v47 = vsub.f32 %v2409_v34, %v2438_v42 }
 0x71e   :  { %v2451_v5 = vmul.f32 1.442695, %v2439_v32  ;;  %v2453_v20 = vmul.f32 1.442695, %v2440_v44  ;;  %v2455_v11 = vmul.f32 1.442695, %v2441_v26  ;;  %v2447_v22 = vsub.f32 %v2412_v52, %v2438_v42 }
 0x71f   :  { %v2457_v54 = vmul.f32 1.442695, %v2442_v31  ;;  %v2459_v7 = vmul.f32 1.442695, %v2443_v17  ;;  %v2461_v50 = vmul.f32 1.442695, %v2444_v63  ;;  %v2448_v10 = vsub.f32 %v2415_v18, %v2438_v42 }
 0x720   :  { %5712 = vpow2.f32 %v2451_v5  ;;  %v2463_v37 = vmul.f32 1.442695, %v2445_v62  ;;  %v2465_v13 = vmul.f32 1.442695, %v2446_v47  ;;  %v2449_v51 = vsub.f32 %v2418_v28, %v2438_v42 }
 0x721   :  { %5714 = vpow2.f32 %v2453_v20  ;;  %v2467_v5 = vmul.f32 1.442695, %v2447_v22  ;;  %v2450_v31 = vsub.f32 %v2421_v46, %v2438_v42 }
 0x722   :  { %5716 = vpow2.f32 %v2455_v11  ;;  %v2469_v11 = vmul.f32 1.442695, %v2448_v10  ;;  %v2471_v38 = vmul.f32 1.442695, %v2449_v51 }
 0x723   :  { %5718 = vpow2.f32 %v2457_v54  ;;  %v2473_v18 = vmul.f32 1.442695, %v2450_v31 }
 0x724   :  { %5720 = vpow2.f32 %v2459_v7 }
 0x725   :  { %5722 = vpow2.f32 %v2461_v50 }
 0x726   :  { %5724 = vpow2.f32 %v2463_v37 }
 0x727   :  { %5726 = vpow2.f32 %v2465_v13 }
 0x728   :  { %5728 = vpow2.f32 %v2467_v5 }
 0x729   :  { %5730 = vpow2.f32 %v2469_v11 }
 0x72a   :  { %v5713_v32 = vpop.eup %5712  ;;  %5732 = vpow2.f32 %v2471_v38 }
 0x72b   :  { %v5715_v44 = vpop.eup %5714  ;;  %5734 = vpow2.f32 %v2473_v18 }
 0x72c   :  { %v2475_v26 = vadd.f32 %v5715_v44, %v5713_v32  ;;  %v5717_v48 = vpop.eup %5716 }
 0x72d   :  { %v5719_v3 = vpop.eup %5718 }
 0x72e   :  { %v2476_v43 = vadd.f32 %v5717_v48, %v2475_v26  ;;  %v5721_v14 = vpop.eup %5720 }
 0x72f   :  { %v5723_v29 = vpop.eup %5722 }
 0x730   :  { %v2477_v52 = vadd.f32 %v5719_v3, %v2476_v43  ;;  %v5725_v28 = vpop.eup %5724 }
 0x731   :  { %v5727_v49 = vpop.eup %5726 }
 0x732   :  { %v2478_v4 = vadd.f32 %v5721_v14, %v2477_v52  ;;  %v5729_v42 = vpop.eup %5728 }
 0x733   :  { %v5731_v20 = vpop.eup %5730 }
 0x734   :  { %v2479_v15 = vadd.f32 %v5723_v29, %v2478_v4  ;;  %v5733_v63 = vpop.eup %5732 }
 0x735   :  { %v5735_v62 = vpop.eup %5734 }
 0x736   :  { %v2480_v41 = vadd.f32 %v5725_v28, %v2479_v15 }
 0x738   :  { %v2481_v34 = vadd.f32 %v5727_v49, %v2480_v41 }
 0x73a   :  { %v2482_v46 = vadd.f32 %v5729_v42, %v2481_v34 }
 0x73c   :  { %v2483_v17 = vadd.f32 %v5731_v20, %v2482_v46 }
 0x73e   :  { %v2484_v54 = vadd.f32 %v5733_v63, %v2483_v17 }
 0x740   :  { %v2485_v7 = vadd.f32 %v5735_v62, %v2484_v54 }
 0x742   :  { %v2486_v47 = vrot.slane %v2485_v7, 4 }
 0x744   :  { %v2487_v50 = vadd.f32 %v2486_v47, %v2485_v7  ;;  %v1769_v47 = vadd.s32 56, %v6113_v12 }
 0x746   :  { %v2488_v22 = vrot.slane %v2487_v50, 2  ;;  %vm1782_vm9 = vcmp.eq.s32.totalorder %v1769_v47, %v7070_v39 }
 0x748   :  { %v2489_v37 = vadd.f32 %v2488_v22, %v2487_v50  ;;  %v2736_v50 = vld [vmem:[%s7774_s0 + $0x450] sm:$0xff]  ;;  %v2737_v22 = vld [vmem:[%s7774_s0 + $0x460] sm:$0xff] }
 0x74a   :  { %v2490_v10 = vrot.slane %v2489_v37, 1 }
 0x74c   :  { %v2491_v13 = vadd.f32 %v2490_v10, %v2489_v37  ;;  %v5469_v10 = vpack.c.bf16 %v2737_v22, %v2736_v50 }
 0x74e   :  { %5736 = vrcp.f32 %v2491_v13  ;;  %v7184_v13 = vsel %vm1782_vm9, 1.0, %v7909_v60 }
 0x751   :  { %v5103_v51 = vpop.f32.mrb[48].mxu0 }
 0x752   :  { %v3028_v5 = vpop.f32.mrb[49].mxu0 }
 0x753   :  { %v5481_v26 = vpack.c.bf16 %v5103_v51, %v3028_v5  ;;  %v7912_v51 = vld [vmem:[#allocation33_spill] sm:$0xff]  ;;  %v7913_v5 = vld [vmem:[#allocation36_spill] sm:$0xff] }
 0x755   :  { %5482 = vmatprep.subr.bf16.mxu0 %v5481_v26 }
 0x756   :  { %5484 = vmatpush3.bf16.msra.mxu0 %v5481_v26  ;;  %v7915_v26 = vld [vmem:[#allocation38_spill] sm:$0xff] }
 0x758   :  { %v5737_v31 = vpop.eup %5736 }
 0x759   :  { %5109 = vmatmul.mubr.msk.f32.vlgmr.msra.gmra.mrb[50].mxu0 %vm1890_vm4, %v6750_v6  ;;  %v2493_v11 = vmul.f32 %v5737_v31, %v5713_v32  ;;  %v2494_v43 = vmul.f32 %v5737_v31, %v5715_v44  ;;  %v2495_v38 = vmul.f32 %v5737_v31, %v5717_v48  ;;  %v2496_v52 = vmul.f32 %v5737_v31, %v5719_v3 }
 0x75a   :  { %5111 = vmatprep.mubr.msk.f32.mxu0 %vm1890_vm4, %v6753_v55  ;;  %v2497_v18 = vmul.f32 %v5737_v31, %v5721_v14  ;;  %v2498_v4 = vmul.f32 %v5737_v31, %v5723_v29  ;;  %v2499_v15 = vmul.f32 %v5737_v31, %v5725_v28  ;;  %v2500_v41 = vmul.f32 %v5737_v31, %v5727_v49  ;;  %v2734_v49 = vld [vmem:[%s7774_s0 + $0x430] sm:$0xff] }
 0x75b   :  { %v2505_v34 = vmul.f32 %v2493_v11, %v7012_v9  ;;  %v2506_v46 = vmul.f32 %v7009_v19, %v2494_v43  ;;  %v2507_v17 = vmul.f32 %v2495_v38, %v7020_v2  ;;  %v2508_v54 = vmul.f32 %v7016_v16, %v2496_v52  ;;  %v7917_v11 = vld [vmem:[#allocation32_spill] sm:$0xff] }
 0x75c   :  { %v2509_v6 = vmul.f32 %v2497_v18, %v7028_v0  ;;  %v2510_v55 = vmul.f32 %v7024_v40, %v2498_v4  ;;  %v2511_v32 = vmul.f32 %v2499_v15, %v7036_v27  ;;  %v2512_v44 = vmul.f32 %v7032_v1, %v2500_v41 }
 0x75d   :  { %5112 = vmatmul.mubr.msk.f32.gmra.mrb[52].mxu0 %vm1890_vm4, %v6760_v59  ;;  %v5425_v48 = vpack.c.bf16 %v2506_v46, %v2505_v34  ;;  %v5429_v9 = vpack.c.bf16 %v2508_v54, %v2507_v17  ;;  %v2501_v19 = vmul.f32 %v5737_v31, %v5729_v42  ;;  %v2502_v2 = vmul.f32 %v5737_v31, %v5731_v20  ;;  %v2735_v42 = vld [vmem:[%s7774_s0 + $0x440] sm:$0xff]  ;;  %v2738_v46 = vld [vmem:[%s7774_s0 + $0x470] ss:$0 sm:$0xff] }
 0x75e   :  { %5114 = vmatprep.mubr.msk.f32.mxu0 %vm1890_vm4, %v6765_v30  ;;  %v5433_v3 = vpack.c.bf16 %v2510_v55, %v2509_v6  ;;  %v5437_v16 = vpack.c.bf16 %v2512_v44, %v2511_v32  ;;  %v2503_v14 = vmul.f32 %v5737_v31, %v5733_v63  ;;  %v2504_v29 = vmul.f32 %v5737_v31, %v5735_v62  ;;  %v7916_v31 = vld [vmem:[#allocation37_spill] sm:$0xff] }
 0x75f   :  { %5426 = vmatprep.subr.bf16.mxu1 %v5425_v48  ;;  %v2513_v59 = vmul.f32 %v2501_v19, %v7044_v25  ;;  %v2514_v40 = vmul.f32 %v7040_v33, %v2502_v2  ;;  %v1766_v33 = vadd.s32 32, %v6113_v12  ;;  %v1767_v28 = vadd.s32 40, %v6113_v12 }
 0x760   :  { %5428 = vmatpush3.bf16.msra.mxu1 %v5425_v48  ;;  %v2515_v27 = vmul.f32 %v2503_v14, %v7052_v8  ;;  %v2516_v30 = vmul.f32 %v7048_v23, %v2504_v29  ;;  %v1768_v20 = vadd.s32 48, %v6113_v12  ;;  %v5465_v7 = vpack.c.bf16 %v2735_v42, %v2734_v49 }
 0x761   :  { %5115 = vmatmul.mubr.msk.f32.gmra.mrb[54].mxu0 %vm1890_vm4, %v6772_v45  ;;  %5430 = vmatprep.subr.bf16.mxu1 %v5429_v9  ;;  %v5441_v0 = vpack.c.bf16 %v2514_v40, %v2513_v59  ;;  %v1763_v45 = vadd.s32 8, %v6113_v12  ;;  %vm1779_vm6 = vcmp.eq.s32.totalorder %v1766_v33, %v7070_v39  ;;  %vm1780_vm7 = vcmp.eq.s32.totalorder %v1767_v28, %v7070_v39 }
 0x762   :  { %5117 = vmatprep.mubr.msk.f32.mxu0 %vm1890_vm4, %v6777_v57  ;;  %v5445_v1 = vpack.c.bf16 %v2516_v30, %v2515_v27  ;;  %v2730_v57 = vld [vmem:[%s7774_s0 + $0x3f0] sm:$0xff]  ;;  %v7157_v62 = vsel %vm1779_vm6, 1.0, %v7909_v60  ;;  %vm1781_vm8 = vcmp.eq.s32.totalorder %v1768_v20, %v7070_v39  ;;  %v7173_v37 = vsel %vm1780_vm7, 1.0, %v7909_v60 }
 0x764   :  { %5432 = vmatpush3.bf16.msra.mxu1 %v5429_v9 }
 0x765   :  { %5118 = vmatmul.mubr.msk.f32.gmra.mrb[56].mxu0 %vm1890_vm4, %v6784_v53  ;;  %5434 = vmatprep.subr.bf16.mxu1 %v5433_v3  ;;  %v2731_v53 = vld [vmem:[%s7774_s0 + $0x400] sm:$0xff] }
 0x766   :  { %5120 = vmatprep.mubr.msk.f32.mxu0 %vm1890_vm4, %v6789_v24  ;;  %v1764_v24 = vadd.s32 16, %v6113_v12 }
 0x768   :  { %5436 = vmatpush3.bf16.msra.mxu1 %v5433_v3  ;;  %vm1777_vm1 = vcmp.eq.s32.totalorder %v1764_v24, %v7070_v39 }
 0x769   :  { %5121 = vmatmul.mubr.msk.f32.gmra.mrb[58].mxu0 %vm1890_vm4, %v6796_v58  ;;  %5438 = vmatprep.subr.bf16.mxu1 %v5437_v16  ;;  %v5457_v58 = vpack.c.bf16 %v2731_v53, %v2730_v57  ;;  %v7137_v23 = vsel %vm1777_vm1, 1.0, %v7909_v60 }
 0x76a   :  { %5123 = vmatprep.mubr.msk.f32.mxu0 %vm1890_vm4, %v6801_v21  ;;  %v1765_v21 = vadd.s32 24, %v6113_v12  ;;  %v7176_v12 = vsel %vm1781_vm8, 1.0, %v7909_v60 }
 0x76c   :  { %5440 = vmatpush3.bf16.msra.mxu1 %v5437_v16  ;;  %vm1778_vm5 = vcmp.eq.s32.totalorder %v1765_v21, %v7070_v39 }
 0x76d   :  { %5124 = vmatmul.mubr.msk.f32.gmra.mrb[60].mxu0 %vm1890_vm4, %v6810_v36  ;;  %5442 = vmatprep.subr.bf16.mxu1 %v5441_v0  ;;  %vm1776_vm4 = vcmp.eq.s32.totalorder %v1763_v45, %v7070_v39  ;;  %v2732_v36 = vld [vmem:[%s7774_s0 + $0x410] sm:$0xff]  ;;  %v7154_v63 = vsel %vm1778_vm5, 1.0, %v7909_v60  ;;  %v7911_v39 = vld [vmem:[#allocation34_spill] sm:$0xff] }
 0x76e   :  { %5176 = vmatprep.mubr.msk.f32.mxu0 %vm235_vm2, %v6912_v61  ;;  %v2733_v61 = vld [vmem:[%s7774_s0 + $0x420] sm:$0xff]  ;;  %v7134_v25 = vsel %vm1776_vm4, 1.0, %v7909_v60  ;;  %v7914_v60 = vld [vmem:[#allocation35_spill] sm:$0xff] }
 0x76f   :  { %v5461_v8 = vpack.c.bf16 %v2733_v61, %v2732_v36 }
 0x770   :  { %5444 = vmatpush3.bf16.msra.mxu1 %v5441_v0 }
 0x771   :  { %5446 = vmatprep.subr.bf16.mxu1 %v5445_v1 }
 0x774   :  { %5448 = vmatpush3.bf16.msra.mxu1 %v5445_v1 }
 0x775   :  { %5458 = vmatprep.subr.bf16.mxu1 %v5457_v58 }
 0x777   :  { %5043 = vmatmul.mubr.msk.f32.vlgmr.msra.gmra.mrb[28].mxu1 %vm2517_vm15, %v7134_v25 }
 0x778   :  { %5460 = vmatpush3.bf16.msra.mxu1 %v5457_v58  ;;  %5045 = vmatprep.mubr.msk.f32.mxu1 %vm2517_vm15, %v7137_v23 }
 0x779   :  { %5462 = vmatprep.subr.bf16.mxu1 %v5461_v8 }
 0x77b   :  { %5046 = vmatmul.mubr.msk.f32.gmra.mrb[30].mxu1 %vm2517_vm15, %v7154_v63 }
 0x77c   :  { %5464 = vmatpush3.bf16.msra.mxu1 %v5461_v8  ;;  %5048 = vmatprep.mubr.msk.f32.mxu1 %vm2517_vm15, %v7157_v62 }
 0x77d   :  { %5466 = vmatprep.subr.bf16.mxu1 %v5465_v7 }
 0x77f   :  { %5049 = vmatmul.mubr.msk.f32.gmra.mrb[32].mxu1 %vm2517_vm15, %v7173_v37 }
 0x780   :  { %5468 = vmatpush3.bf16.msra.mxu1 %v5465_v7  ;;  %5051 = vmatprep.mubr.msk.f32.mxu1 %vm2517_vm15, %v7176_v12 }
 0x781   :  { %5470 = vmatprep.subr.bf16.mxu1 %v5469_v10 }
 0x783   :  { %5052 = vmatmul.mubr.msk.f32.gmra.mrb[34].mxu1 %vm2517_vm15, %v7184_v13 }
 0x784   :  { %5472 = vmatpush3.bf16.msra.mxu1 %v5469_v10  ;;  %5081 = vmatprep.mubr.msk.f32.mxu1 %vm235_vm2, %v6821_v56 }
 0x787   :  { %5082 = vmatmul.mubr.msk.f32.vlgmr.msra.gmra.mrb[36].mxu1 %vm235_vm2, %v6819_v35 }
 0x788   :  { %5084 = vmatprep.mubr.msk.f32.mxu1 %vm235_vm2, %v7911_v39 }
 0x78b   :  { %5085 = vmatmul.mubr.msk.f32.gmra.mrb[38].mxu1 %vm235_vm2, %v7912_v51 }
 0x78c   :  { %5087 = vmatprep.mubr.msk.f32.mxu1 %vm235_vm2, %v7913_v5 }
 0x78f   :  { %5088 = vmatmul.mubr.msk.f32.gmra.mrb[40].mxu1 %vm235_vm2, %v7914_v60 }
 0x790   :  { %5090 = vmatprep.mubr.msk.f32.mxu1 %vm235_vm2, %v7915_v26 }
 0x793   :  { %5091 = vmatmul.mubr.msk.f32.gmra.mrb[42].mxu1 %vm235_vm2, %v7916_v31 }
 0x794   :  { %5142 = vmatprep.mubr.msk.f32.mxu1 %vm235_vm2, %v7917_v11 }
 0x84a   :  { %v7206_v43 = vpop.f32.mrb[28].mxu1 }
 0x84b   :  { %v7208_v38 = vpop.f32.mrb[29].mxu1  ;;  %v2648_v22 = vmax.f32 %v7206_v43, 0.0 }
 0x84c   :  { %v2647_v11 = vmax.f32 %v7208_v38, 0.0 }
 0x84e   :  { %v7210_v52 = vpop.f32.mrb[30].mxu1 }
 0x84f   :  { %v7212_v18 = vpop.f32.mrb[31].mxu1 }
 0x850   :  { %v2649_v43 = vmax.f32 %v7212_v18, 0.0 }
 0x852   :  { %v7214_v4 = vpop.f32.mrb[32].mxu1 }
 0x853   :  { %v7216_v15 = vpop.f32.mrb[33].mxu1 }
 0x856   :  { %v7218_v41 = vpop.f32.mrb[34].mxu1 }
 0x857   :  { %v7220_v34 = vpop.f32.mrb[35].mxu1 }
 0x85a   :  { %v5083_v17 = vpop.f32.mrb[36].mxu1 }
 0x85b   :  { %v2835_v54 = vadd.f32 %v5083_v17, %v2738_v46  ;;  %v2829_v6 = vpop.f32.mrb[37].mxu1 }
 0x85c   :  { %v2830_v55 = vadd.f32 %v2829_v6, %v2738_v46 }
 0x85d   :  { %v4382_v32 = vmul.f32 -1.442695, %v2835_v54 }
 0x85e   :  { %v4381_v44 = vmul.f32 -1.442695, %v2830_v55  ;;  %v5086_v48 = vpop.f32.mrb[38].mxu1 }
 0x85f   :  { %5738 = vpow2.f32 %v4382_v32  ;;  %v2845_v9 = vadd.f32 %v5086_v48, %v2738_v46  ;;  %v2839_v19 = vpop.f32.mrb[39].mxu1  ;;  %v2650_v48 = vmax.f32 %v7210_v52, 0.0  ;;  %v2652_v52 = vmax.f32 %v7214_v4, 0.0 }
 0x860   :  { %5740 = vpow2.f32 %v4381_v44  ;;  %v2840_v2 = vadd.f32 %v2839_v19, %v2738_v46 }
 0x861   :  { %v4384_v3 = vmul.f32 -1.442695, %v2845_v9 }
 0x862   :  { %v4383_v16 = vmul.f32 -1.442695, %v2840_v2  ;;  %v5089_v14 = vpop.f32.mrb[40].mxu1 }
 0x863   :  { %5742 = vpow2.f32 %v4384_v3  ;;  %v2855_v29 = vadd.f32 %v5089_v14, %v2738_v46  ;;  %v2849_v59 = vpop.f32.mrb[41].mxu1 }
 0x864   :  { %5744 = vpow2.f32 %v4383_v16  ;;  %v2850_v40 = vadd.f32 %v2849_v59, %v2738_v46 }
 0x865   :  { %v4386_v27 = vmul.f32 -1.442695, %v2855_v29 }
 0x866   :  { %v4385_v30 = vmul.f32 -1.442695, %v2850_v40  ;;  %v5092_v0 = vpop.f32.mrb[42].mxu1 }
 0x867   :  { %5746 = vpow2.f32 %v4386_v27  ;;  %v2865_v1 = vadd.f32 %v5092_v0, %v2738_v46  ;;  %v2859_v45 = vpop.f32.mrb[43].mxu1 }
 0x868   :  { %5748 = vpow2.f32 %v4385_v30  ;;  %v2860_v57 = vadd.f32 %v2859_v45, %v2738_v46 }
 0x869   :  { %v5739_v53 = vpop.eup %5738  ;;  %v4388_v24 = vmul.f32 -1.442695, %v2865_v1  ;;  %v2651_v1 = vmax.f32 %v7216_v15, 0.0 }
 0x86a   :  { %v5741_v58 = vpop.eup %5740  ;;  %v2893_v21 = vadd.f32 1.0, %v5739_v53  ;;  %v4387_v36 = vmul.f32 -1.442695, %v2860_v57 }
 0x86b   :  { %v2892_v61 = vadd.f32 1.0, %v5741_v58  ;;  %5750 = vpow2.f32 %v4388_v24 }
 0x86c   :  { %5752 = vrcp.f32 %v2893_v21 }
 0x86d   :  { %v5743_v33 = vpop.eup %5742  ;;  %5754 = vrcp.f32 %v2892_v61  ;;  %v2654_v61 = vmax.f32 %v7218_v41, 0.0 }
 0x86e   :  { %v5745_v8 = vpop.eup %5744  ;;  %v2895_v28 = vadd.f32 1.0, %v5743_v33  ;;  %5756 = vpow2.f32 %v4387_v36 }
 0x86f   :  { %v2894_v49 = vadd.f32 1.0, %v5745_v8 }
 0x870   :  { %5758 = vrcp.f32 %v2895_v28 }
 0x871   :  { %v5747_v42 = vpop.eup %5746  ;;  %5760 = vrcp.f32 %v2894_v49 }
 0x872   :  { %v5749_v20 = vpop.eup %5748  ;;  %v2897_v7 = vadd.f32 1.0, %v5747_v42 }
 0x873   :  { %v2896_v47 = vadd.f32 1.0, %v5749_v20 }
 0x874   :  { %5762 = vrcp.f32 %v2897_v7  ;;  %v2653_v7 = vmax.f32 %v7220_v34, 0.0 }
 0x875   :  { %v5751_v50 = vpop.eup %5750  ;;  %5764 = vrcp.f32 %v2896_v47 }
 0x876   :  { %v5753_v10 = vpop.eup %5752  ;;  %v2899_v46 = vadd.f32 1.0, %v5751_v50 }
 0x877   :  { %v5755_v17 = vpop.eup %5754  ;;  %v2917_v54 = vmul.f32 %v5753_v10, %v2648_v22  ;;  %v2925_v6 = vsub.f32 1.0, %v5753_v10 }
 0x878   :  { %v5757_v55 = vpop.eup %5756  ;;  %v2916_v32 = vmul.f32 %v5755_v17, %v2647_v11  ;;  %v2924_v44 = vsub.f32 1.0, %v5755_v17  ;;  %5766 = vrcp.f32 %v2899_v46  ;;  %v2952_v17 = vld [vmem:[%s7774_s0 + $0x3b0] sm:$0xff] }
 0x879   :  { %v2898_v9 = vadd.f32 1.0, %v5757_v55  ;;  %v2933_v19 = vmul.f32 %v6819_v35, %v2925_v6 }
 0x87a   :  { %v5759_v2 = vpop.eup %5758  ;;  %v2932_v3 = vmul.f32 %v2924_v44, %v6821_v56  ;;  %v2954_v44 = vld [vmem:[%s7774_s0 + $0x3d0] sm:$0xff] }
 0x87b   :  { %v5761_v16 = vpop.eup %5760  ;;  %v2919_v38 = vmul.f32 %v5759_v2, %v2650_v48  ;;  %v2927_v14 = vsub.f32 1.0, %v5759_v2  ;;  %5768 = vrcp.f32 %v2898_v9  ;;  %v7231_v29 = vadd.f32 %v2933_v19, %v2917_v54  ;;  %v2953_v54 = vld [vmem:[%s7774_s0 + $0x3c0] sm:$0xff]  ;;  %v7918_v19 = vld [vmem:[#allocation39_spill] sm:$0xff] }
 0x87c   :  { %v2918_v59 = vmul.f32 %v5761_v16, %v2649_v43  ;;  %v2926_v40 = vsub.f32 1.0, %v5761_v16  ;;  %v7233_v27 = vadd.f32 %v2932_v3, %v2916_v32  ;;  %v5541_v32 = vpack.c.bf16 %v2953_v54, %v2952_v17  ;;  %v2955_v48 = vld [vmem:[%s7774_s0 + $0x3e0] sm:$0xff]  ;;  %v7920_v43 = vld [vmem:[#allocation40_spill] sm:$0xff]  ;;  %v7921_v3 = vld [vmem:[#allocation51_spill] sm:$0xff] }
 0x87d   :  { %v2935_v30 = vmul.f32 %v7912_v51, %v2927_v14  ;;  %v5545_v9 = vpack.c.bf16 %v2955_v48, %v2954_v44  ;;  %v7919_v2 = vld [vmem:[#allocation50_spill] sm:$0xff]  ;;  %v7922_v16 = vld [vmem:[#allocation41_spill] sm:$0xff] }
 0x87e   :  { %v5763_v0 = vpop.eup %5762  ;;  %v5485_v18 = vpack.c.bf16 %v7231_v29, %v7233_v27  ;;  %v2934_v45 = vmul.f32 %v2926_v40, %v7911_v39  ;;  %v7924_v14 = vld [vmem:[#allocation42_spill] sm:$0xff]  ;;  %v7926_v40 = vld [vmem:[#allocation43_spill] sm:$0xff] }
 0x87f   :  { %v5765_v57 = vpop.eup %5764  ;;  %v2921_v53 = vmul.f32 %v5763_v0, %v2652_v52  ;;  %v2929_v24 = vsub.f32 1.0, %v5763_v0  ;;  %v7241_v58 = vadd.f32 %v2935_v30, %v2919_v38  ;;  %v7923_v38 = vld [vmem:[#allocation52_spill] sm:$0xff]  ;;  %v7927_v52 = vld [vmem:[#allocation54_spill] sm:$0xff]  ;;  %v7929_v0 = vld [vmem:[#allocation55_spill] sm:$0xff] }
 0x880   :  { %v2920_v21 = vmul.f32 %v5765_v57, %v2651_v1  ;;  %v2928_v36 = vsub.f32 1.0, %v5765_v57  ;;  %5486 = vmatprep.subr.bf16.mxu1 %v5485_v18  ;;  %5502 = vmatprep.subr.bf16.mxu0 %v5485_v18  ;;  %v7243_v4 = vadd.f32 %v2934_v45, %v2918_v59  ;;  %v7925_v59 = vld [vmem:[#allocation53_spill] sm:$0xff]  ;;  %v7928_v30 = vld [vmem:[#allocation44_spill] sm:$0xff]  ;;  %v7932_v45 = vld [vmem:[#allocation46_spill] sm:$0xff] }
 0x881   :  { %5488 = vmatpush3.bf16.msra.mxu1 %v5485_v18  ;;  %5504 = vmatpush3.bf16.msra.mxu0 %v5485_v18  ;;  %v2937_v15 = vmul.f32 %v7914_v60, %v2929_v24  ;;  %v7930_v1 = vld [vmem:[#allocation45_spill] sm:$0xff]  ;;  %v7931_v18 = vld [vmem:[#allocation56_spill] sm:$0xff]  ;;  %v7935_v24 = vld [vmem:[#allocation58_spill] sm:$0xff] }
 0x882   :  { %v5767_v33 = vpop.eup %5766  ;;  %v5489_v8 = vpack.c.bf16 %v7241_v58, %v7243_v4  ;;  %v2936_v28 = vmul.f32 %v2928_v36, %v7913_v5  ;;  %v7933_v57 = vld [vmem:[#allocation57_spill] sm:$0xff]  ;;  %v7937_v36 = vld [vmem:[#allocation59_spill] sm:$0xff] }
 0x883   :  { %v2923_v49 = vmul.f32 %v5767_v33, %v2654_v61  ;;  %v2931_v42 = vsub.f32 1.0, %v5767_v33  ;;  %v7250_v20 = vadd.f32 %v2937_v15, %v2921_v53  ;;  %v7934_v53 = vld [vmem:[#allocation47_spill] sm:$0xff]  ;;  %v7938_v61 = vld [vmem:[#allocation49_spill] sm:$0xff]  ;;  %v7939_v15 = vld [vmem:[#allocation60_spill] sm:$0xff] }
 0x884   :  { %5490 = vmatprep.subr.bf16.mxu1 %v5489_v8  ;;  %5506 = vmatprep.subr.bf16.mxu0 %v5489_v8  ;;  %v7253_v47 = vadd.f32 %v2936_v28, %v2920_v21  ;;  %v7936_v21 = vld [vmem:[#allocation48_spill] sm:$0xff]  ;;  %v7940_v33 = vld [vmem:[#allocation62_spill] sm:$0xff]  ;;  %v7942_v28 = vld [vmem:[#allocation61_spill] sm:$0xff] }
 0x885   :  { %v5769_v41 = vpop.eup %5768  ;;  %5492 = vmatpush3.bf16.msra.mxu1 %v5489_v8  ;;  %5508 = vmatpush3.bf16.msra.mxu0 %v5489_v8  ;;  %v2939_v50 = vmul.f32 %v7916_v31, %v2931_v42  ;;  %v7941_v8 = vld [vmem:[#allocation63_spill] sm:$0xff] }
 0x886   :  { %v2922_v22 = vmul.f32 %v5769_v41, %v2653_v7  ;;  %v2930_v10 = vsub.f32 1.0, %v5769_v41  ;;  %v5493_v11 = vpack.c.bf16 %v7250_v20, %v7253_v47 }
 0x887   :  { %v7258_v46 = vadd.f32 %v2939_v50, %v2923_v49 }
 0x888   :  { %5494 = vmatprep.subr.bf16.mxu1 %v5493_v11  ;;  %5510 = vmatprep.subr.bf16.mxu0 %v5493_v11  ;;  %v2938_v34 = vmul.f32 %v2930_v10, %v7915_v26 }
 0x889   :  { %5496 = vmatpush3.bf16.msra.mxu1 %v5493_v11  ;;  %5512 = vmatpush3.bf16.msra.mxu0 %v5493_v11 }
 0x88a   :  { %v7267_v6 = vadd.f32 %v2938_v34, %v2922_v22 }
 0x88c   :  { %v5497_v55 = vpack.c.bf16 %v7258_v46, %v7267_v6 }
 0x88e   :  { %5498 = vmatprep.subr.bf16.mxu1 %v5497_v55  ;;  %5514 = vmatprep.subr.bf16.mxu0 %v5497_v55 }
 0x88f   :  { %5500 = vmatpush3.bf16.msra.mxu1 %v5497_v55  ;;  %5516 = vmatpush3.bf16.msra.mxu0 %v5497_v55 }
 0x890   :  { %5542 = vmatprep.subr.bf16.mxu0 %v5541_v32 }
 0x892   :  { %5143 = vmatmul.mubr.msk.f32.vlgmr.msra.gmra.mrb[44].mxu1 %vm235_vm2, %v7918_v19  ;;  %5177 = vmatmul.mubr.msk.f32.vlgmr.msra.gmra.mrb[50].mxu0 %vm235_vm2, %v7919_v2 }
 0x893   :  { %5145 = vmatprep.mubr.msk.f32.mxu1 %vm235_vm2, %v7920_v43  ;;  %5179 = vmatprep.mubr.msk.f32.mxu0 %vm235_vm2, %v7921_v3 }
 0x894   :  { %5544 = vmatpush3.bf16.msra.mxu0 %v5541_v32 }
 0x895   :  { %5546 = vmatprep.subr.bf16.mxu0 %v5545_v9 }
 0x896   :  { %5146 = vmatmul.mubr.msk.f32.gmra.mrb[46].mxu1 %vm235_vm2, %v7922_v16  ;;  %5180 = vmatmul.mubr.msk.f32.gmra.mrb[52].mxu0 %vm235_vm2, %v7923_v38 }
 0x897   :  { %5148 = vmatprep.mubr.msk.f32.mxu1 %vm235_vm2, %v7924_v14  ;;  %5182 = vmatprep.mubr.msk.f32.mxu0 %vm235_vm2, %v7925_v59 }
 0x898   :  { %5548 = vmatpush3.bf16.msra.mxu0 %v5545_v9 }
 0x89a   :  { %5149 = vmatmul.mubr.msk.f32.gmra.mrb[48].mxu1 %vm235_vm2, %v7926_v40  ;;  %5183 = vmatmul.mubr.msk.f32.gmra.mrb[54].mxu0 %vm235_vm2, %v7927_v52 }
 0x89b   :  { %5151 = vmatprep.mubr.msk.f32.mxu1 %vm235_vm2, %v7928_v30  ;;  %5185 = vmatprep.mubr.msk.f32.mxu0 %vm235_vm2, %v7929_v0 }
 0x89e   :  { %5152 = vmatmul.mubr.msk.f32.gmra.mrb[50].mxu1 %vm235_vm2, %v7930_v1  ;;  %5186 = vmatmul.mubr.msk.f32.gmra.mrb[56].mxu0 %vm235_vm2, %v7931_v18 }
 0x89f   :  { %5154 = vmatprep.mubr.msk.f32.mxu1 %vm235_vm2, %v7932_v45  ;;  %5188 = vmatprep.mubr.msk.f32.mxu0 %vm235_vm2, %v7933_v57 }
 0x8a2   :  { %5155 = vmatmul.mubr.msk.f32.gmra.mrb[52].mxu1 %vm235_vm2, %v7934_v53  ;;  %5189 = vmatmul.mubr.msk.f32.gmra.mrb[58].mxu0 %vm235_vm2, %v7935_v24 }
 0x8a3   :  { %5157 = vmatprep.mubr.msk.f32.mxu1 %vm235_vm2, %v7936_v21  ;;  %5191 = vmatprep.mubr.msk.f32.mxu0 %vm235_vm2, %v7937_v36 }
 0x8a6   :  { %5158 = vmatmul.mubr.msk.f32.gmra.mrb[54].mxu1 %vm235_vm2, %v7938_v61  ;;  %5192 = vmatmul.mubr.msk.f32.gmra.mrb[60].mxu0 %vm235_vm2, %v7939_v15 }
 0x8a7   :  { %5238 = vmatprep.mubr.msk.f32.mxu0 %vm377_vm3, %v7940_v33  ;;  %5218 = vmatprep.mubr.msk.f32.mxu1 %vm2517_vm15, %v7941_v8 }
 0x8aa   :  { %5239 = vmatmul.mubr.msk.f32.vlgmr.msra.gmra.mrb[62].mxu0 %vm377_vm3, %v7942_v28 }
 0x965   :  { %v5144_v49 = vpop.f32.mrb[44].mxu1  ;;  %v7327_v42 = vpop.f32.mrb[50].mxu0 }
 0x966   :  { %v3413_v7 = vmul.f32 %v7327_v42, %v5144_v49  ;;  %v3228_v41 = vpop.f32.mrb[45].mxu1  ;;  %v7330_v50 = vpop.f32.mrb[51].mxu0 }
 0x967   :  { %v3412_v22 = vmul.f32 %v7330_v50, %v3228_v41 }
 0x968   :  { %v3427_v10 = vsel %vm235_vm2, %v3413_v7, 0.0 }
 0x969   :  { %v7334_v11 = vpop.f32.mrb[52].mxu0  ;;  %3428 = vadd.xlane.f32.xlu1 %v3427_v10  ;;  %v5147_v34 = vpop.f32.mrb[46].mxu1  ;;  %v3424_v17 = vsel %vm235_vm2, %v3412_v22, 0.0 }
 0x96a   :  { %v3415_v54 = vmul.f32 %v7334_v11, %v5147_v34  ;;  %v7338_v55 = vpop.f32.mrb[53].mxu0  ;;  %3425 = vadd.xlane.f32.xlu0 %v3424_v17  ;;  %v3238_v32 = vpop.f32.mrb[47].mxu1 }
 0x96b   :  { %v3414_v44 = vmul.f32 %v7338_v55, %v3238_v32 }
 0x96c   :  { %v3433_v48 = vsel %vm235_vm2, %v3415_v54, 0.0 }
 0x96d   :  { %v7342_v9 = vpop.f32.mrb[54].mxu0  ;;  %3434 = vadd.xlane.f32.xlu1 %v3433_v48  ;;  %v5150_v19 = vpop.f32.mrb[48].mxu1  ;;  %v3430_v2 = vsel %vm235_vm2, %v3414_v44, 0.0  ;;  %v7943_v44 = vld [vmem:[#allocation18_spill] sm:$0xff]  ;;  %v7944_v48 = vld [vmem:[#allocation19_spill] sm:$0xff] }
 0x96e   :  { %v3417_v43 = vmul.f32 %v7342_v9, %v5150_v19  ;;  %v7346_v3 = vpop.f32.mrb[55].mxu0  ;;  %3431 = vadd.xlane.f32.xlu0 %v3430_v2  ;;  %v3248_v16 = vpop.f32.mrb[49].mxu1  ;;  %v7945_v19 = vld [vmem:[#allocation10_spill] sm:$0xff]  ;;  %v7946_v2 = vld [vmem:[#allocation21_spill] sm:$0xff] }
 0x96f   :  { %v3416_v38 = vmul.f32 %v7346_v3, %v3248_v16  ;;  %v7948_v16 = vld [vmem:[#allocation23_spill] sm:$0xff] }
 0x970   :  { %v3439_v14 = vsel %vm235_vm2, %v3417_v43, 0.0  ;;  %v7947_v43 = vld [vmem:[#allocation20_spill] sm:$0xff] }
 0x971   :  { %v7350_v59 = vpop.f32.mrb[56].mxu0  ;;  %3440 = vadd.xlane.f32.xlu1 %v3439_v14  ;;  %v5153_v40 = vpop.f32.mrb[50].mxu1  ;;  %v3436_v52 = vsel %vm235_vm2, %v3416_v38, 0.0  ;;  %v7949_v38 = vld [vmem:[#allocation22_spill] sm:$0xff]  ;;  %v7950_v14 = vld [vmem:[#allocation8_spill] sm:$0xff] }
 0x972   :  { %v3419_v30 = vmul.f32 %v7350_v59, %v5153_v40  ;;  %v7354_v0 = vpop.f32.mrb[57].mxu0  ;;  %3437 = vadd.xlane.f32.xlu0 %v3436_v52  ;;  %v3258_v1 = vpop.f32.mrb[51].mxu1  ;;  %v7951_v40 = vld [vmem:[#allocation17_spill] sm:$0xff]  ;;  %v7952_v52 = vld [vmem:[#allocation11_spill] sm:$0xff] }
 0x973   :  { %v3418_v18 = vmul.f32 %v7354_v0, %v3258_v1  ;;  %v7954_v1 = vld [vmem:[#allocation13_spill] sm:$0xff] }
 0x974   :  { %v3445_v45 = vsel %vm235_vm2, %v3419_v30, 0.0  ;;  %v7953_v30 = vld [vmem:[#allocation9_spill] sm:$0xff] }
 0x975   :  { %v7358_v57 = vpop.f32.mrb[58].mxu0  ;;  %3446 = vadd.xlane.f32.xlu1 %v3445_v45  ;;  %v5156_v53 = vpop.f32.mrb[52].mxu1  ;;  %v3442_v24 = vsel %vm235_vm2, %v3418_v18, 0.0  ;;  %v7955_v18 = vld [vmem:[#allocation12_spill] sm:$0xff]  ;;  %v7956_v45 = vld [vmem:[#allocation15_spill] sm:$0xff] }
 0x976   :  { %v3421_v21 = vmul.f32 %v7358_v57, %v5156_v53  ;;  %v7362_v36 = vpop.f32.mrb[59].mxu0  ;;  %3443 = vadd.xlane.f32.xlu0 %v3442_v24  ;;  %v3268_v61 = vpop.f32.mrb[53].mxu1  ;;  %v7957_v53 = vld [vmem:[#allocation14_spill] sm:$0xff]  ;;  %v7958_v24 = vld [vmem:[#allocation16_spill] sm:$0xff] }
 0x977   :  { %v3420_v15 = vmul.f32 %v7362_v36, %v3268_v61 }
 0x978   :  { %v3451_v33 = vsel %vm235_vm2, %v3421_v21, 0.0 }
 0x979   :  { %v7366_v8 = vpop.f32.mrb[60].mxu0  ;;  %3452 = vadd.xlane.f32.xlu1 %v3451_v33  ;;  %v5159_v28 = vpop.f32.mrb[54].mxu1  ;;  %v3448_v49 = vsel %vm235_vm2, %v3420_v15, 0.0 }
 0x97a   :  { %v3423_v7 = vmul.f32 %v7366_v8, %v5159_v28  ;;  %v7370_v41 = vpop.f32.mrb[61].mxu0  ;;  %3449 = vadd.xlane.f32.xlu0 %v3448_v49  ;;  %v3278_v22 = vpop.f32.mrb[55].mxu1 }
 0x97b   :  { %v3422_v10 = vmul.f32 %v7370_v41, %v3278_v22 }
 0x97c   :  { %v3457_v34 = vsel %vm235_vm2, %v3423_v7, 0.0 }
 0x97d   :  { %v5240_v17 = vpop.f32.mrb[62].mxu0  ;;  %3458 = vadd.xlane.f32.xlu1 %v3457_v34  ;;  %v3454_v54 = vsel %vm235_vm2, %v3422_v10, 0.0 }
 0x97e   :  { %3962 = vst.msk [vmem:[#allocation4 + $0x8] sm:$0xff] %vm377_vm3, %v5240_v17  ;;  %v3734_v32 = vpop.f32.mrb[63].mxu0  ;;  %3455 = vadd.xlane.f32.xlu0 %v3454_v54 }
 0x97f   :  { %3961 = vst.msk [vmem:[#allocation4] sm:$0xff] %vm377_vm3, %v3734_v32 }
 0x98e   :  { %4019 = vrot.lane.b32.xlu1 %v7943_v44, %s5883_s19 }
 0x992   :  { %4023 = vrot.lane.b32.xlu1 %v7944_v48, %s5883_s19 }
 0x994   :  { %4021 = vrot.lane.b32.xlu0 %v7945_v19, %s5883_s19 }
 0x996   :  { %4027 = vrot.lane.b32.xlu1 %v7946_v2, %s5883_s19 }
 0x998   :  { %4025 = vrot.lane.b32.xlu0 %v7947_v43, %s5883_s19 }
 0x99a   :  { %4031 = vrot.lane.b32.xlu1 %v7948_v16, %s5883_s19 }
 0x99c   :  { %4029 = vrot.lane.b32.xlu0 %v7949_v38, %s5883_s19 }
 0x99e   :  { %4051 = vrot.lane.b32.xlu1 %v7950_v14, %s5883_s19 }
 0x9a0   :  { %4033 = vrot.lane.b32.xlu0 %v7951_v40, %s5883_s19 }
 0x9a2   :  { %4055 = vrot.lane.b32.xlu1 %v7952_v52, %s5883_s19 }
 0x9a4   :  { %4053 = vrot.lane.b32.xlu0 %v7953_v30, %s5883_s19 }
 0x9a6   :  { %4059 = vrot.lane.b32.xlu1 %v7954_v1, %s5883_s19 }
 0x9a8   :  { %4057 = vrot.lane.b32.xlu0 %v7955_v18, %s5883_s19 }
 0x9aa   :  { %4063 = vrot.lane.b32.xlu1 %v7956_v45, %s5883_s19 }
 0x9ac   :  { %4061 = vrot.lane.b32.xlu0 %v7957_v53, %s5883_s19 }
 0x9ae   :  { %4075 = vrot.lane.b32.xlu1 %v6821_v56, %s5877_s17 }
 0x9b0   :  { %4065 = vrot.lane.b32.xlu0 %v7958_v24, %s5883_s19 }
 0x9b2   :  { %4079 = vrot.lane.b32.xlu1 %v7911_v39, %s5877_s17 }
 0x9b4   :  { %4077 = vrot.lane.b32.xlu0 %v6819_v35, %s5877_s17 }
 0x9b6   :  { %4083 = vrot.lane.b32.xlu1 %v7913_v5, %s5877_s17 }
 0x9b8   :  { %4081 = vrot.lane.b32.xlu0 %v7912_v51, %s5877_s17 }
 0x9ba   :  { %4087 = vrot.lane.b32.xlu1 %v7915_v26, %s5877_s17 }
 0x9bc   :  { %4085 = vrot.lane.b32.xlu0 %v7914_v60, %s5877_s17 }
 0x9be   :  { %4099 = vrot.lane.b32.xlu1 %v7950_v14, %s5877_s17 }
 0x9c0   :  { %4089 = vrot.lane.b32.xlu0 %v7916_v31, %s5877_s17 }
 0x9c2   :  { %4103 = vrot.lane.b32.xlu1 %v7952_v52, %s5877_s17 }
 0x9c4   :  { %4101 = vrot.lane.b32.xlu0 %v7953_v30, %s5877_s17 }
 0x9c6   :  { %4107 = vrot.lane.b32.xlu1 %v7954_v1, %s5877_s17 }
 0x9c8   :  { %4105 = vrot.lane.b32.xlu0 %v7955_v18, %s5877_s17 }
 0x9cc   :  { %4109 = vrot.lane.b32.xlu0 %v7957_v53, %s5877_s17 }
 0x9f6   :  { %v3429_v35 = vpop.xlane.xlu1 %3428 }
 0x9f7   :  { %v3426_v56 = vpop.xlane.xlu0 %3425 }
 0x9fa   :  { %v3435_v39 = vpop.xlane.xlu1 %3434 }
 0x9fb   :  { %v3432_v51 = vpop.xlane.xlu0 %3431 }
 0x9fe   :  { %v3441_v5 = vpop.xlane.xlu1 %3440 }
 0x9ff   :  { %v3438_v60 = vpop.xlane.xlu0 %3437  ;;  %v3461_v15 = vmax.f32 %v3429_v35, %v3441_v5 }
 0xa00   :  { %v3460_v33 = vmax.f32 %v3426_v56, %v3438_v60 }
 0xa02   :  { %v3447_v26 = vpop.xlane.xlu1 %3446 }
 0xa03   :  { %v3444_v31 = vpop.xlane.xlu0 %3443  ;;  %v3463_v28 = vmax.f32 %v3435_v39, %v3447_v26 }
 0xa04   :  { %v3462_v49 = vmax.f32 %v3432_v51, %v3444_v31 }
 0xa06   :  { %v7421_v21 = vpop.xlane.xlu1 %3452 }
 0xa07   :  { %v7423_v61 = vpop.xlane.xlu0 %3449  ;;  %v3465_v7 = vmax.f32 %v3461_v15, %v7421_v21 }
 0xa08   :  { %v3464_v22 = vmax.f32 %v3460_v33, %v7423_v61 }
 0xa0a   :  { %v7427_v10 = vpop.xlane.xlu1 %3458  ;;  %v3468_v32 = vmax.f32 %v3464_v22, %v3465_v7 }
 0xa0b   :  { %v3467_v34 = vmax.f32 %v3463_v28, %v7427_v10  ;;  %v7430_v17 = vpop.xlane.xlu0 %3455 }
 0xa0c   :  { %v3466_v54 = vmax.f32 %v3462_v49, %v7430_v17 }
 0xa0e   :  { %v3469_v44 = vmax.f32 %v3466_v54, %v3467_v34  ;;  %v4020_v48 = vpop.permute.xlu1 %4019 }
 0xa0f   :  { %v4022_v19 = vpop.permute.xlu0 %4021 }
 0xa10   :  { %v3470_v2 = vmax.f32 %v3468_v32, %v3469_v44 }
 0xa12   :  { %v3471_v43 = vrot.slane %v3470_v2, 4  ;;  %v7433_v16 = vpop.permute.xlu1 %4023 }
 0xa13   :  { %v7435_v38 = vpop.permute.xlu0 %4025 }
 0xa14   :  { %v3472_v14 = vmax.f32 %v3470_v2, %v3471_v43 }
 0xa16   :  { %v3473_v40 = vrot.slane %v3472_v14, 2  ;;  %v7437_v52 = vpop.permute.xlu1 %4027 }
 0xa17   :  { %v7439_v30 = vpop.permute.xlu0 %4029 }
 0xa18   :  { %v3474_v1 = vmax.f32 %v3472_v14, %v3473_v40 }
 0xa1a   :  { %v3475_v18 = vrot.slane %v3474_v1, 1  ;;  %v7441_v53 = vpop.permute.xlu1 %4031 }
 0xa1b   :  { %v7443_v15 = vpop.permute.xlu0 %4033 }
 0xa1c   :  { %v7445_v33 = vmax.f32 %v3474_v1, %v3475_v18 }
 0xa1e   :  { %v3477_v28 = vsub.f32 %v3426_v56, %v7445_v33  ;;  %v3478_v49 = vsub.f32 %v3429_v35, %v7445_v33  ;;  %v3479_v7 = vsub.f32 %v3432_v51, %v7445_v33  ;;  %v4052_v22 = vpop.permute.xlu1 %4051  ;;  %v3480_v54 = vsub.f32 %v3435_v39, %v7445_v33 }
 0xa1f   :  { %v4054_v34 = vpop.permute.xlu0 %4053  ;;  %v3481_v2 = vsub.f32 %v3438_v60, %v7445_v33  ;;  %v3482_v1 = vsub.f32 %v3441_v5, %v7445_v33  ;;  %v3483_v35 = vsub.f32 %v3444_v31, %v7445_v33  ;;  %v3484_v39 = vsub.f32 %v3447_v26, %v7445_v33 }
 0xa20   :  { %v3489_v32 = vmul.f32 1.442695, %v3477_v28  ;;  %v3491_v44 = vmul.f32 1.442695, %v3478_v49  ;;  %v3493_v43 = vmul.f32 1.442695, %v3479_v7  ;;  %v3485_v60 = vsub.f32 %v7423_v61, %v7445_v33 }
 0xa21   :  { %v3495_v56 = vmul.f32 1.442695, %v3480_v54  ;;  %v3497_v51 = vmul.f32 1.442695, %v3481_v2  ;;  %v3499_v28 = vmul.f32 1.442695, %v3482_v1  ;;  %v3486_v31 = vsub.f32 %v7421_v21, %v7445_v33 }
 0xa22   :  { %v4056_v14 = vpop.permute.xlu1 %4055  ;;  %5770 = vpow2.f32 %v3489_v32  ;;  %v3501_v49 = vmul.f32 1.442695, %v3483_v35  ;;  %v3503_v54 = vmul.f32 1.442695, %v3484_v39  ;;  %v7960_v2 = vld [vmem:[#allocation24_spill] sm:$0xff]  ;;  %v3487_v1 = vsub.f32 %v7430_v17, %v7445_v33 }
 0xa23   :  { %v4058_v40 = vpop.permute.xlu0 %4057  ;;  %5772 = vpow2.f32 %v3491_v44  ;;  %v7959_v44 = vld [vmem:[#allocation25_spill] sm:$0xff]  ;;  %v3488_v17 = vsub.f32 %v7427_v10, %v7445_v33 }
 0xa24   :  { %5774 = vpow2.f32 %v3493_v43  ;;  %v4123_v26 = vsel %vm377_vm3, %v7959_v44, %v4020_v48  ;;  %v4124_v43 = vsel %vm377_vm3, %v7960_v2, %v4022_v19  ;;  %v3509_v33 = vmul.f32 1.442695, %v3487_v1  ;;  %v7963_v1 = vld [vmem:[#allocation29_spill] sm:$0xff] }
 0xa25   :  { %5776 = vpow2.f32 %v3495_v56  ;;  %v3505_v56 = vmul.f32 1.442695, %v3485_v60  ;;  %v4131_v35 = vsel %vm235_vm2, %v4123_v26, %v4052_v22  ;;  %v4132_v39 = vsel %vm235_vm2, %v4124_v43, %v4054_v34 }
 0xa26   :  { %v4060_v18 = vpop.permute.xlu1 %4059  ;;  %5778 = vpow2.f32 %v3497_v51  ;;  %v3507_v60 = vmul.f32 1.442695, %v3486_v31  ;;  %v7962_v31 = vld [vmem:[#allocation26_spill] sm:$0xff] }
 0xa27   :  { %v4062_v45 = vpop.permute.xlu0 %4061  ;;  %5780 = vpow2.f32 %v3499_v28 }
 0xa28   :  { %5782 = vpow2.f32 %v3501_v49  ;;  %v7961_v49 = vld [vmem:[#allocation27_spill] sm:$0xff] }
 0xa29   :  { %5784 = vpow2.f32 %v3503_v54  ;;  %v4125_v44 = vsel %vm377_vm3, %v7961_v49, %v7433_v16  ;;  %v4126_v54 = vsel %vm377_vm3, %v7962_v31, %v7435_v38 }
 0xa2a   :  { %v7457_v7 = vpop.permute.xlu1 %4063  ;;  %5786 = vpow2.f32 %v3505_v56  ;;  %v4133_v26 = vsel %vm235_vm2, %v4125_v44, %v4056_v14  ;;  %v4127_v56 = vsel %vm377_vm3, %v7963_v1, %v7437_v52 }
 0xa2b   :  { %v7459_v5 = vpop.permute.xlu0 %4065  ;;  %5788 = vpow2.f32 %v3507_v60 }
 0xa2c   :  { %v7463_v32 = vpop.eup %5770  ;;  %5790 = vpow2.f32 %v3509_v33 }
 0xa2d   :  { %v7469_v61 = vpop.eup %5772 }
 0xa2e   :  { %v7474_v21 = vpop.permute.xlu1 %4075  ;;  %v3513_v51 = vadd.f32 %v7469_v61, %v7463_v32  ;;  %v7483_v28 = vpop.eup %5774 }
 0xa2f   :  { %v4139_v48 = vsel %vm2517_vm15, %v4131_v35, %v7474_v21  ;;  %v7481_v19 = vpop.permute.xlu0 %4077  ;;  %v7499_v10 = vpop.eup %5776  ;;  %v4134_v35 = vsel %vm235_vm2, %v4126_v54, %v4058_v40 }
 0xa30   :  { %4163 = vst [vmem:[%s7779_s5] sm:$0xff] %v4139_v48  ;;  %v4140_v22 = vsel %vm2517_vm15, %v4132_v39, %v7481_v19  ;;  %v3514_v34 = vadd.f32 %v7483_v28, %v3513_v51  ;;  %v7508_v39 = vpop.eup %5778  ;;  %v3511_v48 = vmul.f32 1.442695, %v3488_v17  ;;  %v7964_v17 = vld [vmem:[#allocation28_spill] sm:$0xff] }
 0xa31   :  { %4165 = vst [vmem:[%s7779_s5 + $0x10] sm:$0xff] %v4140_v22  ;;  %v7521_v40 = vpop.eup %5780  ;;  %v4128_v60 = vsel %vm377_vm3, %v7964_v17, %v7439_v30  ;;  %v4135_v22 = vsel %vm235_vm2, %v4127_v56, %v4060_v18  ;;  %v7965_v18 = vld [vmem:[#allocation31_spill] sm:$0xff] }
 0xa32   :  { %v4080_v2 = vpop.permute.xlu1 %4079  ;;  %v3515_v43 = vadd.f32 %v7499_v10, %v3514_v34  ;;  %v4136_v44 = vsel %vm235_vm2, %v4128_v60, %v4062_v45  ;;  %v7530_v54 = vpop.eup %5782  ;;  %5792 = vpow2.f32 %v3511_v48 }
 0xa33   :  { %v4141_v16 = vsel %vm2517_vm15, %v4133_v26, %v4080_v2  ;;  %v4082_v51 = vpop.permute.xlu0 %4081  ;;  %v4129_v26 = vsel %vm377_vm3, %v7965_v18, %v7441_v53  ;;  %v5785_v45 = vpop.eup %5784 }
 0xa34   :  { %4167 = vst [vmem:[%s7779_s5 + $0x20] sm:$0xff] %v4141_v16  ;;  %v4142_v38 = vsel %vm2517_vm15, %v4134_v35, %v4082_v51  ;;  %v3516_v14 = vadd.f32 %v7508_v39, %v3515_v43  ;;  %v7966_v43 = vld [vmem:[#allocation30_spill] sm:$0xff]  ;;  %v4137_v16 = vsel %vm235_vm2, %v4129_v26, %v7457_v7  ;;  %v5787_v56 = vpop.eup %5786 }
 0xa35   :  { %4169 = vst [vmem:[%s7779_s5 + $0x30] sm:$0xff] %v4142_v38  ;;  %v4130_v35 = vsel %vm377_vm3, %v7966_v43, %v7443_v15  ;;  %v5789_v17 = vpop.eup %5788 }
 0xa36   :  { %v4084_v34 = vpop.permute.xlu1 %4083  ;;  %v3517_v49 = vadd.f32 %v7521_v40, %v3516_v14  ;;  %v4138_v14 = vsel %vm235_vm2, %v4130_v35, %v7459_v5 }
 0xa37   :  { %v4143_v52 = vsel %vm2517_vm15, %v4135_v22, %v4084_v34  ;;  %v4086_v31 = vpop.permute.xlu0 %4085 }
 0xa38   :  { %4171 = vst [vmem:[%s7779_s5 + $0x40] sm:$0xff] %v4143_v52  ;;  %v4144_v33 = vsel %vm2517_vm15, %v4136_v44, %v4086_v31  ;;  %v3518_v30 = vadd.f32 %v7530_v54, %v3517_v49  ;;  %v5791_v44 = vpop.eup %5790 }
 0xa39   :  { %4173 = vst [vmem:[%s7779_s5 + $0x50] sm:$0xff] %v4144_v33 }
 0xa3a   :  { %v7548_v48 = vpop.permute.xlu1 %4087  ;;  %v3519_v38 = vadd.f32 %v5785_v45, %v3518_v30 }
 0xa3b   :  { %v4145_v53 = vsel %vm2517_vm15, %v4137_v16, %v7548_v48  ;;  %v7554_v1 = vpop.permute.xlu0 %4089 }
 0xa3c   :  { %4175 = vst [vmem:[%s7779_s5 + $0x60] sm:$0xff] %v4145_v53  ;;  %v4146_v15 = vsel %vm2517_vm15, %v4138_v14, %v7554_v1  ;;  %v3520_v7 = vadd.f32 %v5787_v56, %v3519_v38  ;;  %v5793_v26 = vpop.eup %5792 }
 0xa3d   :  { %4177 = vst [vmem:[%s7779_s5 + $0x70] sm:$0xff] %v4146_v15 }
 0xa3e   :  { %v4100_v5 = vpop.permute.xlu1 %4099  ;;  %v3521_v60 = vadd.f32 %v5789_v17, %v3520_v7 }
 0xa3f   :  { %v4147_v22 = vsel %vm377_vm3, %v7474_v21, %v4100_v5  ;;  %v4102_v49 = vpop.permute.xlu0 %4101 }
 0xa40   :  { %v4155_v52 = vsel %vm2517_vm15, %v4147_v22, 0.0  ;;  %v4148_v33 = vsel %vm377_vm3, %v7481_v19, %v4102_v49  ;;  %v3522_v30 = vadd.f32 %v5791_v44, %v3521_v60 }
 0xa41   :  { %4164 = vst [vmem:[%s7779_s5 + $0x8] sm:$0xff] %v4155_v52  ;;  %v4156_v18 = vsel %vm2517_vm15, %v4148_v33, 0.0 }
 0xa42   :  { %4166 = vst [vmem:[%s7779_s5 + $0x18] sm:$0xff] %v4156_v18  ;;  %v4104_v21 = vpop.permute.xlu1 %4103  ;;  %v3523_v43 = vadd.f32 %v5793_v26, %v3522_v30 }
 0xa43   :  { %v4149_v35 = vsel %vm377_vm3, %v4080_v2, %v4104_v21  ;;  %v4106_v16 = vpop.permute.xlu0 %4105 }
 0xa44   :  { %v4157_v38 = vsel %vm2517_vm15, %v4149_v35, 0.0  ;;  %v4150_v19 = vsel %vm377_vm3, %v4082_v51, %v4106_v16  ;;  %v3524_v14 = vrot.slane %v3523_v43, 4 }
 0xa45   :  { %4168 = vst [vmem:[%s7779_s5 + $0x28] sm:$0xff] %v4157_v38  ;;  %v4158_v53 = vsel %vm2517_vm15, %v4150_v19, 0.0 }
 0xa46   :  { %4170 = vst [vmem:[%s7779_s5 + $0x38] sm:$0xff] %v4158_v53  ;;  %v4108_v15 = vpop.permute.xlu1 %4107  ;;  %v3525_v7 = vadd.f32 %v3524_v14, %v3523_v43 }
 0xa47   :  { %v4151_v2 = vsel %vm377_vm3, %v4084_v34, %v4108_v15  ;;  %v4110_v5 = vpop.permute.xlu0 %4109 }
 0xa48   :  { %v4159_v60 = vsel %vm2517_vm15, %v4151_v2, 0.0  ;;  %v4152_v51 = vsel %vm377_vm3, %v4086_v31, %v4110_v5  ;;  %v3526_v22 = vrot.slane %v3525_v7, 2 }
 0xa49   :  { %4172 = vst [vmem:[%s7779_s5 + $0x48] sm:$0xff] %v4159_v60  ;;  %v4160_v49 = vsel %vm2517_vm15, %v4152_v51, 0.0  ;;  %v3749_v51 = vld [vmem:[%s7774_s0 + $0x4e0] sm:$0xff] }
 0xa4a   :  { %4174 = vst [vmem:[%s7779_s5 + $0x58] sm:$0xff] %v4160_v49  ;;  %v3527_v52 = vadd.f32 %v3526_v22, %v3525_v7  ;;  %v3750_v22 = vld [vmem:[%s7774_s0 + $0x4f0] sm:$0xff] }
 0xa4c   :  { %v3528_v33 = vrot.slane %v3527_v52, 1 }
 0xa4e   :  { %v3529_v30 = vadd.f32 %v3528_v33, %v3527_v52  ;;  %v3751_v33 = vld [vmem:[%s7774_s0 + $0x500] ss:$0 sm:$0xff] }
 0xa50   :  { %5794 = vrcp.f32 %v3529_v30 }
 0xa5a   :  { %v5795_v34 = vpop.eup %5794 }
 0xa5b   :  { %v3531_v18 = vmul.f32 %v5795_v34, %v7463_v32  ;;  %v3532_v31 = vmul.f32 %v5795_v34, %v7469_v61  ;;  %v3533_v21 = vmul.f32 %v5795_v34, %v7483_v28  ;;  %v3534_v43 = vmul.f32 %v5795_v34, %v7499_v10 }
 0xa5c   :  { %v3535_v35 = vmul.f32 %v5795_v34, %v7508_v39  ;;  %v3536_v16 = vmul.f32 %v5795_v34, %v7521_v40  ;;  %v3537_v38 = vmul.f32 %v5795_v34, %v7530_v54  ;;  %v3538_v19 = vmul.f32 %v5795_v34, %v5785_v45 }
 0xa5d   :  { %v3543_v14 = vmul.f32 %v3531_v18, %v7330_v50  ;;  %v3544_v53 = vmul.f32 %v7327_v42, %v3532_v31  ;;  %v3545_v15 = vmul.f32 %v3533_v21, %v7338_v55  ;;  %v3546_v32 = vmul.f32 %v7334_v11, %v3534_v43 }
 0xa5e   :  { %v3547_v61 = vmul.f32 %v3535_v35, %v7346_v3  ;;  %v3548_v28 = vmul.f32 %v7342_v9, %v3536_v16  ;;  %v3549_v10 = vmul.f32 %v3537_v38, %v7354_v0  ;;  %v3550_v39 = vmul.f32 %v7350_v59, %v3538_v19 }
 0xa5f   :  { %v5517_v40 = vpack.c.bf16 %v3544_v53, %v3543_v14  ;;  %v5521_v7 = vpack.c.bf16 %v3546_v32, %v3545_v15  ;;  %v3539_v54 = vmul.f32 %v5795_v34, %v5787_v56  ;;  %v3540_v45 = vmul.f32 %v5795_v34, %v5789_v17  ;;  %v3746_v56 = vld [vmem:[%s7774_s0 + $0x4b0] sm:$0xff] }
 0xa60   :  { %v5525_v2 = vpack.c.bf16 %v3548_v28, %v3547_v61  ;;  %v5529_v50 = vpack.c.bf16 %v3550_v39, %v3549_v10  ;;  %v3541_v5 = vmul.f32 %v5795_v34, %v5791_v44  ;;  %v3542_v42 = vmul.f32 %v5795_v34, %v5793_v26  ;;  %v3747_v44 = vld [vmem:[%s7774_s0 + $0x4c0] sm:$0xff]  ;;  %v3748_v26 = vld [vmem:[%s7774_s0 + $0x4d0] sm:$0xff] }
 0xa61   :  { %5518 = vmatprep.subr.bf16.mxu1 %v5517_v40  ;;  %v3551_v55 = vmul.f32 %v3539_v54, %v7362_v36  ;;  %v3552_v11 = vmul.f32 %v7358_v57, %v3540_v45  ;;  %v3743_v36 = vld [vmem:[%s7774_s0 + $0x480] sm:$0xff]  ;;  %v3744_v57 = vld [vmem:[%s7774_s0 + $0x490] sm:$0xff]  ;;  %v5557_v60 = vpack.c.bf16 %v3748_v26, %v3747_v44 }
 0xa62   :  { %5520 = vmatpush3.bf16.msra.mxu1 %v5517_v40  ;;  %v3553_v9 = vmul.f32 %v3541_v5, %v7370_v41  ;;  %v3554_v3 = vmul.f32 %v7366_v8, %v3542_v42  ;;  %v5549_v8 = vpack.c.bf16 %v3744_v57, %v3743_v36  ;;  %v3745_v41 = vld [vmem:[%s7774_s0 + $0x4a0] sm:$0xff]  ;;  %s5884_s0 = smov [#allocation4]  }
 0xa63   :  { %5522 = vmatprep.subr.bf16.mxu1 %v5521_v7  ;;  %v5533_v59 = vpack.c.bf16 %v3552_v11, %v3551_v55  ;;  %v5553_v17 = vpack.c.bf16 %v3746_v56, %v3745_v41  ;;  %s4198_s15 = sshll.u32 %s5884_s0, 4  ;;  %s4199_s15 = int_to_ptr.vmem [resolvable:$true] %s4198_s15 }
 0xa64   :  { %v5537_v0 = vpack.c.bf16 %v3554_v3, %v3553_v9  ;;  %s5828_s18 = scalar_lea.vmem %s4199_s15, 256  ;;  %p5833_p1 = scmp.lt.s32.totalorder %s4199_s15, %s4199_s15 }
 0xa65   :  { %p5829_p0 = scmp.ne.s32.totalorder %s4199_s15, %s5828_s18  ;;  %p5834_p2 = scmp.lt.s32.totalorder %s5828_s18, %s5828_s18 }
 0xa66   :  { %5524 = vmatpush3.bf16.msra.mxu1 %v5521_v7 }
 0xa67   :  { %5526 = vmatprep.subr.bf16.mxu1 %v5525_v2  ;;  %p5835_p3 = por %p5834_p2, %p5833_p1 }
 0xa69   :  { %p5836_p4 = pnand %p5835_p3, %p5829_p0 }
 0xa6a   :  { %5528 = vmatpush3.bf16.msra.mxu1 %v5525_v2 }
 0xa6b   :  { %5530 = vmatprep.subr.bf16.mxu1 %v5529_v50 }
 0xa6e   :  { %5532 = vmatpush3.bf16.msra.mxu1 %v5529_v50 }
 0xa6f   :  { %5534 = vmatprep.subr.bf16.mxu1 %v5533_v59 }
 0xa72   :  { %5536 = vmatpush3.bf16.msra.mxu1 %v5533_v59 }
 0xa73   :  { %5538 = vmatprep.subr.bf16.mxu1 %v5537_v0 }
 0xa76   :  { %5540 = vmatpush3.bf16.msra.mxu1 %v5537_v0 }
 0xa77   :  { %5550 = vmatprep.subr.bf16.mxu1 %v5549_v8 }
 0xa79   :  { %5219 = vmatmul.mubr.msk.f32.vlgmr.msra.gmra.mrb[56].mxu1 %vm2517_vm15, %v7134_v25  ;;  %v5561_v25 = vpack.c.bf16 %v3750_v22, %v3749_v51 }
 0xa7a   :  { %5552 = vmatpush3.bf16.msra.mxu1 %v5549_v8  ;;  %5221 = vmatprep.mubr.msk.f32.mxu1 %vm2517_vm15, %v7137_v23 }
 0xa7b   :  { %5554 = vmatprep.subr.bf16.mxu1 %v5553_v17 }
 0xa7d   :  { %5222 = vmatmul.mubr.msk.f32.gmra.mrb[58].mxu1 %vm2517_vm15, %v7154_v63 }
 0xa7e   :  { %5556 = vmatpush3.bf16.msra.mxu1 %v5553_v17  ;;  %5224 = vmatprep.mubr.msk.f32.mxu1 %vm2517_vm15, %v7157_v62 }
 0xa7f   :  { %5558 = vmatprep.subr.bf16.mxu1 %v5557_v60 }
 0xa81   :  { %5225 = vmatmul.mubr.msk.f32.gmra.mrb[60].mxu1 %vm2517_vm15, %v7173_v37 }
 0xa82   :  { %5560 = vmatpush3.bf16.msra.mxu1 %v5557_v60  ;;  %5227 = vmatprep.mubr.msk.f32.mxu1 %vm2517_vm15, %v7176_v12 }
 0xa83   :  { %5562 = vmatprep.subr.bf16.mxu1 %v5561_v25 }
 0xa85   :  { %5228 = vmatmul.mubr.msk.f32.gmra.mrb[62].mxu1 %vm2517_vm15, %v7184_v13 }
 0xa86   :  { %5564 = vmatpush3.bf16.msra.mxu1 %v5561_v25  ;;  %5257 = vmatprep.mubr.msk.f32.mxu1 %vm235_vm2, %v7233_v27 }
 0xa89   :  { %5258 = vmatmul.mubr.msk.f32.vlgmr.msra.gmra.mrb[64].mxu1 %vm235_vm2, %v7231_v29 }
 0xa8a   :  { %5260 = vmatprep.mubr.msk.f32.mxu1 %vm235_vm2, %v7243_v4 }
 0xa8d   :  { %5261 = vmatmul.mubr.msk.f32.gmra.mrb[66].mxu1 %vm235_vm2, %v7241_v58 }
 0xa8e   :  { %5263 = vmatprep.mubr.msk.f32.mxu1 %vm235_vm2, %v7253_v47 }
 0xa91   :  { %5264 = vmatmul.mubr.msk.f32.gmra.mrb[68].mxu1 %vm235_vm2, %v7250_v20 }
 0xa92   :  { %5266 = vmatprep.mubr.msk.f32.mxu1 %vm235_vm2, %v7267_v6 }
 0xa95   :  { %5267 = vmatmul.mubr.msk.f32.gmra.mrb[70].mxu1 %vm235_vm2, %v7258_v46 }
 0xb4c   :  { %v7669_v23 = vpop.f32.mrb[56].mxu1 }
 0xb4d   :  { %v7671_v63 = vpop.f32.mrb[57].mxu1  ;;  %v3661_v17 = vmax.f32 %v7669_v23, 0.0 }
 0xb4e   :  { %v3660_v26 = vmax.f32 %v7671_v63, 0.0 }
 0xb50   :  { %v7673_v62 = vpop.f32.mrb[58].mxu1 }
 0xb51   :  { %v7675_v37 = vpop.f32.mrb[59].mxu1 }
 0xb52   :  { %v3662_v23 = vmax.f32 %v7675_v37, 0.0 }
 0xb54   :  { %v7677_v12 = vpop.f32.mrb[60].mxu1 }
 0xb55   :  { %v7679_v13 = vpop.f32.mrb[61].mxu1 }
 0xb58   :  { %v7681_v49 = vpop.f32.mrb[62].mxu1 }
 0xb59   :  { %v7683_v52 = vpop.f32.mrb[63].mxu1 }
 0xb5c   :  { %v5259_v30 = vpop.f32.mrb[64].mxu1 }
 0xb5d   :  { %v3848_v34 = vadd.f32 %v5259_v30, %v3751_v33  ;;  %v3842_v18 = vpop.f32.mrb[65].mxu1 }
 0xb5e   :  { %v3843_v31 = vadd.f32 %v3842_v18, %v3751_v33  ;;  %v3663_v18 = vmax.f32 %v7673_v62, 0.0 }
 0xb5f   :  { %v4446_v21 = vmul.f32 -1.442695, %v3848_v34 }
 0xb60   :  { %v4445_v43 = vmul.f32 -1.442695, %v3843_v31  ;;  %v5262_v35 = vpop.f32.mrb[66].mxu1 }
 0xb61   :  { %5796 = vpow2.f32 %v4446_v21  ;;  %v3858_v16 = vadd.f32 %v5262_v35, %v3751_v33  ;;  %v3852_v38 = vpop.f32.mrb[67].mxu1 }
 0xb62   :  { %5798 = vpow2.f32 %v4445_v43  ;;  %v3853_v19 = vadd.f32 %v3852_v38, %v3751_v33 }
 0xb63   :  { %v4448_v14 = vmul.f32 -1.442695, %v3858_v16 }
 0xb64   :  { %v4447_v53 = vmul.f32 -1.442695, %v3853_v19  ;;  %v5265_v15 = vpop.f32.mrb[68].mxu1 }
 0xb65   :  { %5800 = vpow2.f32 %v4448_v14  ;;  %v3868_v32 = vadd.f32 %v5265_v15, %v3751_v33  ;;  %v3862_v61 = vpop.f32.mrb[69].mxu1 }
 0xb66   :  { %5802 = vpow2.f32 %v4447_v53  ;;  %v3863_v28 = vadd.f32 %v3862_v61, %v3751_v33 }
 0xb67   :  { %v4450_v10 = vmul.f32 -1.442695, %v3868_v32  ;;  %v3665_v32 = vmax.f32 %v7677_v12, 0.0  ;;  %v3667_v12 = vmax.f32 %v7681_v49, 0.0 }
 0xb68   :  { %v4449_v39 = vmul.f32 -1.442695, %v3863_v28  ;;  %v5268_v40 = vpop.f32.mrb[70].mxu1  ;;  %v3664_v28 = vmax.f32 %v7679_v13, 0.0 }
 0xb69   :  { %5804 = vpow2.f32 %v4450_v10  ;;  %v3878_v7 = vadd.f32 %v5268_v40, %v3751_v33  ;;  %v3872_v54 = vpop.f32.mrb[71].mxu1 }
 0xb6a   :  { %5806 = vpow2.f32 %v4449_v39  ;;  %v3873_v45 = vadd.f32 %v3872_v54, %v3751_v33 }
 0xb6b   :  { %v5797_v2 = vpop.eup %5796  ;;  %v4452_v50 = vmul.f32 -1.442695, %v3878_v7 }
 0xb6c   :  { %v5799_v5 = vpop.eup %5798  ;;  %v3906_v42 = vadd.f32 1.0, %v5797_v2  ;;  %v4451_v55 = vmul.f32 -1.442695, %v3873_v45 }
 0xb6d   :  { %v3905_v11 = vadd.f32 1.0, %v5799_v5  ;;  %5808 = vpow2.f32 %v4452_v50 }
 0xb6e   :  { %5810 = vrcp.f32 %v3906_v42 }
 0xb6f   :  { %v5801_v9 = vpop.eup %5800  ;;  %5812 = vrcp.f32 %v3905_v11 }
 0xb70   :  { %v5803_v3 = vpop.eup %5802  ;;  %v3908_v59 = vadd.f32 1.0, %v5801_v9  ;;  %5814 = vpow2.f32 %v4451_v55  ;;  %v3666_v9 = vmax.f32 %v7683_v52, 0.0 }
 0xb71   :  { %v3907_v0 = vadd.f32 1.0, %v5803_v3 }
 0xb72   :  { %5816 = vrcp.f32 %v3908_v59 }
 0xb73   :  { %v5805_v36 = vpop.eup %5804  ;;  %5818 = vrcp.f32 %v3907_v0 }
 0xb74   :  { %v5807_v57 = vpop.eup %5806  ;;  %v3910_v8 = vadd.f32 1.0, %v5805_v36 }
 0xb75   :  { %v3909_v41 = vadd.f32 1.0, %v5807_v57 }
 0xb76   :  { %5820 = vrcp.f32 %v3910_v8 }
 0xb77   :  { %v5809_v56 = vpop.eup %5808  ;;  %5822 = vrcp.f32 %v3909_v41 }
 0xb78   :  { %v5811_v44 = vpop.eup %5810  ;;  %v3912_v60 = vadd.f32 1.0, %v5809_v56 }
 0xb79   :  { %v5813_v51 = vpop.eup %5812  ;;  %v3930_v22 = vmul.f32 %v5811_v44, %v3661_v17  ;;  %v3938_v25 = vsub.f32 1.0, %v5811_v44 }
 0xb7a   :  { %v5815_v33 = vpop.eup %5814  ;;  %5824 = vrcp.f32 %v3912_v60  ;;  %v3929_v30 = vmul.f32 %v5813_v51, %v3660_v26  ;;  %v3937_v34 = vsub.f32 1.0, %v5813_v51 }
 0xb7b   :  { %v3911_v31 = vadd.f32 1.0, %v5815_v33  ;;  %v3946_v21 = vmul.f32 %v3938_v25, %v7231_v29 }
 0xb7c   :  { %v5817_v43 = vpop.eup %5816  ;;  %v3945_v35 = vmul.f32 %v3937_v34, %v7233_v27 }
 0xb7d   :  { %v5819_v16 = vpop.eup %5818  ;;  %5826 = vrcp.f32 %v3911_v31  ;;  %v3954_v63 = vadd.f32 %v3946_v21, %v3930_v22  ;;  %v3932_v38 = vmul.f32 %v5817_v43, %v3663_v18  ;;  %v3940_v19 = vsub.f32 1.0, %v5817_v43 }
 0xb7e   :  { %v3953_v14 = vadd.f32 %v3945_v35, %v3929_v30  ;;  %v3931_v53 = vmul.f32 %v5819_v16, %v3662_v23  ;;  %v3939_v15 = vsub.f32 1.0, %v5819_v16 }
 0xb7f   :  { %3973 = vrot.lane.b32.xlu1 %v3954_v63, %s5876_s16  ;;  %v3948_v62 = vmul.f32 %v3940_v19, %v7241_v58 }
 0xb80   :  { %v5821_v61 = vpop.eup %5820  ;;  %3971 = vrot.lane.b32.xlu0 %v3953_v14, %s5876_s16  ;;  %v3947_v37 = vmul.f32 %v3939_v15, %v7243_v4 }
 0xb81   :  { %v5823_v10 = vpop.eup %5822  ;;  %v3956_v39 = vadd.f32 %v3948_v62, %v3932_v38  ;;  %v3934_v40 = vmul.f32 %v5821_v61, %v3665_v32  ;;  %v3942_v7 = vsub.f32 1.0, %v5821_v61 }
 0xb82   :  { %v3955_v54 = vadd.f32 %v3947_v37, %v3931_v53  ;;  %v3933_v45 = vmul.f32 %v5823_v10, %v3664_v28  ;;  %v3941_v2 = vsub.f32 1.0, %v5823_v10 }
 0xb83   :  { %v3950_v50 = vmul.f32 %v3942_v7, %v7250_v20 }
 0xb84   :  { %v5825_v5 = vpop.eup %5824  ;;  %3975 = vrot.lane.b32.xlu1 %v3955_v54, %s5876_s16  ;;  %3977 = vrot.lane.b32.xlu0 %v3956_v39, %s5876_s16  ;;  %v3949_v13 = vmul.f32 %v3941_v2, %v7253_v47 }
 0xb85   :  { %v3958_v42 = vadd.f32 %v3950_v50, %v3934_v40  ;;  %v3936_v55 = vmul.f32 %v5825_v5, %v3667_v12  ;;  %v3944_v11 = vsub.f32 1.0, %v5825_v5 }
 0xb86   :  { %v3957_v3 = vadd.f32 %v3949_v13, %v3933_v45 }
 0xb87   :  { %v5827_v59 = vpop.eup %5826  ;;  %v3952_v0 = vmul.f32 %v3944_v11, %v7258_v46 }
 0xb88   :  { %3979 = vrot.lane.b32.xlu1 %v3957_v3, %s5876_s16  ;;  %3981 = vrot.lane.b32.xlu0 %v3958_v42, %s5876_s16  ;;  %v3935_v49 = vmul.f32 %v5827_v59, %v3666_v9  ;;  %v3943_v36 = vsub.f32 1.0, %v5827_v59 }
 0xb89   :  { %v3960_v57 = vadd.f32 %v3952_v0, %v3936_v55 }
 0xb8a   :  { %v3951_v8 = vmul.f32 %v3943_v36, %v7267_v6 }
 0xb8c   :  { %3985 = vrot.lane.b32.xlu0 %v3960_v57, %s5876_s16  ;;  %v3959_v41 = vadd.f32 %v3951_v8, %v3935_v49 }
 0xb8d   :  { %5839 = shalt.err (!%p5836_p4)
}
 0xb8e   :  { %s5840_s20 = scalar_lea.hbm %s7781_s7, 256 }
 0xb8f   :  { %p5841_p5 = scmp.ne.s32.totalorder %s7781_s7, %s5840_s20  ;;  %p5844_p6 = scmp.lt.u32.totalorder %s5840_s20, %s7781_s7 }
 0xb91   :  { %p5846_p7 = pnand %p5844_p6, %p5841_p5 }
 0xb93   :  { %5849 = shalt.err (!%p5846_p7)
}
 0xb94   :  { %s5885_s24 = smov 128   ;;  %s5886_s25 = smov 8   ;;  %3983 = vrot.lane.b32.xlu1 %v3959_v41, %s5876_s16  ;;  %4113 = vrot.lane.b32.xlu0 %v7958_v24, %s5877_s17  ;;  %v7967_v52 = vld [vmem:[#allocation15_spill] sm:$0xff] }
 0xb95   :  { %4204 = dma.vmem_to_hbm [thread:$0]  %s4199_s15, 256, %s7781_s7, [#allocation5], %s5885_s24, %s5885_s24, %s5886_s25  }
 0xb96   :  { %s5887_s7 = smov [#allocation2]  }
 0xb97   :  { %s4186_s16 = sshll.u32 %s5887_s7, 4  ;;  %s4187_s16 = int_to_ptr.vmem [resolvable:$true] %s4186_s16 }
 0xb98   :  { %4111 = vrot.lane.b32.xlu1 %v7967_v52, %s5877_s17  ;;  %s5850_s17 = scalar_lea.vmem %s4187_s16, 1024  ;;  %p5855_p9 = scmp.lt.s32.totalorder %s4187_s16, %s4187_s16 }
 0xb99   :  { %p5851_p8 = scmp.ne.s32.totalorder %s4187_s16, %s5850_s17  ;;  %p5856_p10 = scmp.lt.s32.totalorder %s5850_s17, %s5850_s17 }
 0xb9b   :  { %p5857_p11 = por %p5856_p10, %p5855_p9 }
 0xb9d   :  { %p5858_p12 = pnand %p5857_p11, %p5851_p8 }
 0xbf1   :  { %v3974_v56 = vpop.permute.xlu1 %3973 }
 0xbf2   :  { %v3996_v17 = vsel %vm235_vm2, %v7231_v29, %v3974_v56  ;;  %v3972_v44 = vpop.permute.xlu0 %3971 }
 0xbf3   :  { %4004 = vst [vmem:[#allocation2 + $0x8] sm:$0xff] %v3996_v17  ;;  %v3995_v26 = vsel %vm235_vm2, %v7233_v27, %v3972_v44 }
 0xbf4   :  { %4003 = vst [vmem:[#allocation2] sm:$0xff] %v3995_v26 }
 0xbf6   :  { %v3976_v60 = vpop.permute.xlu1 %3975  ;;  %v3978_v51 = vpop.permute.xlu0 %3977 }
 0xbf7   :  { %v3997_v22 = vsel %vm235_vm2, %v7243_v4, %v3976_v60  ;;  %v3998_v24 = vsel %vm235_vm2, %v7241_v58, %v3978_v51 }
 0xbf8   :  { %4005 = vst [vmem:[#allocation2 + $0x10] sm:$0xff] %v3997_v22  ;;  %4006 = vst [vmem:[#allocation2 + $0x18] sm:$0xff] %v3998_v24 }
 0xbfa   :  { %v3980_v25 = vpop.permute.xlu1 %3979  ;;  %v3982_v33 = vpop.permute.xlu0 %3981 }
 0xbfb   :  { %v3999_v29 = vsel %vm235_vm2, %v7253_v47, %v3980_v25  ;;  %v4000_v30 = vsel %vm235_vm2, %v7250_v20, %v3982_v33 }
 0xbfc   :  { %4007 = vst [vmem:[#allocation2 + $0x20] sm:$0xff] %v3999_v29  ;;  %4008 = vst [vmem:[#allocation2 + $0x28] sm:$0xff] %v4000_v30 }
 0xbfe   :  { %v3986_v27 = vpop.permute.xlu0 %3985 }
 0xbff   :  { %v4002_v4 = vsel %vm235_vm2, %v7258_v46, %v3986_v27 }
 0xc00   :  { %4010 = vst [vmem:[#allocation2 + $0x38] sm:$0xff] %v4002_v4 }
 0xc06   :  { %v3984_v34 = vpop.permute.xlu1 %3983  ;;  %v4114_v18 = vpop.permute.xlu0 %4113 }
 0xc07   :  { %v4001_v58 = vsel %vm235_vm2, %v7267_v6, %v3984_v34  ;;  %v4154_v47 = vsel %vm377_vm3, %v7554_v1, %v4114_v18 }
 0xc08   :  { %4009 = vst [vmem:[#allocation2 + $0x30] sm:$0xff] %v4001_v58 }
 0xc09   :  { %5861 = shalt.err (!%p5858_p12)
}
 0xc0a   :  { %s5862_s30 = scalar_lea.hbm %s7780_s6, 1024 }
 0xc0b   :  { %p5863_p13 = scmp.ne.s32.totalorder %s7780_s6, %s5862_s30  ;;  %p5866_p0 = scmp.lt.u32.totalorder %s5862_s30, %s7780_s6 }
 0xc0d   :  { %p5868_p1 = pnand %p5866_p0, %p5863_p13 }
 0xc0f   :  { %5871 = shalt.err (!%p5868_p1)
}
 0xc10   :  { %4192 = dma.vmem_to_hbm [thread:$0]  %s4187_s16, 1024, %s7780_s6, [#allocation3], %s5885_s24, %s5885_s24, %s5886_s25   ;;  %v4112_v20 = vpop.permute.xlu1 %4111  ;;  %v4162_v46 = vsel %vm2517_vm15, %v4154_v47, 0.0 }
 0xc11   :  { %v4153_v6 = vsel %vm377_vm3, %v7548_v48, %v4112_v20  ;;  %4178 = vst [vmem:[%s7779_s5 + $0x78] sm:$0xff] %v4162_v46 }
 0xc12   :  { %v4161_v1 = vsel %vm2517_vm15, %v4153_v6, 0.0 }
 0xc13   :  { %4176 = vst [vmem:[%s7779_s5 + $0x68] sm:$0xff] %v4161_v1 }
 0xc14   :  { %5872 = dma.done.wait [#allocation3], 1024  }
 0xc15   :  { %5873 = vsyncadd [#allocation3], 4294966272 }
 0xc16   :  { %5874 = dma.done.wait [#allocation5], 256  }
 0xc17   :  { %5875 = vsyncadd [#allocation5], 4294967040 }
 0xc18   :  { %4213 = vsyncpa [#allocation3], 1 }
 0xc19   :  { %4214 = vsyncpa [#allocation5], 1 }

</bundles_post_ra>
